<compile_context>
chip_gen: v6e
topology: v6e:2x2x1
jax: 0.10.0
libtpu: 0.0.40
codegen_flags: <defaults>
</compile_context>

<pallas_src>
import jax
import jax.numpy as jnp
from jax import lax
from jax.experimental import pallas as pl
from jax.experimental.pallas import tpu as pltpu

# static architecture constants (from the module __init__)
C0, C1, C2, C3 = 1, 3, 3, 1
K1, K2, K3 = 16, 16, 3
S3 = 2          # stride of conv3

R = 8           # fold rows per channel (maps to sublanes)
HALO = 128      # lane-aligned halo width (>= max kernel size - 1)

# flat parameter layout inside the single SMEM array
W1_OFF = 0
W2_OFF = W1_OFF + C1 * C0 * K1          # 48
W3_OFF = W2_OFF + C2 * C1 * K2          # 192
B1_OFF = W3_OFF + C3 * C2 * K3          # 201
B2_OFF = B1_OFF + C1                    # 204
B3_OFF = B2_OFF + C2                    # 207
N_PARAMS = B3_OFF + C3                  # 208


def _conv_taps(src_ref, params_ref, c_in, c_out, ksize, w_off, b_off):
    """One 'valid' stride-1 Conv1d on the row-folded layout (pre-activation).

    src_ref: (c_in, R+1, cols) VMEM ref; row r holds seq[r*cols:(r+1)*cols],
    row R is all zeros (halo row).  Returns c_out (R, cols) f32 accumulators.
    """
    cols = src_ref.shape[-1]
    ext = cols + HALO
    accs = [jnp.full((R, cols), params_ref[b_off + co], jnp.float32)
            for co in range(c_out)]
    for ci in range(c_in):
        base = src_ref[ci, 0:R, :]                         # (R, cols), 1 load
        halo = src_ref[ci, 1:R + 1, 0:HALO]                # next-row halo
        ext_row = jnp.concatenate([base, halo], axis=1)    # (R, cols + HALO)
        for k in range(ksize):
            if k == 0:
                shifted = base
            else:
                # in-register shift: shifted[r, c] = seq[r*cols + c + k]
                shifted = pltpu.roll(ext_row, shift=ext - k, axis=1)[:, :cols]
            for co in range(c_out):
                w = params_ref[w_off + (co * c_in + ci) * ksize + k]
                accs[co] = accs[co] + w * shifted
    return accs


def fused_kernel(params_ref, x_ref, o_ref, v2_ref, v4_ref):
    """params_ref: (N_PARAMS,) f32 SMEM.  x_ref: (C0, R+1, cols) VMEM fold.
    o_ref: (C3, R, cols) stride-1 conv3 result (::2 subsample in the wrapper).
    v2_ref / v4_ref: (C, R+1, cols) VMEM scratch for the tanh'd intermediates."""
    cols = x_ref.shape[-1]
    zero_row = jnp.zeros((1, cols), jnp.float32)

    # ---- conv1 + tanh -> v2 ----
    accs = _conv_taps(x_ref, params_ref, C0, C1, K1, W1_OFF, B1_OFF)
    for co in range(C1):
        v2_ref[co, 0:R, :] = jnp.tanh(accs[co])
        v2_ref[co, R:R + 1, :] = zero_row          # keep halo row defined

    # ---- conv2 + tanh -> v4 ----
    accs = _conv_taps(v2_ref, params_ref, C1, C2, K2, W2_OFF, B2_OFF)
    for co in range(C2):
        v4_ref[co, 0:R, :] = jnp.tanh(accs[co])
        v4_ref[co, R:R + 1, :] = zero_row

    # ---- conv3 (stride 1 here; stride-2 subsample is wrapper slicing glue) ----
    accs = _conv_taps(v4_ref, params_ref, C2, C3, K3, W3_OFF, B3_OFF)
    o_ref[0, :, :] = accs[0]


def _round_up(n, m):
    return -(-n // m) * m


def _model_tanh_forward(x, params):
    """x: (1, 1, L) float32, PyTorch NCW layout. Returns (1, 1, L3)."""
    w1, b1, w2, b2, w3, b3 = params
    n, c_in, L = x.shape
    assert n == 1 and c_in == C0
    L1 = L - K1 + 1
    L2 = L1 - K2 + 1
    assert L2 >= K3, "sequence too short for conv3"
    L3 = (L2 - K3) // S3 + 1

    cols = _round_up(_round_up(L, R) // R, 128)    # lanes per fold row
    total = (R + 1) * cols                         # + one zero halo row

    x_seq = x.reshape(L).astype(jnp.float32)
    x_fold = jnp.pad(x_seq, (0, total - L)).reshape(C0, R + 1, cols)

    packed = jnp.concatenate([
        w1.reshape(-1), w2.reshape(-1), w3.reshape(-1),
        b1.reshape(-1), b2.reshape(-1), b3.reshape(-1),
    ]).astype(jnp.float32)
    assert packed.shape[0] == N_PARAMS

    smem = pl.BlockSpec(memory_space=pltpu.MemorySpace.SMEM)
    vmem = pl.BlockSpec(memory_space=pltpu.MemorySpace.VMEM)

    out_fold = pl.pallas_call(
        fused_kernel,
        out_shape=jax.ShapeDtypeStruct((C3, R, cols), jnp.float32),
        in_specs=[smem, vmem],
        out_specs=vmem,
        scratch_shapes=[
            pltpu.VMEM((C1, R + 1, cols), jnp.float32),
            pltpu.VMEM((C2, R + 1, cols), jnp.float32),
        ],
    )(packed, x_fold)

    # TODO(synk): stride-2 decimation stays in the wrapper (Mosaic has no
    # strided lane loads); a polyphase in-kernel layout would remove this op.
    out_seq = out_fold.reshape(C3, R * cols)
    out = out_seq[:, ::S3][:, :L3]
    return out.reshape(1, C3, L3)


model_tanh_forward = jax.jit(_model_tanh_forward)


def reference_forward(x, params):
    """Pure-JAX reference (lax convolutions) for verification."""
    w1, b1, w2, b2, w3, b3 = params
    dn = ('NCH', 'OIH', 'NCH')  # 1-D conv, NCW layout

    def conv(v, w, b, stride):
        y = lax.conv_general_dilated(v, w, (stride,), 'VALID',
                                     dimension_numbers=dn,
                                     precision=lax.Precision.HIGHEST)
        return y + b.reshape(1, -1, 1)

    v2 = jnp.tanh(conv(x, w1, b1, 1))
    v4 = jnp.tanh(conv(v2, w2, b2, 1))
    return conv(v4, w3, b3, S3)


def init_params(key):
    """Deterministic synthetic parameters with Conv1d-shaped tensors."""
    ks = jax.random.split(key, 6)

    def u(k, shape, fan_in):
        bound = 1.0 / jnp.sqrt(jnp.float32(fan_in))
        return jax.random.uniform(k, shape, jnp.float32, -bound, bound)

    w1 = u(ks[0], (C1, C0, K1), C0 * K1)
    b1 = u(ks[1], (C1,), C0 * K1)
    w2 = u(ks[2], (C2, C1, K2), C1 * K2)
    b2 = u(ks[3], (C2,), C1 * K2)
    w3 = u(ks[4], (C3, C2, K3), C2 * K3)
    b3 = u(ks[5], (C3,), C2 * K3)
    return (w1, b1, w2, b2, w3, b3)


if __name__ == "__main__":
    key = jax.random.PRNGKey(0)
    k_x, k_p = jax.random.split(key)

    L = 512  # small stand-in for the 4024-long sequence in the original test
    x = jax.random.normal(k_x, (1, 1, L), jnp.float32)
    params = init_params(k_p)

    out = model_tanh_forward(x, params)
    out = jax.block_until_ready(out)

    ref = jax.block_until_ready(reference_forward(x, params))
    assert out.shape == ref.shape, (out.shape, ref.shape)
    assert jnp.allclose(out, ref, atol=1e-5, rtol=1e-5), float(
        jnp.max(jnp.abs(out - ref)))

    print("KERNEL_OK")
</pallas_src>

<mosaic_0001>
module attributes {stable_mosaic.version = 11 : i64} {
  func.func @fused_kernel(%arg0: memref<208xf32, #tpu.memory_space<smem>>, %arg1: memref<1x9x128xf32, #tpu.memory_space<vmem>>, %arg2: memref<1x8x128xf32, #tpu.memory_space<vmem>>, %arg3: memref<3x9x128xf32, #tpu.memory_space<vmem>>, %arg4: memref<3x9x128xf32, #tpu.memory_space<vmem>>) attributes {dimension_semantics = [], scalar_prefetch = 0 : i64, scratch_operands = 2 : i64, tpu.core_type = #tpu.core_type<tc>} {
    %cst = arith.constant 0.000000e+00 : f32
    %0 = vector.broadcast %cst : f32 to vector<1x128xf32>
    %c201 = arith.constant 201 : index
    %1 = memref.load %arg0[%c201] : memref<208xf32, #tpu.memory_space<smem>>
    %2 = vector.broadcast %1 : f32 to vector<8x128xf32>
    %c202 = arith.constant 202 : index
    %3 = memref.load %arg0[%c202] : memref<208xf32, #tpu.memory_space<smem>>
    %4 = vector.broadcast %3 : f32 to vector<8x128xf32>
    %c203 = arith.constant 203 : index
    %5 = memref.load %arg0[%c203] : memref<208xf32, #tpu.memory_space<smem>>
    %6 = vector.broadcast %5 : f32 to vector<8x128xf32>
    %c0 = arith.constant 0 : index
    %c0_0 = arith.constant 0 : index
    %c0_1 = arith.constant 0 : index
    %7 = vector.load %arg1[%c0, %c0_0, %c0_1] : memref<1x9x128xf32, #tpu.memory_space<vmem>>, vector<1x8x128xf32>
    %8 = vector.shape_cast %7 : vector<1x8x128xf32> to vector<8x128xf32>
    %c0_2 = arith.constant 0 : index
    %c1 = arith.constant 1 : index
    %c0_3 = arith.constant 0 : index
    %9 = vector.load %arg1[%c0_2, %c1, %c0_3] : memref<1x9x128xf32, #tpu.memory_space<vmem>>, vector<1x8x128xf32>
    %10 = vector.shape_cast %9 : vector<1x8x128xf32> to vector<8x128xf32>
    %11 = tpu.concatenate %8, %10 in 1 : vector<8x128xf32>, vector<8x128xf32> -> vector<8x256xf32>
    %c0_4 = arith.constant 0 : index
    %12 = memref.load %arg0[%c0_4] : memref<208xf32, #tpu.memory_space<smem>>
    %13 = vector.broadcast %12 : f32 to vector<8x128xf32>
    %14 = arith.mulf %13, %8 : vector<8x128xf32>
    %15 = arith.addf %2, %14 : vector<8x128xf32>
    %c16 = arith.constant 16 : index
    %16 = memref.load %arg0[%c16] : memref<208xf32, #tpu.memory_space<smem>>
    %17 = vector.broadcast %16 : f32 to vector<8x128xf32>
    %18 = arith.mulf %17, %8 : vector<8x128xf32>
    %19 = arith.addf %4, %18 : vector<8x128xf32>
    %c32 = arith.constant 32 : index
    %20 = memref.load %arg0[%c32] : memref<208xf32, #tpu.memory_space<smem>>
    %21 = vector.broadcast %20 : f32 to vector<8x128xf32>
    %22 = arith.mulf %21, %8 : vector<8x128xf32>
    %23 = arith.addf %6, %22 : vector<8x128xf32>
    %c255_i32 = arith.constant 255 : i32
    %24 = tpu.dynamic_rotate %11 by %c255_i32 dim 1 : vector<8x256xf32>, i32 -> vector<8x256xf32>
    %25 = vector.extract_strided_slice %24 {offsets = [0, 0], sizes = [8, 128], strides = [1, 1]} : vector<8x256xf32> to vector<8x128xf32>
    %c1_5 = arith.constant 1 : index
    %26 = memref.load %arg0[%c1_5] : memref<208xf32, #tpu.memory_space<smem>>
    %27 = vector.broadcast %26 : f32 to vector<8x128xf32>
    %28 = arith.mulf %27, %25 : vector<8x128xf32>
    %29 = arith.addf %15, %28 : vector<8x128xf32>
    %c17 = arith.constant 17 : index
    %30 = memref.load %arg0[%c17] : memref<208xf32, #tpu.memory_space<smem>>
    %31 = vector.broadcast %30 : f32 to vector<8x128xf32>
    %32 = arith.mulf %31, %25 : vector<8x128xf32>
    %33 = arith.addf %19, %32 : vector<8x128xf32>
    %c33 = arith.constant 33 : index
    %34 = memref.load %arg0[%c33] : memref<208xf32, #tpu.memory_space<smem>>
    %35 = vector.broadcast %34 : f32 to vector<8x128xf32>
    %36 = arith.mulf %35, %25 : vector<8x128xf32>
    %37 = arith.addf %23, %36 : vector<8x128xf32>
    %c254_i32 = arith.constant 254 : i32
    %38 = tpu.dynamic_rotate %11 by %c254_i32 dim 1 : vector<8x256xf32>, i32 -> vector<8x256xf32>
    %39 = vector.extract_strided_slice %38 {offsets = [0, 0], sizes = [8, 128], strides = [1, 1]} : vector<8x256xf32> to vector<8x128xf32>
    %c2 = arith.constant 2 : index
    %40 = memref.load %arg0[%c2] : memref<208xf32, #tpu.memory_space<smem>>
    %41 = vector.broadcast %40 : f32 to vector<8x128xf32>
    %42 = arith.mulf %41, %39 : vector<8x128xf32>
    %43 = arith.addf %29, %42 : vector<8x128xf32>
    %c18 = arith.constant 18 : index
    %44 = memref.load %arg0[%c18] : memref<208xf32, #tpu.memory_space<smem>>
    %45 = vector.broadcast %44 : f32 to vector<8x128xf32>
    %46 = arith.mulf %45, %39 : vector<8x128xf32>
    %47 = arith.addf %33, %46 : vector<8x128xf32>
    %c34 = arith.constant 34 : index
    %48 = memref.load %arg0[%c34] : memref<208xf32, #tpu.memory_space<smem>>
    %49 = vector.broadcast %48 : f32 to vector<8x128xf32>
    %50 = arith.mulf %49, %39 : vector<8x128xf32>
    %51 = arith.addf %37, %50 : vector<8x128xf32>
    %c253_i32 = arith.constant 253 : i32
    %52 = tpu.dynamic_rotate %11 by %c253_i32 dim 1 : vector<8x256xf32>, i32 -> vector<8x256xf32>
    %53 = vector.extract_strided_slice %52 {offsets = [0, 0], sizes = [8, 128], strides = [1, 1]} : vector<8x256xf32> to vector<8x128xf32>
    %c3 = arith.constant 3 : index
    %54 = memref.load %arg0[%c3] : memref<208xf32, #tpu.memory_space<smem>>
    %55 = vector.broadcast %54 : f32 to vector<8x128xf32>
    %56 = arith.mulf %55, %53 : vector<8x128xf32>
    %57 = arith.addf %43, %56 : vector<8x128xf32>
    %c19 = arith.constant 19 : index
    %58 = memref.load %arg0[%c19] : memref<208xf32, #tpu.memory_space<smem>>
    %59 = vector.broadcast %58 : f32 to vector<8x128xf32>
    %60 = arith.mulf %59, %53 : vector<8x128xf32>
    %61 = arith.addf %47, %60 : vector<8x128xf32>
    %c35 = arith.constant 35 : index
    %62 = memref.load %arg0[%c35] : memref<208xf32, #tpu.memory_space<smem>>
    %63 = vector.broadcast %62 : f32 to vector<8x128xf32>
    %64 = arith.mulf %63, %53 : vector<8x128xf32>
    %65 = arith.addf %51, %64 : vector<8x128xf32>
    %c252_i32 = arith.constant 252 : i32
    %66 = tpu.dynamic_rotate %11 by %c252_i32 dim 1 : vector<8x256xf32>, i32 -> vector<8x256xf32>
    %67 = vector.extract_strided_slice %66 {offsets = [0, 0], sizes = [8, 128], strides = [1, 1]} : vector<8x256xf32> to vector<8x128xf32>
    %c4 = arith.constant 4 : index
    %68 = memref.load %arg0[%c4] : memref<208xf32, #tpu.memory_space<smem>>
    %69 = vector.broadcast %68 : f32 to vector<8x128xf32>
    %70 = arith.mulf %69, %67 : vector<8x128xf32>
    %71 = arith.addf %57, %70 : vector<8x128xf32>
    %c20 = arith.constant 20 : index
    %72 = memref.load %arg0[%c20] : memref<208xf32, #tpu.memory_space<smem>>
    %73 = vector.broadcast %72 : f32 to vector<8x128xf32>
    %74 = arith.mulf %73, %67 : vector<8x128xf32>
    %75 = arith.addf %61, %74 : vector<8x128xf32>
    %c36 = arith.constant 36 : index
    %76 = memref.load %arg0[%c36] : memref<208xf32, #tpu.memory_space<smem>>
    %77 = vector.broadcast %76 : f32 to vector<8x128xf32>
    %78 = arith.mulf %77, %67 : vector<8x128xf32>
    %79 = arith.addf %65, %78 : vector<8x128xf32>
    %c251_i32 = arith.constant 251 : i32
    %80 = tpu.dynamic_rotate %11 by %c251_i32 dim 1 : vector<8x256xf32>, i32 -> vector<8x256xf32>
    %81 = vector.extract_strided_slice %80 {offsets = [0, 0], sizes = [8, 128], strides = [1, 1]} : vector<8x256xf32> to vector<8x128xf32>
    %c5 = arith.constant 5 : index
    %82 = memref.load %arg0[%c5] : memref<208xf32, #tpu.memory_space<smem>>
    %83 = vector.broadcast %82 : f32 to vector<8x128xf32>
    %84 = arith.mulf %83, %81 : vector<8x128xf32>
    %85 = arith.addf %71, %84 : vector<8x128xf32>
    %c21 = arith.constant 21 : index
    %86 = memref.load %arg0[%c21] : memref<208xf32, #tpu.memory_space<smem>>
    %87 = vector.broadcast %86 : f32 to vector<8x128xf32>
    %88 = arith.mulf %87, %81 : vector<8x128xf32>
    %89 = arith.addf %75, %88 : vector<8x128xf32>
    %c37 = arith.constant 37 : index
    %90 = memref.load %arg0[%c37] : memref<208xf32, #tpu.memory_space<smem>>
    %91 = vector.broadcast %90 : f32 to vector<8x128xf32>
    %92 = arith.mulf %91, %81 : vector<8x128xf32>
    %93 = arith.addf %79, %92 : vector<8x128xf32>
    %c250_i32 = arith.constant 250 : i32
    %94 = tpu.dynamic_rotate %11 by %c250_i32 dim 1 : vector<8x256xf32>, i32 -> vector<8x256xf32>
    %95 = vector.extract_strided_slice %94 {offsets = [0, 0], sizes = [8, 128], strides = [1, 1]} : vector<8x256xf32> to vector<8x128xf32>
    %c6 = arith.constant 6 : index
    %96 = memref.load %arg0[%c6] : memref<208xf32, #tpu.memory_space<smem>>
    %97 = vector.broadcast %96 : f32 to vector<8x128xf32>
    %98 = arith.mulf %97, %95 : vector<8x128xf32>
    %99 = arith.addf %85, %98 : vector<8x128xf32>
    %c22 = arith.constant 22 : index
    %100 = memref.load %arg0[%c22] : memref<208xf32, #tpu.memory_space<smem>>
    %101 = vector.broadcast %100 : f32 to vector<8x128xf32>
    %102 = arith.mulf %101, %95 : vector<8x128xf32>
    %103 = arith.addf %89, %102 : vector<8x128xf32>
    %c38 = arith.constant 38 : index
    %104 = memref.load %arg0[%c38] : memref<208xf32, #tpu.memory_space<smem>>
    %105 = vector.broadcast %104 : f32 to vector<8x128xf32>
    %106 = arith.mulf %105, %95 : vector<8x128xf32>
    %107 = arith.addf %93, %106 : vector<8x128xf32>
    %c249_i32 = arith.constant 249 : i32
    %108 = tpu.dynamic_rotate %11 by %c249_i32 dim 1 : vector<8x256xf32>, i32 -> vector<8x256xf32>
    %109 = vector.extract_strided_slice %108 {offsets = [0, 0], sizes = [8, 128], strides = [1, 1]} : vector<8x256xf32> to vector<8x128xf32>
    %c7 = arith.constant 7 : index
    %110 = memref.load %arg0[%c7] : memref<208xf32, #tpu.memory_space<smem>>
    %111 = vector.broadcast %110 : f32 to vector<8x128xf32>
    %112 = arith.mulf %111, %109 : vector<8x128xf32>
    %113 = arith.addf %99, %112 : vector<8x128xf32>
    %c23 = arith.constant 23 : index
    %114 = memref.load %arg0[%c23] : memref<208xf32, #tpu.memory_space<smem>>
    %115 = vector.broadcast %114 : f32 to vector<8x128xf32>
    %116 = arith.mulf %115, %109 : vector<8x128xf32>
    %117 = arith.addf %103, %116 : vector<8x128xf32>
    %c39 = arith.constant 39 : index
    %118 = memref.load %arg0[%c39] : memref<208xf32, #tpu.memory_space<smem>>
    %119 = vector.broadcast %118 : f32 to vector<8x128xf32>
    %120 = arith.mulf %119, %109 : vector<8x128xf32>
    %121 = arith.addf %107, %120 : vector<8x128xf32>
    %c248_i32 = arith.constant 248 : i32
    %122 = tpu.dynamic_rotate %11 by %c248_i32 dim 1 : vector<8x256xf32>, i32 -> vector<8x256xf32>
    %123 = vector.extract_strided_slice %122 {offsets = [0, 0], sizes = [8, 128], strides = [1, 1]} : vector<8x256xf32> to vector<8x128xf32>
    %c8 = arith.constant 8 : index
    %124 = memref.load %arg0[%c8] : memref<208xf32, #tpu.memory_space<smem>>
    %125 = vector.broadcast %124 : f32 to vector<8x128xf32>
    %126 = arith.mulf %125, %123 : vector<8x128xf32>
    %127 = arith.addf %113, %126 : vector<8x128xf32>
    %c24 = arith.constant 24 : index
    %128 = memref.load %arg0[%c24] : memref<208xf32, #tpu.memory_space<smem>>
    %129 = vector.broadcast %128 : f32 to vector<8x128xf32>
    %130 = arith.mulf %129, %123 : vector<8x128xf32>
    %131 = arith.addf %117, %130 : vector<8x128xf32>
    %c40 = arith.constant 40 : index
    %132 = memref.load %arg0[%c40] : memref<208xf32, #tpu.memory_space<smem>>
    %133 = vector.broadcast %132 : f32 to vector<8x128xf32>
    %134 = arith.mulf %133, %123 : vector<8x128xf32>
    %135 = arith.addf %121, %134 : vector<8x128xf32>
    %c247_i32 = arith.constant 247 : i32
    %136 = tpu.dynamic_rotate %11 by %c247_i32 dim 1 : vector<8x256xf32>, i32 -> vector<8x256xf32>
    %137 = vector.extract_strided_slice %136 {offsets = [0, 0], sizes = [8, 128], strides = [1, 1]} : vector<8x256xf32> to vector<8x128xf32>
    %c9 = arith.constant 9 : index
    %138 = memref.load %arg0[%c9] : memref<208xf32, #tpu.memory_space<smem>>
    %139 = vector.broadcast %138 : f32 to vector<8x128xf32>
    %140 = arith.mulf %139, %137 : vector<8x128xf32>
    %141 = arith.addf %127, %140 : vector<8x128xf32>
    %c25 = arith.constant 25 : index
    %142 = memref.load %arg0[%c25] : memref<208xf32, #tpu.memory_space<smem>>
    %143 = vector.broadcast %142 : f32 to vector<8x128xf32>
    %144 = arith.mulf %143, %137 : vector<8x128xf32>
    %145 = arith.addf %131, %144 : vector<8x128xf32>
    %c41 = arith.constant 41 : index
    %146 = memref.load %arg0[%c41] : memref<208xf32, #tpu.memory_space<smem>>
    %147 = vector.broadcast %146 : f32 to vector<8x128xf32>
    %148 = arith.mulf %147, %137 : vector<8x128xf32>
    %149 = arith.addf %135, %148 : vector<8x128xf32>
    %c246_i32 = arith.constant 246 : i32
    %150 = tpu.dynamic_rotate %11 by %c246_i32 dim 1 : vector<8x256xf32>, i32 -> vector<8x256xf32>
    %151 = vector.extract_strided_slice %150 {offsets = [0, 0], sizes = [8, 128], strides = [1, 1]} : vector<8x256xf32> to vector<8x128xf32>
    %c10 = arith.constant 10 : index
    %152 = memref.load %arg0[%c10] : memref<208xf32, #tpu.memory_space<smem>>
    %153 = vector.broadcast %152 : f32 to vector<8x128xf32>
    %154 = arith.mulf %153, %151 : vector<8x128xf32>
    %155 = arith.addf %141, %154 : vector<8x128xf32>
    %c26 = arith.constant 26 : index
    %156 = memref.load %arg0[%c26] : memref<208xf32, #tpu.memory_space<smem>>
    %157 = vector.broadcast %156 : f32 to vector<8x128xf32>
    %158 = arith.mulf %157, %151 : vector<8x128xf32>
    %159 = arith.addf %145, %158 : vector<8x128xf32>
    %c42 = arith.constant 42 : index
    %160 = memref.load %arg0[%c42] : memref<208xf32, #tpu.memory_space<smem>>
    %161 = vector.broadcast %160 : f32 to vector<8x128xf32>
    %162 = arith.mulf %161, %151 : vector<8x128xf32>
    %163 = arith.addf %149, %162 : vector<8x128xf32>
    %c245_i32 = arith.constant 245 : i32
    %164 = tpu.dynamic_rotate %11 by %c245_i32 dim 1 : vector<8x256xf32>, i32 -> vector<8x256xf32>
    %165 = vector.extract_strided_slice %164 {offsets = [0, 0], sizes = [8, 128], strides = [1, 1]} : vector<8x256xf32> to vector<8x128xf32>
    %c11 = arith.constant 11 : index
    %166 = memref.load %arg0[%c11] : memref<208xf32, #tpu.memory_space<smem>>
    %167 = vector.broadcast %166 : f32 to vector<8x128xf32>
    %168 = arith.mulf %167, %165 : vector<8x128xf32>
    %169 = arith.addf %155, %168 : vector<8x128xf32>
    %c27 = arith.constant 27 : index
    %170 = memref.load %arg0[%c27] : memref<208xf32, #tpu.memory_space<smem>>
    %171 = vector.broadcast %170 : f32 to vector<8x128xf32>
    %172 = arith.mulf %171, %165 : vector<8x128xf32>
    %173 = arith.addf %159, %172 : vector<8x128xf32>
    %c43 = arith.constant 43 : index
    %174 = memref.load %arg0[%c43] : memref<208xf32, #tpu.memory_space<smem>>
    %175 = vector.broadcast %174 : f32 to vector<8x128xf32>
    %176 = arith.mulf %175, %165 : vector<8x128xf32>
    %177 = arith.addf %163, %176 : vector<8x128xf32>
    %c244_i32 = arith.constant 244 : i32
    %178 = tpu.dynamic_rotate %11 by %c244_i32 dim 1 : vector<8x256xf32>, i32 -> vector<8x256xf32>
    %179 = vector.extract_strided_slice %178 {offsets = [0, 0], sizes = [8, 128], strides = [1, 1]} : vector<8x256xf32> to vector<8x128xf32>
    %c12 = arith.constant 12 : index
    %180 = memref.load %arg0[%c12] : memref<208xf32, #tpu.memory_space<smem>>
    %181 = vector.broadcast %180 : f32 to vector<8x128xf32>
    %182 = arith.mulf %181, %179 : vector<8x128xf32>
    %183 = arith.addf %169, %182 : vector<8x128xf32>
    %c28 = arith.constant 28 : index
    %184 = memref.load %arg0[%c28] : memref<208xf32, #tpu.memory_space<smem>>
    %185 = vector.broadcast %184 : f32 to vector<8x128xf32>
    %186 = arith.mulf %185, %179 : vector<8x128xf32>
    %187 = arith.addf %173, %186 : vector<8x128xf32>
    %c44 = arith.constant 44 : index
    %188 = memref.load %arg0[%c44] : memref<208xf32, #tpu.memory_space<smem>>
    %189 = vector.broadcast %188 : f32 to vector<8x128xf32>
    %190 = arith.mulf %189, %179 : vector<8x128xf32>
    %191 = arith.addf %177, %190 : vector<8x128xf32>
    %c243_i32 = arith.constant 243 : i32
    %192 = tpu.dynamic_rotate %11 by %c243_i32 dim 1 : vector<8x256xf32>, i32 -> vector<8x256xf32>
    %193 = vector.extract_strided_slice %192 {offsets = [0, 0], sizes = [8, 128], strides = [1, 1]} : vector<8x256xf32> to vector<8x128xf32>
    %c13 = arith.constant 13 : index
    %194 = memref.load %arg0[%c13] : memref<208xf32, #tpu.memory_space<smem>>
    %195 = vector.broadcast %194 : f32 to vector<8x128xf32>
    %196 = arith.mulf %195, %193 : vector<8x128xf32>
    %197 = arith.addf %183, %196 : vector<8x128xf32>
    %c29 = arith.constant 29 : index
    %198 = memref.load %arg0[%c29] : memref<208xf32, #tpu.memory_space<smem>>
    %199 = vector.broadcast %198 : f32 to vector<8x128xf32>
    %200 = arith.mulf %199, %193 : vector<8x128xf32>
    %201 = arith.addf %187, %200 : vector<8x128xf32>
    %c45 = arith.constant 45 : index
    %202 = memref.load %arg0[%c45] : memref<208xf32, #tpu.memory_space<smem>>
    %203 = vector.broadcast %202 : f32 to vector<8x128xf32>
    %204 = arith.mulf %203, %193 : vector<8x128xf32>
    %205 = arith.addf %191, %204 : vector<8x128xf32>
    %c242_i32 = arith.constant 242 : i32
    %206 = tpu.dynamic_rotate %11 by %c242_i32 dim 1 : vector<8x256xf32>, i32 -> vector<8x256xf32>
    %207 = vector.extract_strided_slice %206 {offsets = [0, 0], sizes = [8, 128], strides = [1, 1]} : vector<8x256xf32> to vector<8x128xf32>
    %c14 = arith.constant 14 : index
    %208 = memref.load %arg0[%c14] : memref<208xf32, #tpu.memory_space<smem>>
    %209 = vector.broadcast %208 : f32 to vector<8x128xf32>
    %210 = arith.mulf %209, %207 : vector<8x128xf32>
    %211 = arith.addf %197, %210 : vector<8x128xf32>
    %c30 = arith.constant 30 : index
    %212 = memref.load %arg0[%c30] : memref<208xf32, #tpu.memory_space<smem>>
    %213 = vector.broadcast %212 : f32 to vector<8x128xf32>
    %214 = arith.mulf %213, %207 : vector<8x128xf32>
    %215 = arith.addf %201, %214 : vector<8x128xf32>
    %c46 = arith.constant 46 : index
    %216 = memref.load %arg0[%c46] : memref<208xf32, #tpu.memory_space<smem>>
    %217 = vector.broadcast %216 : f32 to vector<8x128xf32>
    %218 = arith.mulf %217, %207 : vector<8x128xf32>
    %219 = arith.addf %205, %218 : vector<8x128xf32>
    %c241_i32 = arith.constant 241 : i32
    %220 = tpu.dynamic_rotate %11 by %c241_i32 dim 1 : vector<8x256xf32>, i32 -> vector<8x256xf32>
    %221 = vector.extract_strided_slice %220 {offsets = [0, 0], sizes = [8, 128], strides = [1, 1]} : vector<8x256xf32> to vector<8x128xf32>
    %c15 = arith.constant 15 : index
    %222 = memref.load %arg0[%c15] : memref<208xf32, #tpu.memory_space<smem>>
    %223 = vector.broadcast %222 : f32 to vector<8x128xf32>
    %224 = arith.mulf %223, %221 : vector<8x128xf32>
    %225 = arith.addf %211, %224 : vector<8x128xf32>
    %c31 = arith.constant 31 : index
    %226 = memref.load %arg0[%c31] : memref<208xf32, #tpu.memory_space<smem>>
    %227 = vector.broadcast %226 : f32 to vector<8x128xf32>
    %228 = arith.mulf %227, %221 : vector<8x128xf32>
    %229 = arith.addf %215, %228 : vector<8x128xf32>
    %c47 = arith.constant 47 : index
    %230 = memref.load %arg0[%c47] : memref<208xf32, #tpu.memory_space<smem>>
    %231 = vector.broadcast %230 : f32 to vector<8x128xf32>
    %232 = arith.mulf %231, %221 : vector<8x128xf32>
    %233 = arith.addf %219, %232 : vector<8x128xf32>
    %234 = math.tanh %225 : vector<8x128xf32>
    %c0_6 = arith.constant 0 : index
    %c0_7 = arith.constant 0 : index
    %c0_8 = arith.constant 0 : index
    %235 = vector.load %arg3[%c0_6, %c0_7, %c0_8] : memref<3x9x128xf32, #tpu.memory_space<vmem>>, vector<1x8x128xf32>
    %236 = vector.shape_cast %235 : vector<1x8x128xf32> to vector<8x128xf32>
    %237 = vector.shape_cast %234 : vector<8x128xf32> to vector<1x8x128xf32>
    tpu.vector_store %arg3[%c0_6, %c0_7, %c0_8], %237 {strides = array<i32>} : memref<3x9x128xf32, #tpu.memory_space<vmem>>, vector<1x8x128xf32>,
    %c0_9 = arith.constant 0 : index
    %c8_10 = arith.constant 8 : index
    %c0_11 = arith.constant 0 : index
    %238 = vector.load %arg3[%c0_9, %c8_10, %c0_11] : memref<3x9x128xf32, #tpu.memory_space<vmem>>, vector<1x1x128xf32>
    %239 = vector.shape_cast %238 : vector<1x1x128xf32> to vector<1x128xf32>
    %240 = vector.shape_cast %0 : vector<1x128xf32> to vector<1x1x128xf32>
    tpu.vector_store %arg3[%c0_9, %c8_10, %c0_11], %240 {strides = array<i32>} : memref<3x9x128xf32, #tpu.memory_space<vmem>>, vector<1x1x128xf32>,
    %241 = math.tanh %229 : vector<8x128xf32>
    %c1_12 = arith.constant 1 : index
    %c0_13 = arith.constant 0 : index
    %c0_14 = arith.constant 0 : index
    %242 = vector.load %arg3[%c1_12, %c0_13, %c0_14] : memref<3x9x128xf32, #tpu.memory_space<vmem>>, vector<1x8x128xf32>
    %243 = vector.shape_cast %242 : vector<1x8x128xf32> to vector<8x128xf32>
    %244 = vector.shape_cast %241 : vector<8x128xf32> to vector<1x8x128xf32>
    tpu.vector_store %arg3[%c1_12, %c0_13, %c0_14], %244 {strides = array<i32>} : memref<3x9x128xf32, #tpu.memory_space<vmem>>, vector<1x8x128xf32>,
    %c1_15 = arith.constant 1 : index
    %c8_16 = arith.constant 8 : index
    %c0_17 = arith.constant 0 : index
    %245 = vector.load %arg3[%c1_15, %c8_16, %c0_17] : memref<3x9x128xf32, #tpu.memory_space<vmem>>, vector<1x1x128xf32>
    %246 = vector.shape_cast %245 : vector<1x1x128xf32> to vector<1x128xf32>
    %247 = vector.shape_cast %0 : vector<1x128xf32> to vector<1x1x128xf32>
    tpu.vector_store %arg3[%c1_15, %c8_16, %c0_17], %247 {strides = array<i32>} : memref<3x9x128xf32, #tpu.memory_space<vmem>>, vector<1x1x128xf32>,
    %248 = math.tanh %233 : vector<8x128xf32>
    %c2_18 = arith.constant 2 : index
    %c0_19 = arith.constant 0 : index
    %c0_20 = arith.constant 0 : index
    %249 = vector.load %arg3[%c2_18, %c0_19, %c0_20] : memref<3x9x128xf32, #tpu.memory_space<vmem>>, vector<1x8x128xf32>
    %250 = vector.shape_cast %249 : vector<1x8x128xf32> to vector<8x128xf32>
    %251 = vector.shape_cast %248 : vector<8x128xf32> to vector<1x8x128xf32>
    tpu.vector_store %arg3[%c2_18, %c0_19, %c0_20], %251 {strides = array<i32>} : memref<3x9x128xf32, #tpu.memory_space<vmem>>, vector<1x8x128xf32>,
    %c2_21 = arith.constant 2 : index
    %c8_22 = arith.constant 8 : index
    %c0_23 = arith.constant 0 : index
    %252 = vector.load %arg3[%c2_21, %c8_22, %c0_23] : memref<3x9x128xf32, #tpu.memory_space<vmem>>, vector<1x1x128xf32>
    %253 = vector.shape_cast %252 : vector<1x1x128xf32> to vector<1x128xf32>
    %254 = vector.shape_cast %0 : vector<1x128xf32> to vector<1x1x128xf32>
    tpu.vector_store %arg3[%c2_21, %c8_22, %c0_23], %254 {strides = array<i32>} : memref<3x9x128xf32, #tpu.memory_space<vmem>>, vector<1x1x128xf32>,
    %c204 = arith.constant 204 : index
    %255 = memref.load %arg0[%c204] : memref<208xf32, #tpu.memory_space<smem>>
    %256 = vector.broadcast %255 : f32 to vector<8x128xf32>
    %c205 = arith.constant 205 : index
    %257 = memref.load %arg0[%c205] : memref<208xf32, #tpu.memory_space<smem>>
    %258 = vector.broadcast %257 : f32 to vector<8x128xf32>
    %c206 = arith.constant 206 : index
    %259 = memref.load %arg0[%c206] : memref<208xf32, #tpu.memory_space<smem>>
    %260 = vector.broadcast %259 : f32 to vector<8x128xf32>
    %c0_24 = arith.constant 0 : index
    %c0_25 = arith.constant 0 : index
    %c0_26 = arith.constant 0 : index
    %261 = vector.load %arg3[%c0_24, %c0_25, %c0_26] : memref<3x9x128xf32, #tpu.memory_space<vmem>>, vector<1x8x128xf32>
    %262 = vector.shape_cast %261 : vector<1x8x128xf32> to vector<8x128xf32>
    %c0_27 = arith.constant 0 : index
    %c1_28 = arith.constant 1 : index
    %c0_29 = arith.constant 0 : index
    %263 = vector.load %arg3[%c0_27, %c1_28, %c0_29] : memref<3x9x128xf32, #tpu.memory_space<vmem>>, vector<1x8x128xf32>
    %264 = vector.shape_cast %263 : vector<1x8x128xf32> to vector<8x128xf32>
    %265 = tpu.concatenate %262, %264 in 1 : vector<8x128xf32>, vector<8x128xf32> -> vector<8x256xf32>
    %c48 = arith.constant 48 : index
    %266 = memref.load %arg0[%c48] : memref<208xf32, #tpu.memory_space<smem>>
    %267 = vector.broadcast %266 : f32 to vector<8x128xf32>
    %268 = arith.mulf %267, %262 : vector<8x128xf32>
    %269 = arith.addf %256, %268 : vector<8x128xf32>
    %c96 = arith.constant 96 : index
    %270 = memref.load %arg0[%c96] : memref<208xf32, #tpu.memory_space<smem>>
    %271 = vector.broadcast %270 : f32 to vector<8x128xf32>
    %272 = arith.mulf %271, %262 : vector<8x128xf32>
    %273 = arith.addf %258, %272 : vector<8x128xf32>
    %c144 = arith.constant 144 : index
    %274 = memref.load %arg0[%c144] : memref<208xf32, #tpu.memory_space<smem>>
    %275 = vector.broadcast %274 : f32 to vector<8x128xf32>
    %276 = arith.mulf %275, %262 : vector<8x128xf32>
    %277 = arith.addf %260, %276 : vector<8x128xf32>
    %c255_i32_30 = arith.constant 255 : i32
    %278 = tpu.dynamic_rotate %265 by %c255_i32_30 dim 1 : vector<8x256xf32>, i32 -> vector<8x256xf32>
    %279 = vector.extract_strided_slice %278 {offsets = [0, 0], sizes = [8, 128], strides = [1, 1]} : vector<8x256xf32> to vector<8x128xf32>
    %c49 = arith.constant 49 : index
    %280 = memref.load %arg0[%c49] : memref<208xf32, #tpu.memory_space<smem>>
    %281 = vector.broadcast %280 : f32 to vector<8x128xf32>
    %282 = arith.mulf %281, %279 : vector<8x128xf32>
    %283 = arith.addf %269, %282 : vector<8x128xf32>
    %c97 = arith.constant 97 : index
    %284 = memref.load %arg0[%c97] : memref<208xf32, #tpu.memory_space<smem>>
    %285 = vector.broadcast %284 : f32 to vector<8x128xf32>
    %286 = arith.mulf %285, %279 : vector<8x128xf32>
    %287 = arith.addf %273, %286 : vector<8x128xf32>
    %c145 = arith.constant 145 : index
    %288 = memref.load %arg0[%c145] : memref<208xf32, #tpu.memory_space<smem>>
    %289 = vector.broadcast %288 : f32 to vector<8x128xf32>
    %290 = arith.mulf %289, %279 : vector<8x128xf32>
    %291 = arith.addf %277, %290 : vector<8x128xf32>
    %c254_i32_31 = arith.constant 254 : i32
    %292 = tpu.dynamic_rotate %265 by %c254_i32_31 dim 1 : vector<8x256xf32>, i32 -> vector<8x256xf32>
    %293 = vector.extract_strided_slice %292 {offsets = [0, 0], sizes = [8, 128], strides = [1, 1]} : vector<8x256xf32> to vector<8x128xf32>
    %c50 = arith.constant 50 : index
    %294 = memref.load %arg0[%c50] : memref<208xf32, #tpu.memory_space<smem>>
    %295 = vector.broadcast %294 : f32 to vector<8x128xf32>
    %296 = arith.mulf %295, %293 : vector<8x128xf32>
    %297 = arith.addf %283, %296 : vector<8x128xf32>
    %c98 = arith.constant 98 : index
    %298 = memref.load %arg0[%c98] : memref<208xf32, #tpu.memory_space<smem>>
    %299 = vector.broadcast %298 : f32 to vector<8x128xf32>
    %300 = arith.mulf %299, %293 : vector<8x128xf32>
    %301 = arith.addf %287, %300 : vector<8x128xf32>
    %c146 = arith.constant 146 : index
    %302 = memref.load %arg0[%c146] : memref<208xf32, #tpu.memory_space<smem>>
    %303 = vector.broadcast %302 : f32 to vector<8x128xf32>
    %304 = arith.mulf %303, %293 : vector<8x128xf32>
    %305 = arith.addf %291, %304 : vector<8x128xf32>
    %c253_i32_32 = arith.constant 253 : i32
    %306 = tpu.dynamic_rotate %265 by %c253_i32_32 dim 1 : vector<8x256xf32>, i32 -> vector<8x256xf32>
    %307 = vector.extract_strided_slice %306 {offsets = [0, 0], sizes = [8, 128], strides = [1, 1]} : vector<8x256xf32> to vector<8x128xf32>
    %c51 = arith.constant 51 : index
    %308 = memref.load %arg0[%c51] : memref<208xf32, #tpu.memory_space<smem>>
    %309 = vector.broadcast %308 : f32 to vector<8x128xf32>
    %310 = arith.mulf %309, %307 : vector<8x128xf32>
    %311 = arith.addf %297, %310 : vector<8x128xf32>
    %c99 = arith.constant 99 : index
    %312 = memref.load %arg0[%c99] : memref<208xf32, #tpu.memory_space<smem>>
    %313 = vector.broadcast %312 : f32 to vector<8x128xf32>
    %314 = arith.mulf %313, %307 : vector<8x128xf32>
    %315 = arith.addf %301, %314 : vector<8x128xf32>
    %c147 = arith.constant 147 : index
    %316 = memref.load %arg0[%c147] : memref<208xf32, #tpu.memory_space<smem>>
    %317 = vector.broadcast %316 : f32 to vector<8x128xf32>
    %318 = arith.mulf %317, %307 : vector<8x128xf32>
    %319 = arith.addf %305, %318 : vector<8x128xf32>
    %c252_i32_33 = arith.constant 252 : i32
    %320 = tpu.dynamic_rotate %265 by %c252_i32_33 dim 1 : vector<8x256xf32>, i32 -> vector<8x256xf32>
    %321 = vector.extract_strided_slice %320 {offsets = [0, 0], sizes = [8, 128], strides = [1, 1]} : vector<8x256xf32> to vector<8x128xf32>
    %c52 = arith.constant 52 : index
    %322 = memref.load %arg0[%c52] : memref<208xf32, #tpu.memory_space<smem>>
    %323 = vector.broadcast %322 : f32 to vector<8x128xf32>
    %324 = arith.mulf %323, %321 : vector<8x128xf32>
    %325 = arith.addf %311, %324 : vector<8x128xf32>
    %c100 = arith.constant 100 : index
    %326 = memref.load %arg0[%c100] : memref<208xf32, #tpu.memory_space<smem>>
    %327 = vector.broadcast %326 : f32 to vector<8x128xf32>
    %328 = arith.mulf %327, %321 : vector<8x128xf32>
    %329 = arith.addf %315, %328 : vector<8x128xf32>
    %c148 = arith.constant 148 : index
    %330 = memref.load %arg0[%c148] : memref<208xf32, #tpu.memory_space<smem>>
    %331 = vector.broadcast %330 : f32 to vector<8x128xf32>
    %332 = arith.mulf %331, %321 : vector<8x128xf32>
    %333 = arith.addf %319, %332 : vector<8x128xf32>
    %c251_i32_34 = arith.constant 251 : i32
    %334 = tpu.dynamic_rotate %265 by %c251_i32_34 dim 1 : vector<8x256xf32>, i32 -> vector<8x256xf32>
    %335 = vector.extract_strided_slice %334 {offsets = [0, 0], sizes = [8, 128], strides = [1, 1]} : vector<8x256xf32> to vector<8x128xf32>
    %c53 = arith.constant 53 : index
    %336 = memref.load %arg0[%c53] : memref<208xf32, #tpu.memory_space<smem>>
    %337 = vector.broadcast %336 : f32 to vector<8x128xf32>
    %338 = arith.mulf %337, %335 : vector<8x128xf32>
    %339 = arith.addf %325, %338 : vector<8x128xf32>
    %c101 = arith.constant 101 : index
    %340 = memref.load %arg0[%c101] : memref<208xf32, #tpu.memory_space<smem>>
    %341 = vector.broadcast %340 : f32 to vector<8x128xf32>
    %342 = arith.mulf %341, %335 : vector<8x128xf32>
    %343 = arith.addf %329, %342 : vector<8x128xf32>
    %c149 = arith.constant 149 : index
    %344 = memref.load %arg0[%c149] : memref<208xf32, #tpu.memory_space<smem>>
    %345 = vector.broadcast %344 : f32 to vector<8x128xf32>
    %346 = arith.mulf %345, %335 : vector<8x128xf32>
    %347 = arith.addf %333, %346 : vector<8x128xf32>
    %c250_i32_35 = arith.constant 250 : i32
    %348 = tpu.dynamic_rotate %265 by %c250_i32_35 dim 1 : vector<8x256xf32>, i32 -> vector<8x256xf32>
    %349 = vector.extract_strided_slice %348 {offsets = [0, 0], sizes = [8, 128], strides = [1, 1]} : vector<8x256xf32> to vector<8x128xf32>
    %c54 = arith.constant 54 : index
    %350 = memref.load %arg0[%c54] : memref<208xf32, #tpu.memory_space<smem>>
    %351 = vector.broadcast %350 : f32 to vector<8x128xf32>
    %352 = arith.mulf %351, %349 : vector<8x128xf32>
    %353 = arith.addf %339, %352 : vector<8x128xf32>
    %c102 = arith.constant 102 : index
    %354 = memref.load %arg0[%c102] : memref<208xf32, #tpu.memory_space<smem>>
    %355 = vector.broadcast %354 : f32 to vector<8x128xf32>
    %356 = arith.mulf %355, %349 : vector<8x128xf32>
    %357 = arith.addf %343, %356 : vector<8x128xf32>
    %c150 = arith.constant 150 : index
    %358 = memref.load %arg0[%c150] : memref<208xf32, #tpu.memory_space<smem>>
    %359 = vector.broadcast %358 : f32 to vector<8x128xf32>
    %360 = arith.mulf %359, %349 : vector<8x128xf32>
    %361 = arith.addf %347, %360 : vector<8x128xf32>
    %c249_i32_36 = arith.constant 249 : i32
    %362 = tpu.dynamic_rotate %265 by %c249_i32_36 dim 1 : vector<8x256xf32>, i32 -> vector<8x256xf32>
    %363 = vector.extract_strided_slice %362 {offsets = [0, 0], sizes = [8, 128], strides = [1, 1]} : vector<8x256xf32> to vector<8x128xf32>
    %c55 = arith.constant 55 : index
    %364 = memref.load %arg0[%c55] : memref<208xf32, #tpu.memory_space<smem>>
    %365 = vector.broadcast %364 : f32 to vector<8x128xf32>
    %366 = arith.mulf %365, %363 : vector<8x128xf32>
    %367 = arith.addf %353, %366 : vector<8x128xf32>
    %c103 = arith.constant 103 : index
    %368 = memref.load %arg0[%c103] : memref<208xf32, #tpu.memory_space<smem>>
    %369 = vector.broadcast %368 : f32 to vector<8x128xf32>
    %370 = arith.mulf %369, %363 : vector<8x128xf32>
    %371 = arith.addf %357, %370 : vector<8x128xf32>
    %c151 = arith.constant 151 : index
    %372 = memref.load %arg0[%c151] : memref<208xf32, #tpu.memory_space<smem>>
    %373 = vector.broadcast %372 : f32 to vector<8x128xf32>
    %374 = arith.mulf %373, %363 : vector<8x128xf32>
    %375 = arith.addf %361, %374 : vector<8x128xf32>
    %c248_i32_37 = arith.constant 248 : i32
    %376 = tpu.dynamic_rotate %265 by %c248_i32_37 dim 1 : vector<8x256xf32>, i32 -> vector<8x256xf32>
    %377 = vector.extract_strided_slice %376 {offsets = [0, 0], sizes = [8, 128], strides = [1, 1]} : vector<8x256xf32> to vector<8x128xf32>
    %c56 = arith.constant 56 : index
    %378 = memref.load %arg0[%c56] : memref<208xf32, #tpu.memory_space<smem>>
    %379 = vector.broadcast %378 : f32 to vector<8x128xf32>
    %380 = arith.mulf %379, %377 : vector<8x128xf32>
    %381 = arith.addf %367, %380 : vector<8x128xf32>
    %c104 = arith.constant 104 : index
    %382 = memref.load %arg0[%c104] : memref<208xf32, #tpu.memory_space<smem>>
    %383 = vector.broadcast %382 : f32 to vector<8x128xf32>
    %384 = arith.mulf %383, %377 : vector<8x128xf32>
    %385 = arith.addf %371, %384 : vector<8x128xf32>
    %c152 = arith.constant 152 : index
    %386 = memref.load %arg0[%c152] : memref<208xf32, #tpu.memory_space<smem>>
    %387 = vector.broadcast %386 : f32 to vector<8x128xf32>
    %388 = arith.mulf %387, %377 : vector<8x128xf32>
    %389 = arith.addf %375, %388 : vector<8x128xf32>
    %c247_i32_38 = arith.constant 247 : i32
    %390 = tpu.dynamic_rotate %265 by %c247_i32_38 dim 1 : vector<8x256xf32>, i32 -> vector<8x256xf32>
    %391 = vector.extract_strided_slice %390 {offsets = [0, 0], sizes = [8, 128], strides = [1, 1]} : vector<8x256xf32> to vector<8x128xf32>
    %c57 = arith.constant 57 : index
    %392 = memref.load %arg0[%c57] : memref<208xf32, #tpu.memory_space<smem>>
    %393 = vector.broadcast %392 : f32 to vector<8x128xf32>
    %394 = arith.mulf %393, %391 : vector<8x128xf32>
    %395 = arith.addf %381, %394 : vector<8x128xf32>
    %c105 = arith.constant 105 : index
    %396 = memref.load %arg0[%c105] : memref<208xf32, #tpu.memory_space<smem>>
    %397 = vector.broadcast %396 : f32 to vector<8x128xf32>
    %398 = arith.mulf %397, %391 : vector<8x128xf32>
    %399 = arith.addf %385, %398 : vector<8x128xf32>
    %c153 = arith.constant 153 : index
    %400 = memref.load %arg0[%c153] : memref<208xf32, #tpu.memory_space<smem>>
    %401 = vector.broadcast %400 : f32 to vector<8x128xf32>
    %402 = arith.mulf %401, %391 : vector<8x128xf32>
    %403 = arith.addf %389, %402 : vector<8x128xf32>
    %c246_i32_39 = arith.constant 246 : i32
    %404 = tpu.dynamic_rotate %265 by %c246_i32_39 dim 1 : vector<8x256xf32>, i32 -> vector<8x256xf32>
    %405 = vector.extract_strided_slice %404 {offsets = [0, 0], sizes = [8, 128], strides = [1, 1]} : vector<8x256xf32> to vector<8x128xf32>
    %c58 = arith.constant 58 : index
    %406 = memref.load %arg0[%c58] : memref<208xf32, #tpu.memory_space<smem>>
    %407 = vector.broadcast %406 : f32 to vector<8x128xf32>
    %408 = arith.mulf %407, %405 : vector<8x128xf32>
    %409 = arith.addf %395, %408 : vector<8x128xf32>
    %c106 = arith.constant 106 : index
    %410 = memref.load %arg0[%c106] : memref<208xf32, #tpu.memory_space<smem>>
    %411 = vector.broadcast %410 : f32 to vector<8x128xf32>
    %412 = arith.mulf %411, %405 : vector<8x128xf32>
    %413 = arith.addf %399, %412 : vector<8x128xf32>
    %c154 = arith.constant 154 : index
    %414 = memref.load %arg0[%c154] : memref<208xf32, #tpu.memory_space<smem>>
    %415 = vector.broadcast %414 : f32 to vector<8x128xf32>
    %416 = arith.mulf %415, %405 : vector<8x128xf32>
    %417 = arith.addf %403, %416 : vector<8x128xf32>
    %c245_i32_40 = arith.constant 245 : i32
    %418 = tpu.dynamic_rotate %265 by %c245_i32_40 dim 1 : vector<8x256xf32>, i32 -> vector<8x256xf32>
    %419 = vector.extract_strided_slice %418 {offsets = [0, 0], sizes = [8, 128], strides = [1, 1]} : vector<8x256xf32> to vector<8x128xf32>
    %c59 = arith.constant 59 : index
    %420 = memref.load %arg0[%c59] : memref<208xf32, #tpu.memory_space<smem>>
    %421 = vector.broadcast %420 : f32 to vector<8x128xf32>
    %422 = arith.mulf %421, %419 : vector<8x128xf32>
    %423 = arith.addf %409, %422 : vector<8x128xf32>
    %c107 = arith.constant 107 : index
    %424 = memref.load %arg0[%c107] : memref<208xf32, #tpu.memory_space<smem>>
    %425 = vector.broadcast %424 : f32 to vector<8x128xf32>
    %426 = arith.mulf %425, %419 : vector<8x128xf32>
    %427 = arith.addf %413, %426 : vector<8x128xf32>
    %c155 = arith.constant 155 : index
    %428 = memref.load %arg0[%c155] : memref<208xf32, #tpu.memory_space<smem>>
    %429 = vector.broadcast %428 : f32 to vector<8x128xf32>
    %430 = arith.mulf %429, %419 : vector<8x128xf32>
    %431 = arith.addf %417, %430 : vector<8x128xf32>
    %c244_i32_41 = arith.constant 244 : i32
    %432 = tpu.dynamic_rotate %265 by %c244_i32_41 dim 1 : vector<8x256xf32>, i32 -> vector<8x256xf32>
    %433 = vector.extract_strided_slice %432 {offsets = [0, 0], sizes = [8, 128], strides = [1, 1]} : vector<8x256xf32> to vector<8x128xf32>
    %c60 = arith.constant 60 : index
    %434 = memref.load %arg0[%c60] : memref<208xf32, #tpu.memory_space<smem>>
    %435 = vector.broadcast %434 : f32 to vector<8x128xf32>
    %436 = arith.mulf %435, %433 : vector<8x128xf32>
    %437 = arith.addf %423, %436 : vector<8x128xf32>
    %c108 = arith.constant 108 : index
    %438 = memref.load %arg0[%c108] : memref<208xf32, #tpu.memory_space<smem>>
    %439 = vector.broadcast %438 : f32 to vector<8x128xf32>
    %440 = arith.mulf %439, %433 : vector<8x128xf32>
    %441 = arith.addf %427, %440 : vector<8x128xf32>
    %c156 = arith.constant 156 : index
    %442 = memref.load %arg0[%c156] : memref<208xf32, #tpu.memory_space<smem>>
    %443 = vector.broadcast %442 : f32 to vector<8x128xf32>
    %444 = arith.mulf %443, %433 : vector<8x128xf32>
    %445 = arith.addf %431, %444 : vector<8x128xf32>
    %c243_i32_42 = arith.constant 243 : i32
    %446 = tpu.dynamic_rotate %265 by %c243_i32_42 dim 1 : vector<8x256xf32>, i32 -> vector<8x256xf32>
    %447 = vector.extract_strided_slice %446 {offsets = [0, 0], sizes = [8, 128], strides = [1, 1]} : vector<8x256xf32> to vector<8x128xf32>
    %c61 = arith.constant 61 : index
    %448 = memref.load %arg0[%c61] : memref<208xf32, #tpu.memory_space<smem>>
    %449 = vector.broadcast %448 : f32 to vector<8x128xf32>
    %450 = arith.mulf %449, %447 : vector<8x128xf32>
    %451 = arith.addf %437, %450 : vector<8x128xf32>
    %c109 = arith.constant 109 : index
    %452 = memref.load %arg0[%c109] : memref<208xf32, #tpu.memory_space<smem>>
    %453 = vector.broadcast %452 : f32 to vector<8x128xf32>
    %454 = arith.mulf %453, %447 : vector<8x128xf32>
    %455 = arith.addf %441, %454 : vector<8x128xf32>
    %c157 = arith.constant 157 : index
    %456 = memref.load %arg0[%c157] : memref<208xf32, #tpu.memory_space<smem>>
    %457 = vector.broadcast %456 : f32 to vector<8x128xf32>
    %458 = arith.mulf %457, %447 : vector<8x128xf32>
    %459 = arith.addf %445, %458 : vector<8x128xf32>
    %c242_i32_43 = arith.constant 242 : i32
    %460 = tpu.dynamic_rotate %265 by %c242_i32_43 dim 1 : vector<8x256xf32>, i32 -> vector<8x256xf32>
    %461 = vector.extract_strided_slice %460 {offsets = [0, 0], sizes = [8, 128], strides = [1, 1]} : vector<8x256xf32> to vector<8x128xf32>
    %c62 = arith.constant 62 : index
    %462 = memref.load %arg0[%c62] : memref<208xf32, #tpu.memory_space<smem>>
    %463 = vector.broadcast %462 : f32 to vector<8x128xf32>
    %464 = arith.mulf %463, %461 : vector<8x128xf32>
    %465 = arith.addf %451, %464 : vector<8x128xf32>
    %c110 = arith.constant 110 : index
    %466 = memref.load %arg0[%c110] : memref<208xf32, #tpu.memory_space<smem>>
    %467 = vector.broadcast %466 : f32 to vector<8x128xf32>
    %468 = arith.mulf %467, %461 : vector<8x128xf32>
    %469 = arith.addf %455, %468 : vector<8x128xf32>
    %c158 = arith.constant 158 : index
    %470 = memref.load %arg0[%c158] : memref<208xf32, #tpu.memory_space<smem>>
    %471 = vector.broadcast %470 : f32 to vector<8x128xf32>
    %472 = arith.mulf %471, %461 : vector<8x128xf32>
    %473 = arith.addf %459, %472 : vector<8x128xf32>
    %c241_i32_44 = arith.constant 241 : i32
    %474 = tpu.dynamic_rotate %265 by %c241_i32_44 dim 1 : vector<8x256xf32>, i32 -> vector<8x256xf32>
    %475 = vector.extract_strided_slice %474 {offsets = [0, 0], sizes = [8, 128], strides = [1, 1]} : vector<8x256xf32> to vector<8x128xf32>
    %c63 = arith.constant 63 : index
    %476 = memref.load %arg0[%c63] : memref<208xf32, #tpu.memory_space<smem>>
    %477 = vector.broadcast %476 : f32 to vector<8x128xf32>
    %478 = arith.mulf %477, %475 : vector<8x128xf32>
    %479 = arith.addf %465, %478 : vector<8x128xf32>
    %c111 = arith.constant 111 : index
    %480 = memref.load %arg0[%c111] : memref<208xf32, #tpu.memory_space<smem>>
    %481 = vector.broadcast %480 : f32 to vector<8x128xf32>
    %482 = arith.mulf %481, %475 : vector<8x128xf32>
    %483 = arith.addf %469, %482 : vector<8x128xf32>
    %c159 = arith.constant 159 : index
    %484 = memref.load %arg0[%c159] : memref<208xf32, #tpu.memory_space<smem>>
    %485 = vector.broadcast %484 : f32 to vector<8x128xf32>
    %486 = arith.mulf %485, %475 : vector<8x128xf32>
    %487 = arith.addf %473, %486 : vector<8x128xf32>
    %c1_45 = arith.constant 1 : index
    %c0_46 = arith.constant 0 : index
    %c0_47 = arith.constant 0 : index
    %488 = vector.load %arg3[%c1_45, %c0_46, %c0_47] : memref<3x9x128xf32, #tpu.memory_space<vmem>>, vector<1x8x128xf32>
    %489 = vector.shape_cast %488 : vector<1x8x128xf32> to vector<8x128xf32>
    %c1_48 = arith.constant 1 : index
    %c1_49 = arith.constant 1 : index
    %c0_50 = arith.constant 0 : index
    %490 = vector.load %arg3[%c1_48, %c1_49, %c0_50] : memref<3x9x128xf32, #tpu.memory_space<vmem>>, vector<1x8x128xf32>
    %491 = vector.shape_cast %490 : vector<1x8x128xf32> to vector<8x128xf32>
    %492 = tpu.concatenate %489, %491 in 1 : vector<8x128xf32>, vector<8x128xf32> -> vector<8x256xf32>
    %c64 = arith.constant 64 : index
    %493 = memref.load %arg0[%c64] : memref<208xf32, #tpu.memory_space<smem>>
    %494 = vector.broadcast %493 : f32 to vector<8x128xf32>
    %495 = arith.mulf %494, %489 : vector<8x128xf32>
    %496 = arith.addf %479, %495 : vector<8x128xf32>
    %c112 = arith.constant 112 : index
    %497 = memref.load %arg0[%c112] : memref<208xf32, #tpu.memory_space<smem>>
    %498 = vector.broadcast %497 : f32 to vector<8x128xf32>
    %499 = arith.mulf %498, %489 : vector<8x128xf32>
    %500 = arith.addf %483, %499 : vector<8x128xf32>
    %c160 = arith.constant 160 : index
    %501 = memref.load %arg0[%c160] : memref<208xf32, #tpu.memory_space<smem>>
    %502 = vector.broadcast %501 : f32 to vector<8x128xf32>
    %503 = arith.mulf %502, %489 : vector<8x128xf32>
    %504 = arith.addf %487, %503 : vector<8x128xf32>
    %c255_i32_51 = arith.constant 255 : i32
    %505 = tpu.dynamic_rotate %492 by %c255_i32_51 dim 1 : vector<8x256xf32>, i32 -> vector<8x256xf32>
    %506 = vector.extract_strided_slice %505 {offsets = [0, 0], sizes = [8, 128], strides = [1, 1]} : vector<8x256xf32> to vector<8x128xf32>
    %c65 = arith.constant 65 : index
    %507 = memref.load %arg0[%c65] : memref<208xf32, #tpu.memory_space<smem>>
    %508 = vector.broadcast %507 : f32 to vector<8x128xf32>
    %509 = arith.mulf %508, %506 : vector<8x128xf32>
    %510 = arith.addf %496, %509 : vector<8x128xf32>
    %c113 = arith.constant 113 : index
    %511 = memref.load %arg0[%c113] : memref<208xf32, #tpu.memory_space<smem>>
    %512 = vector.broadcast %511 : f32 to vector<8x128xf32>
    %513 = arith.mulf %512, %506 : vector<8x128xf32>
    %514 = arith.addf %500, %513 : vector<8x128xf32>
    %c161 = arith.constant 161 : index
    %515 = memref.load %arg0[%c161] : memref<208xf32, #tpu.memory_space<smem>>
    %516 = vector.broadcast %515 : f32 to vector<8x128xf32>
    %517 = arith.mulf %516, %506 : vector<8x128xf32>
    %518 = arith.addf %504, %517 : vector<8x128xf32>
    %c254_i32_52 = arith.constant 254 : i32
    %519 = tpu.dynamic_rotate %492 by %c254_i32_52 dim 1 : vector<8x256xf32>, i32 -> vector<8x256xf32>
    %520 = vector.extract_strided_slice %519 {offsets = [0, 0], sizes = [8, 128], strides = [1, 1]} : vector<8x256xf32> to vector<8x128xf32>
    %c66 = arith.constant 66 : index
    %521 = memref.load %arg0[%c66] : memref<208xf32, #tpu.memory_space<smem>>
    %522 = vector.broadcast %521 : f32 to vector<8x128xf32>
    %523 = arith.mulf %522, %520 : vector<8x128xf32>
    %524 = arith.addf %510, %523 : vector<8x128xf32>
    %c114 = arith.constant 114 : index
    %525 = memref.load %arg0[%c114] : memref<208xf32, #tpu.memory_space<smem>>
    %526 = vector.broadcast %525 : f32 to vector<8x128xf32>
    %527 = arith.mulf %526, %520 : vector<8x128xf32>
    %528 = arith.addf %514, %527 : vector<8x128xf32>
    %c162 = arith.constant 162 : index
    %529 = memref.load %arg0[%c162] : memref<208xf32, #tpu.memory_space<smem>>
    %530 = vector.broadcast %529 : f32 to vector<8x128xf32>
    %531 = arith.mulf %530, %520 : vector<8x128xf32>
    %532 = arith.addf %518, %531 : vector<8x128xf32>
    %c253_i32_53 = arith.constant 253 : i32
    %533 = tpu.dynamic_rotate %492 by %c253_i32_53 dim 1 : vector<8x256xf32>, i32 -> vector<8x256xf32>
    %534 = vector.extract_strided_slice %533 {offsets = [0, 0], sizes = [8, 128], strides = [1, 1]} : vector<8x256xf32> to vector<8x128xf32>
    %c67 = arith.constant 67 : index
    %535 = memref.load %arg0[%c67] : memref<208xf32, #tpu.memory_space<smem>>
    %536 = vector.broadcast %535 : f32 to vector<8x128xf32>
    %537 = arith.mulf %536, %534 : vector<8x128xf32>
    %538 = arith.addf %524, %537 : vector<8x128xf32>
    %c115 = arith.constant 115 : index
    %539 = memref.load %arg0[%c115] : memref<208xf32, #tpu.memory_space<smem>>
    %540 = vector.broadcast %539 : f32 to vector<8x128xf32>
    %541 = arith.mulf %540, %534 : vector<8x128xf32>
    %542 = arith.addf %528, %541 : vector<8x128xf32>
    %c163 = arith.constant 163 : index
    %543 = memref.load %arg0[%c163] : memref<208xf32, #tpu.memory_space<smem>>
    %544 = vector.broadcast %543 : f32 to vector<8x128xf32>
    %545 = arith.mulf %544, %534 : vector<8x128xf32>
    %546 = arith.addf %532, %545 : vector<8x128xf32>
    %c252_i32_54 = arith.constant 252 : i32
    %547 = tpu.dynamic_rotate %492 by %c252_i32_54 dim 1 : vector<8x256xf32>, i32 -> vector<8x256xf32>
    %548 = vector.extract_strided_slice %547 {offsets = [0, 0], sizes = [8, 128], strides = [1, 1]} : vector<8x256xf32> to vector<8x128xf32>
    %c68 = arith.constant 68 : index
    %549 = memref.load %arg0[%c68] : memref<208xf32, #tpu.memory_space<smem>>
    %550 = vector.broadcast %549 : f32 to vector<8x128xf32>
    %551 = arith.mulf %550, %548 : vector<8x128xf32>
    %552 = arith.addf %538, %551 : vector<8x128xf32>
    %c116 = arith.constant 116 : index
    %553 = memref.load %arg0[%c116] : memref<208xf32, #tpu.memory_space<smem>>
    %554 = vector.broadcast %553 : f32 to vector<8x128xf32>
    %555 = arith.mulf %554, %548 : vector<8x128xf32>
    %556 = arith.addf %542, %555 : vector<8x128xf32>
    %c164 = arith.constant 164 : index
    %557 = memref.load %arg0[%c164] : memref<208xf32, #tpu.memory_space<smem>>
    %558 = vector.broadcast %557 : f32 to vector<8x128xf32>
    %559 = arith.mulf %558, %548 : vector<8x128xf32>
    %560 = arith.addf %546, %559 : vector<8x128xf32>
    %c251_i32_55 = arith.constant 251 : i32
    %561 = tpu.dynamic_rotate %492 by %c251_i32_55 dim 1 : vector<8x256xf32>, i32 -> vector<8x256xf32>
    %562 = vector.extract_strided_slice %561 {offsets = [0, 0], sizes = [8, 128], strides = [1, 1]} : vector<8x256xf32> to vector<8x128xf32>
    %c69 = arith.constant 69 : index
    %563 = memref.load %arg0[%c69] : memref<208xf32, #tpu.memory_space<smem>>
    %564 = vector.broadcast %563 : f32 to vector<8x128xf32>
    %565 = arith.mulf %564, %562 : vector<8x128xf32>
    %566 = arith.addf %552, %565 : vector<8x128xf32>
    %c117 = arith.constant 117 : index
    %567 = memref.load %arg0[%c117] : memref<208xf32, #tpu.memory_space<smem>>
    %568 = vector.broadcast %567 : f32 to vector<8x128xf32>
    %569 = arith.mulf %568, %562 : vector<8x128xf32>
    %570 = arith.addf %556, %569 : vector<8x128xf32>
    %c165 = arith.constant 165 : index
    %571 = memref.load %arg0[%c165] : memref<208xf32, #tpu.memory_space<smem>>
    %572 = vector.broadcast %571 : f32 to vector<8x128xf32>
    %573 = arith.mulf %572, %562 : vector<8x128xf32>
    %574 = arith.addf %560, %573 : vector<8x128xf32>
    %c250_i32_56 = arith.constant 250 : i32
    %575 = tpu.dynamic_rotate %492 by %c250_i32_56 dim 1 : vector<8x256xf32>, i32 -> vector<8x256xf32>
    %576 = vector.extract_strided_slice %575 {offsets = [0, 0], sizes = [8, 128], strides = [1, 1]} : vector<8x256xf32> to vector<8x128xf32>
    %c70 = arith.constant 70 : index
    %577 = memref.load %arg0[%c70] : memref<208xf32, #tpu.memory_space<smem>>
    %578 = vector.broadcast %577 : f32 to vector<8x128xf32>
    %579 = arith.mulf %578, %576 : vector<8x128xf32>
    %580 = arith.addf %566, %579 : vector<8x128xf32>
    %c118 = arith.constant 118 : index
    %581 = memref.load %arg0[%c118] : memref<208xf32, #tpu.memory_space<smem>>
    %582 = vector.broadcast %581 : f32 to vector<8x128xf32>
    %583 = arith.mulf %582, %576 : vector<8x128xf32>
    %584 = arith.addf %570, %583 : vector<8x128xf32>
    %c166 = arith.constant 166 : index
    %585 = memref.load %arg0[%c166] : memref<208xf32, #tpu.memory_space<smem>>
    %586 = vector.broadcast %585 : f32 to vector<8x128xf32>
    %587 = arith.mulf %586, %576 : vector<8x128xf32>
    %588 = arith.addf %574, %587 : vector<8x128xf32>
    %c249_i32_57 = arith.constant 249 : i32
    %589 = tpu.dynamic_rotate %492 by %c249_i32_57 dim 1 : vector<8x256xf32>, i32 -> vector<8x256xf32>
    %590 = vector.extract_strided_slice %589 {offsets = [0, 0], sizes = [8, 128], strides = [1, 1]} : vector<8x256xf32> to vector<8x128xf32>
    %c71 = arith.constant 71 : index
    %591 = memref.load %arg0[%c71] : memref<208xf32, #tpu.memory_space<smem>>
    %592 = vector.broadcast %591 : f32 to vector<8x128xf32>
    %593 = arith.mulf %592, %590 : vector<8x128xf32>
    %594 = arith.addf %580, %593 : vector<8x128xf32>
    %c119 = arith.constant 119 : index
    %595 = memref.load %arg0[%c119] : memref<208xf32, #tpu.memory_space<smem>>
    %596 = vector.broadcast %595 : f32 to vector<8x128xf32>
    %597 = arith.mulf %596, %590 : vector<8x128xf32>
    %598 = arith.addf %584, %597 : vector<8x128xf32>
    %c167 = arith.constant 167 : index
    %599 = memref.load %arg0[%c167] : memref<208xf32, #tpu.memory_space<smem>>
    %600 = vector.broadcast %599 : f32 to vector<8x128xf32>
    %601 = arith.mulf %600, %590 : vector<8x128xf32>
    %602 = arith.addf %588, %601 : vector<8x128xf32>
    %c248_i32_58 = arith.constant 248 : i32
    %603 = tpu.dynamic_rotate %492 by %c248_i32_58 dim 1 : vector<8x256xf32>, i32 -> vector<8x256xf32>
    %604 = vector.extract_strided_slice %603 {offsets = [0, 0], sizes = [8, 128], strides = [1, 1]} : vector<8x256xf32> to vector<8x128xf32>
    %c72 = arith.constant 72 : index
    %605 = memref.load %arg0[%c72] : memref<208xf32, #tpu.memory_space<smem>>
    %606 = vector.broadcast %605 : f32 to vector<8x128xf32>
    %607 = arith.mulf %606, %604 : vector<8x128xf32>
    %608 = arith.addf %594, %607 : vector<8x128xf32>
    %c120 = arith.constant 120 : index
    %609 = memref.load %arg0[%c120] : memref<208xf32, #tpu.memory_space<smem>>
    %610 = vector.broadcast %609 : f32 to vector<8x128xf32>
    %611 = arith.mulf %610, %604 : vector<8x128xf32>
    %612 = arith.addf %598, %611 : vector<8x128xf32>
    %c168 = arith.constant 168 : index
    %613 = memref.load %arg0[%c168] : memref<208xf32, #tpu.memory_space<smem>>
    %614 = vector.broadcast %613 : f32 to vector<8x128xf32>
    %615 = arith.mulf %614, %604 : vector<8x128xf32>
    %616 = arith.addf %602, %615 : vector<8x128xf32>
    %c247_i32_59 = arith.constant 247 : i32
    %617 = tpu.dynamic_rotate %492 by %c247_i32_59 dim 1 : vector<8x256xf32>, i32 -> vector<8x256xf32>
    %618 = vector.extract_strided_slice %617 {offsets = [0, 0], sizes = [8, 128], strides = [1, 1]} : vector<8x256xf32> to vector<8x128xf32>
    %c73 = arith.constant 73 : index
    %619 = memref.load %arg0[%c73] : memref<208xf32, #tpu.memory_space<smem>>
    %620 = vector.broadcast %619 : f32 to vector<8x128xf32>
    %621 = arith.mulf %620, %618 : vector<8x128xf32>
    %622 = arith.addf %608, %621 : vector<8x128xf32>
    %c121 = arith.constant 121 : index
    %623 = memref.load %arg0[%c121] : memref<208xf32, #tpu.memory_space<smem>>
    %624 = vector.broadcast %623 : f32 to vector<8x128xf32>
    %625 = arith.mulf %624, %618 : vector<8x128xf32>
    %626 = arith.addf %612, %625 : vector<8x128xf32>
    %c169 = arith.constant 169 : index
    %627 = memref.load %arg0[%c169] : memref<208xf32, #tpu.memory_space<smem>>
    %628 = vector.broadcast %627 : f32 to vector<8x128xf32>
    %629 = arith.mulf %628, %618 : vector<8x128xf32>
    %630 = arith.addf %616, %629 : vector<8x128xf32>
    %c246_i32_60 = arith.constant 246 : i32
    %631 = tpu.dynamic_rotate %492 by %c246_i32_60 dim 1 : vector<8x256xf32>, i32 -> vector<8x256xf32>
    %632 = vector.extract_strided_slice %631 {offsets = [0, 0], sizes = [8, 128], strides = [1, 1]} : vector<8x256xf32> to vector<8x128xf32>
    %c74 = arith.constant 74 : index
    %633 = memref.load %arg0[%c74] : memref<208xf32, #tpu.memory_space<smem>>
    %634 = vector.broadcast %633 : f32 to vector<8x128xf32>
    %635 = arith.mulf %634, %632 : vector<8x128xf32>
    %636 = arith.addf %622, %635 : vector<8x128xf32>
    %c122 = arith.constant 122 : index
    %637 = memref.load %arg0[%c122] : memref<208xf32, #tpu.memory_space<smem>>
    %638 = vector.broadcast %637 : f32 to vector<8x128xf32>
    %639 = arith.mulf %638, %632 : vector<8x128xf32>
    %640 = arith.addf %626, %639 : vector<8x128xf32>
    %c170 = arith.constant 170 : index
    %641 = memref.load %arg0[%c170] : memref<208xf32, #tpu.memory_space<smem>>
    %642 = vector.broadcast %641 : f32 to vector<8x128xf32>
    %643 = arith.mulf %642, %632 : vector<8x128xf32>
    %644 = arith.addf %630, %643 : vector<8x128xf32>
    %c245_i32_61 = arith.constant 245 : i32
    %645 = tpu.dynamic_rotate %492 by %c245_i32_61 dim 1 : vector<8x256xf32>, i32 -> vector<8x256xf32>
    %646 = vector.extract_strided_slice %645 {offsets = [0, 0], sizes = [8, 128], strides = [1, 1]} : vector<8x256xf32> to vector<8x128xf32>
    %c75 = arith.constant 75 : index
    %647 = memref.load %arg0[%c75] : memref<208xf32, #tpu.memory_space<smem>>
    %648 = vector.broadcast %647 : f32 to vector<8x128xf32>
    %649 = arith.mulf %648, %646 : vector<8x128xf32>
    %650 = arith.addf %636, %649 : vector<8x128xf32>
    %c123 = arith.constant 123 : index
    %651 = memref.load %arg0[%c123] : memref<208xf32, #tpu.memory_space<smem>>
    %652 = vector.broadcast %651 : f32 to vector<8x128xf32>
    %653 = arith.mulf %652, %646 : vector<8x128xf32>
    %654 = arith.addf %640, %653 : vector<8x128xf32>
    %c171 = arith.constant 171 : index
    %655 = memref.load %arg0[%c171] : memref<208xf32, #tpu.memory_space<smem>>
    %656 = vector.broadcast %655 : f32 to vector<8x128xf32>
    %657 = arith.mulf %656, %646 : vector<8x128xf32>
    %658 = arith.addf %644, %657 : vector<8x128xf32>
    %c244_i32_62 = arith.constant 244 : i32
    %659 = tpu.dynamic_rotate %492 by %c244_i32_62 dim 1 : vector<8x256xf32>, i32 -> vector<8x256xf32>
    %660 = vector.extract_strided_slice %659 {offsets = [0, 0], sizes = [8, 128], strides = [1, 1]} : vector<8x256xf32> to vector<8x128xf32>
    %c76 = arith.constant 76 : index
    %661 = memref.load %arg0[%c76] : memref<208xf32, #tpu.memory_space<smem>>
    %662 = vector.broadcast %661 : f32 to vector<8x128xf32>
    %663 = arith.mulf %662, %660 : vector<8x128xf32>
    %664 = arith.addf %650, %663 : vector<8x128xf32>
    %c124 = arith.constant 124 : index
    %665 = memref.load %arg0[%c124] : memref<208xf32, #tpu.memory_space<smem>>
    %666 = vector.broadcast %665 : f32 to vector<8x128xf32>
    %667 = arith.mulf %666, %660 : vector<8x128xf32>
    %668 = arith.addf %654, %667 : vector<8x128xf32>
    %c172 = arith.constant 172 : index
    %669 = memref.load %arg0[%c172] : memref<208xf32, #tpu.memory_space<smem>>
    %670 = vector.broadcast %669 : f32 to vector<8x128xf32>
    %671 = arith.mulf %670, %660 : vector<8x128xf32>
    %672 = arith.addf %658, %671 : vector<8x128xf32>
    %c243_i32_63 = arith.constant 243 : i32
    %673 = tpu.dynamic_rotate %492 by %c243_i32_63 dim 1 : vector<8x256xf32>, i32 -> vector<8x256xf32>
    %674 = vector.extract_strided_slice %673 {offsets = [0, 0], sizes = [8, 128], strides = [1, 1]} : vector<8x256xf32> to vector<8x128xf32>
    %c77 = arith.constant 77 : index
    %675 = memref.load %arg0[%c77] : memref<208xf32, #tpu.memory_space<smem>>
    %676 = vector.broadcast %675 : f32 to vector<8x128xf32>
    %677 = arith.mulf %676, %674 : vector<8x128xf32>
    %678 = arith.addf %664, %677 : vector<8x128xf32>
    %c125 = arith.constant 125 : index
    %679 = memref.load %arg0[%c125] : memref<208xf32, #tpu.memory_space<smem>>
    %680 = vector.broadcast %679 : f32 to vector<8x128xf32>
    %681 = arith.mulf %680, %674 : vector<8x128xf32>
    %682 = arith.addf %668, %681 : vector<8x128xf32>
    %c173 = arith.constant 173 : index
    %683 = memref.load %arg0[%c173] : memref<208xf32, #tpu.memory_space<smem>>
    %684 = vector.broadcast %683 : f32 to vector<8x128xf32>
    %685 = arith.mulf %684, %674 : vector<8x128xf32>
    %686 = arith.addf %672, %685 : vector<8x128xf32>
    %c242_i32_64 = arith.constant 242 : i32
    %687 = tpu.dynamic_rotate %492 by %c242_i32_64 dim 1 : vector<8x256xf32>, i32 -> vector<8x256xf32>
    %688 = vector.extract_strided_slice %687 {offsets = [0, 0], sizes = [8, 128], strides = [1, 1]} : vector<8x256xf32> to vector<8x128xf32>
    %c78 = arith.constant 78 : index
    %689 = memref.load %arg0[%c78] : memref<208xf32, #tpu.memory_space<smem>>
    %690 = vector.broadcast %689 : f32 to vector<8x128xf32>
    %691 = arith.mulf %690, %688 : vector<8x128xf32>
    %692 = arith.addf %678, %691 : vector<8x128xf32>
    %c126 = arith.constant 126 : index
    %693 = memref.load %arg0[%c126] : memref<208xf32, #tpu.memory_space<smem>>
    %694 = vector.broadcast %693 : f32 to vector<8x128xf32>
    %695 = arith.mulf %694, %688 : vector<8x128xf32>
    %696 = arith.addf %682, %695 : vector<8x128xf32>
    %c174 = arith.constant 174 : index
    %697 = memref.load %arg0[%c174] : memref<208xf32, #tpu.memory_space<smem>>
    %698 = vector.broadcast %697 : f32 to vector<8x128xf32>
    %699 = arith.mulf %698, %688 : vector<8x128xf32>
    %700 = arith.addf %686, %699 : vector<8x128xf32>
    %c241_i32_65 = arith.constant 241 : i32
    %701 = tpu.dynamic_rotate %492 by %c241_i32_65 dim 1 : vector<8x256xf32>, i32 -> vector<8x256xf32>
    %702 = vector.extract_strided_slice %701 {offsets = [0, 0], sizes = [8, 128], strides = [1, 1]} : vector<8x256xf32> to vector<8x128xf32>
    %c79 = arith.constant 79 : index
    %703 = memref.load %arg0[%c79] : memref<208xf32, #tpu.memory_space<smem>>
    %704 = vector.broadcast %703 : f32 to vector<8x128xf32>
    %705 = arith.mulf %704, %702 : vector<8x128xf32>
    %706 = arith.addf %692, %705 : vector<8x128xf32>
    %c127 = arith.constant 127 : index
    %707 = memref.load %arg0[%c127] : memref<208xf32, #tpu.memory_space<smem>>
    %708 = vector.broadcast %707 : f32 to vector<8x128xf32>
    %709 = arith.mulf %708, %702 : vector<8x128xf32>
    %710 = arith.addf %696, %709 : vector<8x128xf32>
    %c175 = arith.constant 175 : index
    %711 = memref.load %arg0[%c175] : memref<208xf32, #tpu.memory_space<smem>>
    %712 = vector.broadcast %711 : f32 to vector<8x128xf32>
    %713 = arith.mulf %712, %702 : vector<8x128xf32>
    %714 = arith.addf %700, %713 : vector<8x128xf32>
    %c2_66 = arith.constant 2 : index
    %c0_67 = arith.constant 0 : index
    %c0_68 = arith.constant 0 : index
    %715 = vector.load %arg3[%c2_66, %c0_67, %c0_68] : memref<3x9x128xf32, #tpu.memory_space<vmem>>, vector<1x8x128xf32>
    %716 = vector.shape_cast %715 : vector<1x8x128xf32> to vector<8x128xf32>
    %c2_69 = arith.constant 2 : index
    %c1_70 = arith.constant 1 : index
    %c0_71 = arith.constant 0 : index
    %717 = vector.load %arg3[%c2_69, %c1_70, %c0_71] : memref<3x9x128xf32, #tpu.memory_space<vmem>>, vector<1x8x128xf32>
    %718 = vector.shape_cast %717 : vector<1x8x128xf32> to vector<8x128xf32>
    %719 = tpu.concatenate %716, %718 in 1 : vector<8x128xf32>, vector<8x128xf32> -> vector<8x256xf32>
    %c80 = arith.constant 80 : index
    %720 = memref.load %arg0[%c80] : memref<208xf32, #tpu.memory_space<smem>>
    %721 = vector.broadcast %720 : f32 to vector<8x128xf32>
    %722 = arith.mulf %721, %716 : vector<8x128xf32>
    %723 = arith.addf %706, %722 : vector<8x128xf32>
    %c128 = arith.constant 128 : index
    %724 = memref.load %arg0[%c128] : memref<208xf32, #tpu.memory_space<smem>>
    %725 = vector.broadcast %724 : f32 to vector<8x128xf32>
    %726 = arith.mulf %725, %716 : vector<8x128xf32>
    %727 = arith.addf %710, %726 : vector<8x128xf32>
    %c176 = arith.constant 176 : index
    %728 = memref.load %arg0[%c176] : memref<208xf32, #tpu.memory_space<smem>>
    %729 = vector.broadcast %728 : f32 to vector<8x128xf32>
    %730 = arith.mulf %729, %716 : vector<8x128xf32>
    %731 = arith.addf %714, %730 : vector<8x128xf32>
    %c255_i32_72 = arith.constant 255 : i32
    %732 = tpu.dynamic_rotate %719 by %c255_i32_72 dim 1 : vector<8x256xf32>, i32 -> vector<8x256xf32>
    %733 = vector.extract_strided_slice %732 {offsets = [0, 0], sizes = [8, 128], strides = [1, 1]} : vector<8x256xf32> to vector<8x128xf32>
    %c81 = arith.constant 81 : index
    %734 = memref.load %arg0[%c81] : memref<208xf32, #tpu.memory_space<smem>>
    %735 = vector.broadcast %734 : f32 to vector<8x128xf32>
    %736 = arith.mulf %735, %733 : vector<8x128xf32>
    %737 = arith.addf %723, %736 : vector<8x128xf32>
    %c129 = arith.constant 129 : index
    %738 = memref.load %arg0[%c129] : memref<208xf32, #tpu.memory_space<smem>>
    %739 = vector.broadcast %738 : f32 to vector<8x128xf32>
    %740 = arith.mulf %739, %733 : vector<8x128xf32>
    %741 = arith.addf %727, %740 : vector<8x128xf32>
    %c177 = arith.constant 177 : index
    %742 = memref.load %arg0[%c177] : memref<208xf32, #tpu.memory_space<smem>>
    %743 = vector.broadcast %742 : f32 to vector<8x128xf32>
    %744 = arith.mulf %743, %733 : vector<8x128xf32>
    %745 = arith.addf %731, %744 : vector<8x128xf32>
    %c254_i32_73 = arith.constant 254 : i32
    %746 = tpu.dynamic_rotate %719 by %c254_i32_73 dim 1 : vector<8x256xf32>, i32 -> vector<8x256xf32>
    %747 = vector.extract_strided_slice %746 {offsets = [0, 0], sizes = [8, 128], strides = [1, 1]} : vector<8x256xf32> to vector<8x128xf32>
    %c82 = arith.constant 82 : index
    %748 = memref.load %arg0[%c82] : memref<208xf32, #tpu.memory_space<smem>>
    %749 = vector.broadcast %748 : f32 to vector<8x128xf32>
    %750 = arith.mulf %749, %747 : vector<8x128xf32>
    %751 = arith.addf %737, %750 : vector<8x128xf32>
    %c130 = arith.constant 130 : index
    %752 = memref.load %arg0[%c130] : memref<208xf32, #tpu.memory_space<smem>>
    %753 = vector.broadcast %752 : f32 to vector<8x128xf32>
    %754 = arith.mulf %753, %747 : vector<8x128xf32>
    %755 = arith.addf %741, %754 : vector<8x128xf32>
    %c178 = arith.constant 178 : index
    %756 = memref.load %arg0[%c178] : memref<208xf32, #tpu.memory_space<smem>>
    %757 = vector.broadcast %756 : f32 to vector<8x128xf32>
    %758 = arith.mulf %757, %747 : vector<8x128xf32>
    %759 = arith.addf %745, %758 : vector<8x128xf32>
    %c253_i32_74 = arith.constant 253 : i32
    %760 = tpu.dynamic_rotate %719 by %c253_i32_74 dim 1 : vector<8x256xf32>, i32 -> vector<8x256xf32>
    %761 = vector.extract_strided_slice %760 {offsets = [0, 0], sizes = [8, 128], strides = [1, 1]} : vector<8x256xf32> to vector<8x128xf32>
    %c83 = arith.constant 83 : index
    %762 = memref.load %arg0[%c83] : memref<208xf32, #tpu.memory_space<smem>>
    %763 = vector.broadcast %762 : f32 to vector<8x128xf32>
    %764 = arith.mulf %763, %761 : vector<8x128xf32>
    %765 = arith.addf %751, %764 : vector<8x128xf32>
    %c131 = arith.constant 131 : index
    %766 = memref.load %arg0[%c131] : memref<208xf32, #tpu.memory_space<smem>>
    %767 = vector.broadcast %766 : f32 to vector<8x128xf32>
    %768 = arith.mulf %767, %761 : vector<8x128xf32>
    %769 = arith.addf %755, %768 : vector<8x128xf32>
    %c179 = arith.constant 179 : index
    %770 = memref.load %arg0[%c179] : memref<208xf32, #tpu.memory_space<smem>>
    %771 = vector.broadcast %770 : f32 to vector<8x128xf32>
    %772 = arith.mulf %771, %761 : vector<8x128xf32>
    %773 = arith.addf %759, %772 : vector<8x128xf32>
    %c252_i32_75 = arith.constant 252 : i32
    %774 = tpu.dynamic_rotate %719 by %c252_i32_75 dim 1 : vector<8x256xf32>, i32 -> vector<8x256xf32>
    %775 = vector.extract_strided_slice %774 {offsets = [0, 0], sizes = [8, 128], strides = [1, 1]} : vector<8x256xf32> to vector<8x128xf32>
    %c84 = arith.constant 84 : index
    %776 = memref.load %arg0[%c84] : memref<208xf32, #tpu.memory_space<smem>>
    %777 = vector.broadcast %776 : f32 to vector<8x128xf32>
    %778 = arith.mulf %777, %775 : vector<8x128xf32>
    %779 = arith.addf %765, %778 : vector<8x128xf32>
    %c132 = arith.constant 132 : index
    %780 = memref.load %arg0[%c132] : memref<208xf32, #tpu.memory_space<smem>>
    %781 = vector.broadcast %780 : f32 to vector<8x128xf32>
    %782 = arith.mulf %781, %775 : vector<8x128xf32>
    %783 = arith.addf %769, %782 : vector<8x128xf32>
    %c180 = arith.constant 180 : index
    %784 = memref.load %arg0[%c180] : memref<208xf32, #tpu.memory_space<smem>>
    %785 = vector.broadcast %784 : f32 to vector<8x128xf32>
    %786 = arith.mulf %785, %775 : vector<8x128xf32>
    %787 = arith.addf %773, %786 : vector<8x128xf32>
    %c251_i32_76 = arith.constant 251 : i32
    %788 = tpu.dynamic_rotate %719 by %c251_i32_76 dim 1 : vector<8x256xf32>, i32 -> vector<8x256xf32>
    %789 = vector.extract_strided_slice %788 {offsets = [0, 0], sizes = [8, 128], strides = [1, 1]} : vector<8x256xf32> to vector<8x128xf32>
    %c85 = arith.constant 85 : index
    %790 = memref.load %arg0[%c85] : memref<208xf32, #tpu.memory_space<smem>>
    %791 = vector.broadcast %790 : f32 to vector<8x128xf32>
    %792 = arith.mulf %791, %789 : vector<8x128xf32>
    %793 = arith.addf %779, %792 : vector<8x128xf32>
    %c133 = arith.constant 133 : index
    %794 = memref.load %arg0[%c133] : memref<208xf32, #tpu.memory_space<smem>>
    %795 = vector.broadcast %794 : f32 to vector<8x128xf32>
    %796 = arith.mulf %795, %789 : vector<8x128xf32>
    %797 = arith.addf %783, %796 : vector<8x128xf32>
    %c181 = arith.constant 181 : index
    %798 = memref.load %arg0[%c181] : memref<208xf32, #tpu.memory_space<smem>>
    %799 = vector.broadcast %798 : f32 to vector<8x128xf32>
    %800 = arith.mulf %799, %789 : vector<8x128xf32>
    %801 = arith.addf %787, %800 : vector<8x128xf32>
    %c250_i32_77 = arith.constant 250 : i32
    %802 = tpu.dynamic_rotate %719 by %c250_i32_77 dim 1 : vector<8x256xf32>, i32 -> vector<8x256xf32>
    %803 = vector.extract_strided_slice %802 {offsets = [0, 0], sizes = [8, 128], strides = [1, 1]} : vector<8x256xf32> to vector<8x128xf32>
    %c86 = arith.constant 86 : index
    %804 = memref.load %arg0[%c86] : memref<208xf32, #tpu.memory_space<smem>>
    %805 = vector.broadcast %804 : f32 to vector<8x128xf32>
    %806 = arith.mulf %805, %803 : vector<8x128xf32>
    %807 = arith.addf %793, %806 : vector<8x128xf32>
    %c134 = arith.constant 134 : index
    %808 = memref.load %arg0[%c134] : memref<208xf32, #tpu.memory_space<smem>>
    %809 = vector.broadcast %808 : f32 to vector<8x128xf32>
    %810 = arith.mulf %809, %803 : vector<8x128xf32>
    %811 = arith.addf %797, %810 : vector<8x128xf32>
    %c182 = arith.constant 182 : index
    %812 = memref.load %arg0[%c182] : memref<208xf32, #tpu.memory_space<smem>>
    %813 = vector.broadcast %812 : f32 to vector<8x128xf32>
    %814 = arith.mulf %813, %803 : vector<8x128xf32>
    %815 = arith.addf %801, %814 : vector<8x128xf32>
    %c249_i32_78 = arith.constant 249 : i32
    %816 = tpu.dynamic_rotate %719 by %c249_i32_78 dim 1 : vector<8x256xf32>, i32 -> vector<8x256xf32>
    %817 = vector.extract_strided_slice %816 {offsets = [0, 0], sizes = [8, 128], strides = [1, 1]} : vector<8x256xf32> to vector<8x128xf32>
    %c87 = arith.constant 87 : index
    %818 = memref.load %arg0[%c87] : memref<208xf32, #tpu.memory_space<smem>>
    %819 = vector.broadcast %818 : f32 to vector<8x128xf32>
    %820 = arith.mulf %819, %817 : vector<8x128xf32>
    %821 = arith.addf %807, %820 : vector<8x128xf32>
    %c135 = arith.constant 135 : index
    %822 = memref.load %arg0[%c135] : memref<208xf32, #tpu.memory_space<smem>>
    %823 = vector.broadcast %822 : f32 to vector<8x128xf32>
    %824 = arith.mulf %823, %817 : vector<8x128xf32>
    %825 = arith.addf %811, %824 : vector<8x128xf32>
    %c183 = arith.constant 183 : index
    %826 = memref.load %arg0[%c183] : memref<208xf32, #tpu.memory_space<smem>>
    %827 = vector.broadcast %826 : f32 to vector<8x128xf32>
    %828 = arith.mulf %827, %817 : vector<8x128xf32>
    %829 = arith.addf %815, %828 : vector<8x128xf32>
    %c248_i32_79 = arith.constant 248 : i32
    %830 = tpu.dynamic_rotate %719 by %c248_i32_79 dim 1 : vector<8x256xf32>, i32 -> vector<8x256xf32>
    %831 = vector.extract_strided_slice %830 {offsets = [0, 0], sizes = [8, 128], strides = [1, 1]} : vector<8x256xf32> to vector<8x128xf32>
    %c88 = arith.constant 88 : index
    %832 = memref.load %arg0[%c88] : memref<208xf32, #tpu.memory_space<smem>>
    %833 = vector.broadcast %832 : f32 to vector<8x128xf32>
    %834 = arith.mulf %833, %831 : vector<8x128xf32>
    %835 = arith.addf %821, %834 : vector<8x128xf32>
    %c136 = arith.constant 136 : index
    %836 = memref.load %arg0[%c136] : memref<208xf32, #tpu.memory_space<smem>>
    %837 = vector.broadcast %836 : f32 to vector<8x128xf32>
    %838 = arith.mulf %837, %831 : vector<8x128xf32>
    %839 = arith.addf %825, %838 : vector<8x128xf32>
    %c184 = arith.constant 184 : index
    %840 = memref.load %arg0[%c184] : memref<208xf32, #tpu.memory_space<smem>>
    %841 = vector.broadcast %840 : f32 to vector<8x128xf32>
    %842 = arith.mulf %841, %831 : vector<8x128xf32>
    %843 = arith.addf %829, %842 : vector<8x128xf32>
    %c247_i32_80 = arith.constant 247 : i32
    %844 = tpu.dynamic_rotate %719 by %c247_i32_80 dim 1 : vector<8x256xf32>, i32 -> vector<8x256xf32>
    %845 = vector.extract_strided_slice %844 {offsets = [0, 0], sizes = [8, 128], strides = [1, 1]} : vector<8x256xf32> to vector<8x128xf32>
    %c89 = arith.constant 89 : index
    %846 = memref.load %arg0[%c89] : memref<208xf32, #tpu.memory_space<smem>>
    %847 = vector.broadcast %846 : f32 to vector<8x128xf32>
    %848 = arith.mulf %847, %845 : vector<8x128xf32>
    %849 = arith.addf %835, %848 : vector<8x128xf32>
    %c137 = arith.constant 137 : index
    %850 = memref.load %arg0[%c137] : memref<208xf32, #tpu.memory_space<smem>>
    %851 = vector.broadcast %850 : f32 to vector<8x128xf32>
    %852 = arith.mulf %851, %845 : vector<8x128xf32>
    %853 = arith.addf %839, %852 : vector<8x128xf32>
    %c185 = arith.constant 185 : index
    %854 = memref.load %arg0[%c185] : memref<208xf32, #tpu.memory_space<smem>>
    %855 = vector.broadcast %854 : f32 to vector<8x128xf32>
    %856 = arith.mulf %855, %845 : vector<8x128xf32>
    %857 = arith.addf %843, %856 : vector<8x128xf32>
    %c246_i32_81 = arith.constant 246 : i32
    %858 = tpu.dynamic_rotate %719 by %c246_i32_81 dim 1 : vector<8x256xf32>, i32 -> vector<8x256xf32>
    %859 = vector.extract_strided_slice %858 {offsets = [0, 0], sizes = [8, 128], strides = [1, 1]} : vector<8x256xf32> to vector<8x128xf32>
    %c90 = arith.constant 90 : index
    %860 = memref.load %arg0[%c90] : memref<208xf32, #tpu.memory_space<smem>>
    %861 = vector.broadcast %860 : f32 to vector<8x128xf32>
    %862 = arith.mulf %861, %859 : vector<8x128xf32>
    %863 = arith.addf %849, %862 : vector<8x128xf32>
    %c138 = arith.constant 138 : index
    %864 = memref.load %arg0[%c138] : memref<208xf32, #tpu.memory_space<smem>>
    %865 = vector.broadcast %864 : f32 to vector<8x128xf32>
    %866 = arith.mulf %865, %859 : vector<8x128xf32>
    %867 = arith.addf %853, %866 : vector<8x128xf32>
    %c186 = arith.constant 186 : index
    %868 = memref.load %arg0[%c186] : memref<208xf32, #tpu.memory_space<smem>>
    %869 = vector.broadcast %868 : f32 to vector<8x128xf32>
    %870 = arith.mulf %869, %859 : vector<8x128xf32>
    %871 = arith.addf %857, %870 : vector<8x128xf32>
    %c245_i32_82 = arith.constant 245 : i32
    %872 = tpu.dynamic_rotate %719 by %c245_i32_82 dim 1 : vector<8x256xf32>, i32 -> vector<8x256xf32>
    %873 = vector.extract_strided_slice %872 {offsets = [0, 0], sizes = [8, 128], strides = [1, 1]} : vector<8x256xf32> to vector<8x128xf32>
    %c91 = arith.constant 91 : index
    %874 = memref.load %arg0[%c91] : memref<208xf32, #tpu.memory_space<smem>>
    %875 = vector.broadcast %874 : f32 to vector<8x128xf32>
    %876 = arith.mulf %875, %873 : vector<8x128xf32>
    %877 = arith.addf %863, %876 : vector<8x128xf32>
    %c139 = arith.constant 139 : index
    %878 = memref.load %arg0[%c139] : memref<208xf32, #tpu.memory_space<smem>>
    %879 = vector.broadcast %878 : f32 to vector<8x128xf32>
    %880 = arith.mulf %879, %873 : vector<8x128xf32>
    %881 = arith.addf %867, %880 : vector<8x128xf32>
    %c187 = arith.constant 187 : index
    %882 = memref.load %arg0[%c187] : memref<208xf32, #tpu.memory_space<smem>>
    %883 = vector.broadcast %882 : f32 to vector<8x128xf32>
    %884 = arith.mulf %883, %873 : vector<8x128xf32>
    %885 = arith.addf %871, %884 : vector<8x128xf32>
    %c244_i32_83 = arith.constant 244 : i32
    %886 = tpu.dynamic_rotate %719 by %c244_i32_83 dim 1 : vector<8x256xf32>, i32 -> vector<8x256xf32>
    %887 = vector.extract_strided_slice %886 {offsets = [0, 0], sizes = [8, 128], strides = [1, 1]} : vector<8x256xf32> to vector<8x128xf32>
    %c92 = arith.constant 92 : index
    %888 = memref.load %arg0[%c92] : memref<208xf32, #tpu.memory_space<smem>>
    %889 = vector.broadcast %888 : f32 to vector<8x128xf32>
    %890 = arith.mulf %889, %887 : vector<8x128xf32>
    %891 = arith.addf %877, %890 : vector<8x128xf32>
    %c140 = arith.constant 140 : index
    %892 = memref.load %arg0[%c140] : memref<208xf32, #tpu.memory_space<smem>>
    %893 = vector.broadcast %892 : f32 to vector<8x128xf32>
    %894 = arith.mulf %893, %887 : vector<8x128xf32>
    %895 = arith.addf %881, %894 : vector<8x128xf32>
    %c188 = arith.constant 188 : index
    %896 = memref.load %arg0[%c188] : memref<208xf32, #tpu.memory_space<smem>>
    %897 = vector.broadcast %896 : f32 to vector<8x128xf32>
    %898 = arith.mulf %897, %887 : vector<8x128xf32>
    %899 = arith.addf %885, %898 : vector<8x128xf32>
    %c243_i32_84 = arith.constant 243 : i32
    %900 = tpu.dynamic_rotate %719 by %c243_i32_84 dim 1 : vector<8x256xf32>, i32 -> vector<8x256xf32>
    %901 = vector.extract_strided_slice %900 {offsets = [0, 0], sizes = [8, 128], strides = [1, 1]} : vector<8x256xf32> to vector<8x128xf32>
    %c93 = arith.constant 93 : index
    %902 = memref.load %arg0[%c93] : memref<208xf32, #tpu.memory_space<smem>>
    %903 = vector.broadcast %902 : f32 to vector<8x128xf32>
    %904 = arith.mulf %903, %901 : vector<8x128xf32>
    %905 = arith.addf %891, %904 : vector<8x128xf32>
    %c141 = arith.constant 141 : index
    %906 = memref.load %arg0[%c141] : memref<208xf32, #tpu.memory_space<smem>>
    %907 = vector.broadcast %906 : f32 to vector<8x128xf32>
    %908 = arith.mulf %907, %901 : vector<8x128xf32>
    %909 = arith.addf %895, %908 : vector<8x128xf32>
    %c189 = arith.constant 189 : index
    %910 = memref.load %arg0[%c189] : memref<208xf32, #tpu.memory_space<smem>>
    %911 = vector.broadcast %910 : f32 to vector<8x128xf32>
    %912 = arith.mulf %911, %901 : vector<8x128xf32>
    %913 = arith.addf %899, %912 : vector<8x128xf32>
    %c242_i32_85 = arith.constant 242 : i32
    %914 = tpu.dynamic_rotate %719 by %c242_i32_85 dim 1 : vector<8x256xf32>, i32 -> vector<8x256xf32>
    %915 = vector.extract_strided_slice %914 {offsets = [0, 0], sizes = [8, 128], strides = [1, 1]} : vector<8x256xf32> to vector<8x128xf32>
    %c94 = arith.constant 94 : index
    %916 = memref.load %arg0[%c94] : memref<208xf32, #tpu.memory_space<smem>>
    %917 = vector.broadcast %916 : f32 to vector<8x128xf32>
    %918 = arith.mulf %917, %915 : vector<8x128xf32>
    %919 = arith.addf %905, %918 : vector<8x128xf32>
    %c142 = arith.constant 142 : index
    %920 = memref.load %arg0[%c142] : memref<208xf32, #tpu.memory_space<smem>>
    %921 = vector.broadcast %920 : f32 to vector<8x128xf32>
    %922 = arith.mulf %921, %915 : vector<8x128xf32>
    %923 = arith.addf %909, %922 : vector<8x128xf32>
    %c190 = arith.constant 190 : index
    %924 = memref.load %arg0[%c190] : memref<208xf32, #tpu.memory_space<smem>>
    %925 = vector.broadcast %924 : f32 to vector<8x128xf32>
    %926 = arith.mulf %925, %915 : vector<8x128xf32>
    %927 = arith.addf %913, %926 : vector<8x128xf32>
    %c241_i32_86 = arith.constant 241 : i32
    %928 = tpu.dynamic_rotate %719 by %c241_i32_86 dim 1 : vector<8x256xf32>, i32 -> vector<8x256xf32>
    %929 = vector.extract_strided_slice %928 {offsets = [0, 0], sizes = [8, 128], strides = [1, 1]} : vector<8x256xf32> to vector<8x128xf32>
    %c95 = arith.constant 95 : index
    %930 = memref.load %arg0[%c95] : memref<208xf32, #tpu.memory_space<smem>>
    %931 = vector.broadcast %930 : f32 to vector<8x128xf32>
    %932 = arith.mulf %931, %929 : vector<8x128xf32>
    %933 = arith.addf %919, %932 : vector<8x128xf32>
    %c143 = arith.constant 143 : index
    %934 = memref.load %arg0[%c143] : memref<208xf32, #tpu.memory_space<smem>>
    %935 = vector.broadcast %934 : f32 to vector<8x128xf32>
    %936 = arith.mulf %935, %929 : vector<8x128xf32>
    %937 = arith.addf %923, %936 : vector<8x128xf32>
    %c191 = arith.constant 191 : index
    %938 = memref.load %arg0[%c191] : memref<208xf32, #tpu.memory_space<smem>>
    %939 = vector.broadcast %938 : f32 to vector<8x128xf32>
    %940 = arith.mulf %939, %929 : vector<8x128xf32>
    %941 = arith.addf %927, %940 : vector<8x128xf32>
    %942 = math.tanh %933 : vector<8x128xf32>
    %c0_87 = arith.constant 0 : index
    %c0_88 = arith.constant 0 : index
    %c0_89 = arith.constant 0 : index
    %943 = vector.load %arg4[%c0_87, %c0_88, %c0_89] : memref<3x9x128xf32, #tpu.memory_space<vmem>>, vector<1x8x128xf32>
    %944 = vector.shape_cast %943 : vector<1x8x128xf32> to vector<8x128xf32>
    %945 = vector.shape_cast %942 : vector<8x128xf32> to vector<1x8x128xf32>
    tpu.vector_store %arg4[%c0_87, %c0_88, %c0_89], %945 {strides = array<i32>} : memref<3x9x128xf32, #tpu.memory_space<vmem>>, vector<1x8x128xf32>,
    %c0_90 = arith.constant 0 : index
    %c8_91 = arith.constant 8 : index
    %c0_92 = arith.constant 0 : index
    %946 = vector.load %arg4[%c0_90, %c8_91, %c0_92] : memref<3x9x128xf32, #tpu.memory_space<vmem>>, vector<1x1x128xf32>
    %947 = vector.shape_cast %946 : vector<1x1x128xf32> to vector<1x128xf32>
    %948 = vector.shape_cast %0 : vector<1x128xf32> to vector<1x1x128xf32>
    tpu.vector_store %arg4[%c0_90, %c8_91, %c0_92], %948 {strides = array<i32>} : memref<3x9x128xf32, #tpu.memory_space<vmem>>, vector<1x1x128xf32>,
    %949 = math.tanh %937 : vector<8x128xf32>
    %c1_93 = arith.constant 1 : index
    %c0_94 = arith.constant 0 : index
    %c0_95 = arith.constant 0 : index
    %950 = vector.load %arg4[%c1_93, %c0_94, %c0_95] : memref<3x9x128xf32, #tpu.memory_space<vmem>>, vector<1x8x128xf32>
    %951 = vector.shape_cast %950 : vector<1x8x128xf32> to vector<8x128xf32>
    %952 = vector.shape_cast %949 : vector<8x128xf32> to vector<1x8x128xf32>
    tpu.vector_store %arg4[%c1_93, %c0_94, %c0_95], %952 {strides = array<i32>} : memref<3x9x128xf32, #tpu.memory_space<vmem>>, vector<1x8x128xf32>,
    %c1_96 = arith.constant 1 : index
    %c8_97 = arith.constant 8 : index
    %c0_98 = arith.constant 0 : index
    %953 = vector.load %arg4[%c1_96, %c8_97, %c0_98] : memref<3x9x128xf32, #tpu.memory_space<vmem>>, vector<1x1x128xf32>
    %954 = vector.shape_cast %953 : vector<1x1x128xf32> to vector<1x128xf32>
    %955 = vector.shape_cast %0 : vector<1x128xf32> to vector<1x1x128xf32>
    tpu.vector_store %arg4[%c1_96, %c8_97, %c0_98], %955 {strides = array<i32>} : memref<3x9x128xf32, #tpu.memory_space<vmem>>, vector<1x1x128xf32>,
    %956 = math.tanh %941 : vector<8x128xf32>
    %c2_99 = arith.constant 2 : index
    %c0_100 = arith.constant 0 : index
    %c0_101 = arith.constant 0 : index
    %957 = vector.load %arg4[%c2_99, %c0_100, %c0_101] : memref<3x9x128xf32, #tpu.memory_space<vmem>>, vector<1x8x128xf32>
    %958 = vector.shape_cast %957 : vector<1x8x128xf32> to vector<8x128xf32>
    %959 = vector.shape_cast %956 : vector<8x128xf32> to vector<1x8x128xf32>
    tpu.vector_store %arg4[%c2_99, %c0_100, %c0_101], %959 {strides = array<i32>} : memref<3x9x128xf32, #tpu.memory_space<vmem>>, vector<1x8x128xf32>,
    %c2_102 = arith.constant 2 : index
    %c8_103 = arith.constant 8 : index
    %c0_104 = arith.constant 0 : index
    %960 = vector.load %arg4[%c2_102, %c8_103, %c0_104] : memref<3x9x128xf32, #tpu.memory_space<vmem>>, vector<1x1x128xf32>
    %961 = vector.shape_cast %960 : vector<1x1x128xf32> to vector<1x128xf32>
    %962 = vector.shape_cast %0 : vector<1x128xf32> to vector<1x1x128xf32>
    tpu.vector_store %arg4[%c2_102, %c8_103, %c0_104], %962 {strides = array<i32>} : memref<3x9x128xf32, #tpu.memory_space<vmem>>, vector<1x1x128xf32>,
    %c207 = arith.constant 207 : index
    %963 = memref.load %arg0[%c207] : memref<208xf32, #tpu.memory_space<smem>>
    %964 = vector.broadcast %963 : f32 to vector<8x128xf32>
    %c0_105 = arith.constant 0 : index
    %c0_106 = arith.constant 0 : index
    %c0_107 = arith.constant 0 : index
    %965 = vector.load %arg4[%c0_105, %c0_106, %c0_107] : memref<3x9x128xf32, #tpu.memory_space<vmem>>, vector<1x8x128xf32>
    %966 = vector.shape_cast %965 : vector<1x8x128xf32> to vector<8x128xf32>
    %c0_108 = arith.constant 0 : index
    %c1_109 = arith.constant 1 : index
    %c0_110 = arith.constant 0 : index
    %967 = vector.load %arg4[%c0_108, %c1_109, %c0_110] : memref<3x9x128xf32, #tpu.memory_space<vmem>>, vector<1x8x128xf32>
    %968 = vector.shape_cast %967 : vector<1x8x128xf32> to vector<8x128xf32>
    %969 = tpu.concatenate %966, %968 in 1 : vector<8x128xf32>, vector<8x128xf32> -> vector<8x256xf32>
    %c192 = arith.constant 192 : index
    %970 = memref.load %arg0[%c192] : memref<208xf32, #tpu.memory_space<smem>>
    %971 = vector.broadcast %970 : f32 to vector<8x128xf32>
    %972 = arith.mulf %971, %966 : vector<8x128xf32>
    %973 = arith.addf %964, %972 : vector<8x128xf32>
    %c255_i32_111 = arith.constant 255 : i32
    %974 = tpu.dynamic_rotate %969 by %c255_i32_111 dim 1 : vector<8x256xf32>, i32 -> vector<8x256xf32>
    %975 = vector.extract_strided_slice %974 {offsets = [0, 0], sizes = [8, 128], strides = [1, 1]} : vector<8x256xf32> to vector<8x128xf32>
    %c193 = arith.constant 193 : index
    %976 = memref.load %arg0[%c193] : memref<208xf32, #tpu.memory_space<smem>>
    %977 = vector.broadcast %976 : f32 to vector<8x128xf32>
    %978 = arith.mulf %977, %975 : vector<8x128xf32>
    %979 = arith.addf %973, %978 : vector<8x128xf32>
    %c254_i32_112 = arith.constant 254 : i32
    %980 = tpu.dynamic_rotate %969 by %c254_i32_112 dim 1 : vector<8x256xf32>, i32 -> vector<8x256xf32>
    %981 = vector.extract_strided_slice %980 {offsets = [0, 0], sizes = [8, 128], strides = [1, 1]} : vector<8x256xf32> to vector<8x128xf32>
    %c194 = arith.constant 194 : index
    %982 = memref.load %arg0[%c194] : memref<208xf32, #tpu.memory_space<smem>>
    %983 = vector.broadcast %982 : f32 to vector<8x128xf32>
    %984 = arith.mulf %983, %981 : vector<8x128xf32>
    %985 = arith.addf %979, %984 : vector<8x128xf32>
    %c1_113 = arith.constant 1 : index
    %c0_114 = arith.constant 0 : index
    %c0_115 = arith.constant 0 : index
    %986 = vector.load %arg4[%c1_113, %c0_114, %c0_115] : memref<3x9x128xf32, #tpu.memory_space<vmem>>, vector<1x8x128xf32>
    %987 = vector.shape_cast %986 : vector<1x8x128xf32> to vector<8x128xf32>
    %c1_116 = arith.constant 1 : index
    %c1_117 = arith.constant 1 : index
    %c0_118 = arith.constant 0 : index
    %988 = vector.load %arg4[%c1_116, %c1_117, %c0_118] : memref<3x9x128xf32, #tpu.memory_space<vmem>>, vector<1x8x128xf32>
    %989 = vector.shape_cast %988 : vector<1x8x128xf32> to vector<8x128xf32>
    %990 = tpu.concatenate %987, %989 in 1 : vector<8x128xf32>, vector<8x128xf32> -> vector<8x256xf32>
    %c195 = arith.constant 195 : index
    %991 = memref.load %arg0[%c195] : memref<208xf32, #tpu.memory_space<smem>>
    %992 = vector.broadcast %991 : f32 to vector<8x128xf32>
    %993 = arith.mulf %992, %987 : vector<8x128xf32>
    %994 = arith.addf %985, %993 : vector<8x128xf32>
    %c255_i32_119 = arith.constant 255 : i32
    %995 = tpu.dynamic_rotate %990 by %c255_i32_119 dim 1 : vector<8x256xf32>, i32 -> vector<8x256xf32>
    %996 = vector.extract_strided_slice %995 {offsets = [0, 0], sizes = [8, 128], strides = [1, 1]} : vector<8x256xf32> to vector<8x128xf32>
    %c196 = arith.constant 196 : index
    %997 = memref.load %arg0[%c196] : memref<208xf32, #tpu.memory_space<smem>>
    %998 = vector.broadcast %997 : f32 to vector<8x128xf32>
    %999 = arith.mulf %998, %996 : vector<8x128xf32>
    %1000 = arith.addf %994, %999 : vector<8x128xf32>
    %c254_i32_120 = arith.constant 254 : i32
    %1001 = tpu.dynamic_rotate %990 by %c254_i32_120 dim 1 : vector<8x256xf32>, i32 -> vector<8x256xf32>
    %1002 = vector.extract_strided_slice %1001 {offsets = [0, 0], sizes = [8, 128], strides = [1, 1]} : vector<8x256xf32> to vector<8x128xf32>
    %c197 = arith.constant 197 : index
    %1003 = memref.load %arg0[%c197] : memref<208xf32, #tpu.memory_space<smem>>
    %1004 = vector.broadcast %1003 : f32 to vector<8x128xf32>
    %1005 = arith.mulf %1004, %1002 : vector<8x128xf32>
    %1006 = arith.addf %1000, %1005 : vector<8x128xf32>
    %c2_121 = arith.constant 2 : index
    %c0_122 = arith.constant 0 : index
    %c0_123 = arith.constant 0 : index
    %1007 = vector.load %arg4[%c2_121, %c0_122, %c0_123] : memref<3x9x128xf32, #tpu.memory_space<vmem>>, vector<1x8x128xf32>
    %1008 = vector.shape_cast %1007 : vector<1x8x128xf32> to vector<8x128xf32>
    %c2_124 = arith.constant 2 : index
    %c1_125 = arith.constant 1 : index
    %c0_126 = arith.constant 0 : index
    %1009 = vector.load %arg4[%c2_124, %c1_125, %c0_126] : memref<3x9x128xf32, #tpu.memory_space<vmem>>, vector<1x8x128xf32>
    %1010 = vector.shape_cast %1009 : vector<1x8x128xf32> to vector<8x128xf32>
    %1011 = tpu.concatenate %1008, %1010 in 1 : vector<8x128xf32>, vector<8x128xf32> -> vector<8x256xf32>
    %c198 = arith.constant 198 : index
    %1012 = memref.load %arg0[%c198] : memref<208xf32, #tpu.memory_space<smem>>
    %1013 = vector.broadcast %1012 : f32 to vector<8x128xf32>
    %1014 = arith.mulf %1013, %1008 : vector<8x128xf32>
    %1015 = arith.addf %1006, %1014 : vector<8x128xf32>
    %c255_i32_127 = arith.constant 255 : i32
    %1016 = tpu.dynamic_rotate %1011 by %c255_i32_127 dim 1 : vector<8x256xf32>, i32 -> vector<8x256xf32>
    %1017 = vector.extract_strided_slice %1016 {offsets = [0, 0], sizes = [8, 128], strides = [1, 1]} : vector<8x256xf32> to vector<8x128xf32>
    %c199 = arith.constant 199 : index
    %1018 = memref.load %arg0[%c199] : memref<208xf32, #tpu.memory_space<smem>>
    %1019 = vector.broadcast %1018 : f32 to vector<8x128xf32>
    %1020 = arith.mulf %1019, %1017 : vector<8x128xf32>
    %1021 = arith.addf %1015, %1020 : vector<8x128xf32>
    %c254_i32_128 = arith.constant 254 : i32
    %1022 = tpu.dynamic_rotate %1011 by %c254_i32_128 dim 1 : vector<8x256xf32>, i32 -> vector<8x256xf32>
    %1023 = vector.extract_strided_slice %1022 {offsets = [0, 0], sizes = [8, 128], strides = [1, 1]} : vector<8x256xf32> to vector<8x128xf32>
    %c200 = arith.constant 200 : index
    %1024 = memref.load %arg0[%c200] : memref<208xf32, #tpu.memory_space<smem>>
    %1025 = vector.broadcast %1024 : f32 to vector<8x128xf32>
    %1026 = arith.mulf %1025, %1023 : vector<8x128xf32>
    %1027 = arith.addf %1021, %1026 : vector<8x128xf32>
    %c0_129 = arith.constant 0 : index
    %c0_130 = arith.constant 0 : index
    %c0_131 = arith.constant 0 : index
    %1028 = vector.load %arg2[%c0_129, %c0_130, %c0_131] : memref<1x8x128xf32, #tpu.memory_space<vmem>>, vector<1x8x128xf32>
    %1029 = vector.shape_cast %1028 : vector<1x8x128xf32> to vector<8x128xf32>
    %1030 = vector.shape_cast %1027 : vector<8x128xf32> to vector<1x8x128xf32>
    tpu.vector_store %arg2[%c0_129, %c0_130, %c0_131], %1030 {strides = array<i32>} : memref<1x8x128xf32, #tpu.memory_space<vmem>>, vector<1x8x128xf32>,
    return
  }
}

</mosaic_0001>

<bundles_post_ra>
// kernel: _model_tanh_forward.1
= control target key start
LH: loop header
LB: loop body
LE: loop exit
PB: predicated region body
PF: predicated region fallthrough
CT: control target
= control target key end

     0   :  { %s2847_s0 = inlined_call_operand.vmem [shape: f32[208], index: 0, kind: input, shape index: {}]   ;;  %s2848_s1 = inlined_call_operand.vmem [shape: f32[1,9,128], index: 1, kind: input, shape index: {}]   ;;  %s2849_s2 = inlined_call_operand.vmem [shape: f32[1,8,128], index: 2, kind: output, shape index: {}]  }
   0x1   :  { %2892 = sst [smem:[#allocation20_spill]] %s2849_s2 }
   0x2   :  { %7 = vsyncpa [#allocation5], 0  ;;  %s14_s11 = sshll.u32 %s2847_s0, 4  ;;  %s15_s11 = int_to_ptr.vmem [resolvable:$true] %s14_s11 }
   0x3   :  { %s1467_s12 = scalar_lea.vmem %s15_s11, 32  ;;  %p1472_p1 = scmp.lt.s32.totalorder %s15_s11, %s15_s11 }
   0x4   :  { %p1468_p0 = scmp.ne.s32.totalorder %s15_s11, %s1467_s12  ;;  %p1473_p2 = scmp.lt.s32.totalorder %s1467_s12, %s1467_s12 }
   0x6   :  { %p1474_p3 = por %p1473_p2, %p1472_p1 }
   0x8   :  { %p1475_p4 = pnand %p1474_p3, %p1468_p0 }
   0xa   :  { %1478 = shalt.err (!%p1475_p4)
}
   0xb   :  { %s1481_s13 = smov [#allocation4]  }
   0xc   :  { %17 = dma.vmem_to_smem %s15_s11, 32, %s1481_s13, [#allocation5]  }
   0xd   :  { %1479 = dma.done.wait [#allocation5], 32  }
   0xe   :  { %1480 = vsyncadd [#allocation5], 4294967264 }
   0xf   :  { %23 = sfence }
  0x10   :  { %v1519_v0 = vld [vmem:[%s2848_s1] sm:$0xff]  ;;  %s2872_s16 = smov 126   ;;  %s2874_s0 = smov 127   ;;  %v1493_v2 = vmov 0.0   ;;  %v48_v7 = vlaneseq }
  0x11   :  { %64 = vrot.lane.b32.xlu1 %v1519_v0, %s2872_s16  ;;  %44 = vrot.lane.b32.xlu0 %v1519_v0, %s2874_s0  ;;  %v31_v1 = vld [vmem:[%s2848_s1 + $0x1] sm:$0xff]  ;;  %s1484_s19 = smov 125   ;;  %s1485_s20 = smov 124   ;;  %318 = vst [vmem:[#allocation2 + $0x8] sm:$0x1] %v1493_v2 }
  0x12   :  { %s2870_s21 = smov 123   ;;  %s2868_s1 = smov 122   ;;  %322 = vst [vmem:[#allocation2 + $0x18] sm:$0x1] %v1493_v2  ;;  %326 = vst [vmem:[#allocation2 + $0x28] sm:$0x1] %v1493_v2 }
  0x13   :  { %s2866_s22 = smov 121   ;;  %s2864_s23 = smov 120   ;;  %1142 = vst [vmem:[#allocation3 + $0x8] sm:$0x1] %v1493_v2  ;;  %1146 = vst [vmem:[#allocation3 + $0x18] sm:$0x1] %v1493_v2 }
  0x14   :  { %s2862_s24 = smov 119   ;;  %s2860_s25 = smov 118   ;;  %1150 = vst [vmem:[#allocation3 + $0x28] sm:$0x1] %v1493_v2  ;;  %v1619_v10 = vand.u32 127, %v48_v7 }
  0x15   :  { %66 = vrot.lane.b32.xlu1 %v31_v1, %s2872_s16  ;;  %46 = vrot.lane.b32.xlu0 %v31_v1, %s2874_s0  ;;  %s2858_s26 = smov 117   ;;  %s2856_s27 = smov 116  }
  0x16   :  { %s2854_s28 = smov 115   ;;  %s2852_s29 = smov 114   ;;  %vm50_vm0 = vcmp.lt.s32.totalorder %v1619_v10, 127  ;;  %vm68_vm1 = vcmp.lt.s32.totalorder %v1619_v10, 126  ;;  %vm86_vm2 = vcmp.lt.s32.totalorder %v1619_v10, 125  ;;  %vm104_vm3 = vcmp.lt.s32.totalorder %v1619_v10, 124 }
  0x17   :  { %s2850_s30 = smov 113   ;;  %s1569_s3 = sld [smem:[#allocation4 + $0x2]]  ;;  %vm122_vm4 = vcmp.lt.s32.totalorder %v1619_v10, 123  ;;  %vm140_vm5 = vcmp.lt.s32.totalorder %v1619_v10, 122  ;;  %vm158_vm6 = vcmp.lt.s32.totalorder %v1619_v10, 121  ;;  %vm176_vm7 = vcmp.lt.s32.totalorder %v1619_v10, 120 }
  0x18   :  { %s1571_s4 = sld [smem:[#allocation4 + $0x12]]  ;;  %vm194_vm8 = vcmp.lt.s32.totalorder %v1619_v10, 119  ;;  %vm212_vm9 = vcmp.lt.s32.totalorder %v1619_v10, 118  ;;  %vm230_vm10 = vcmp.lt.s32.totalorder %v1619_v10, 117  ;;  %vm248_vm11 = vcmp.lt.s32.totalorder %v1619_v10, 116 }
  0x19   :  { %84 = vrot.lane.b32.xlu1 %v31_v1, %s1484_s19  ;;  %82 = vrot.lane.b32.xlu0 %v1519_v0, %s1484_s19  ;;  %s1573_s5 = sld [smem:[#allocation4 + $0x22]]  ;;  %vm266_vm12 = vcmp.lt.s32.totalorder %v1619_v10, 115  ;;  %vm284_vm13 = vcmp.lt.s32.totalorder %v1619_v10, 114  ;;  %vm302_vm14 = vcmp.lt.s32.totalorder %v1619_v10, 113 }
  0x1a   :  { %s1575_s6 = sld [smem:[#allocation4]] }
  0x1b   :  { %s1577_s7 = sld [smem:[#allocation4 + $0x10]] }
  0x1c   :  { %s1579_s8 = sld [smem:[#allocation4 + $0x20]] }
  0x1d   :  { %102 = vrot.lane.b32.xlu1 %v31_v1, %s1485_s20  ;;  %100 = vrot.lane.b32.xlu0 %v1519_v0, %s1485_s20  ;;  %s1581_s9 = sld [smem:[#allocation4 + $0x1]]  ;;  %v71_v30 = vstv %s1569_s3 }
  0x1e   :  { %s1583_s10 = sld [smem:[#allocation4 + $0x11]]  ;;  %v75_v31 = vstv %s1571_s4 }
  0x1f   :  { %s1585_s11 = sld [smem:[#allocation4 + $0x21]]  ;;  %v79_v32 = vstv %s1573_s5 }
  0x20   :  { %s1589_s12 = sld [smem:[#allocation4 + $0xc9]]  ;;  %v33_v13 = vstv %s1575_s6 }
  0x21   :  { %120 = vrot.lane.b32.xlu1 %v31_v1, %s2870_s21  ;;  %118 = vrot.lane.b32.xlu0 %v1519_v0, %s2870_s21  ;;  %s1591_s13 = sld [smem:[#allocation4 + $0xca]]  ;;  %v37_v14 = vstv %s1577_s7  ;;  %v34_v18 = vmul.f32 %v33_v13, %v1519_v0 }
  0x22   :  { %s1593_s14 = sld [smem:[#allocation4 + $0xcb]]  ;;  %v41_v15 = vstv %s1579_s8  ;;  %v38_v21 = vmul.f32 %v37_v14, %v1519_v0 }
  0x23   :  { %s1595_s15 = sld [smem:[#allocation4 + $0x3]]  ;;  %v53_v19 = vstv %s1581_s9  ;;  %v42_v22 = vmul.f32 %v41_v15, %v1519_v0 }
  0x24   :  { %s1599_s17 = sld [smem:[#allocation4 + $0x13]]  ;;  %v57_v23 = vstv %s1583_s10 }
  0x25   :  { %138 = vrot.lane.b32.xlu1 %v31_v1, %s2868_s1  ;;  %136 = vrot.lane.b32.xlu0 %v1519_v0, %s2868_s1  ;;  %s1601_s18 = sld [smem:[#allocation4 + $0x23]]  ;;  %v61_v27 = vstv %s1585_s11 }
  0x26   :  { %s1634_s1 = sld [smem:[#allocation4 + $0x7]]  ;;  %v25_v20 = vstv %s1589_s12 }
  0x27   :  { %s1641_s21 = sld [smem:[#allocation4 + $0x17]]  ;;  %v27_v24 = vstv %s1591_s13  ;;  %v35_v33 = vadd.f32 %v34_v18, %v25_v20 }
  0x28   :  { %s1645_s6 = sld [smem:[#allocation4 + $0x27]]  ;;  %v29_v25 = vstv %s1593_s14  ;;  %v39_v34 = vadd.f32 %v38_v21, %v27_v24 }
  0x29   :  { %156 = vrot.lane.b32.xlu1 %v31_v1, %s2866_s22  ;;  %154 = vrot.lane.b32.xlu0 %v1519_v0, %s2866_s22  ;;  %s1630_s22 = sld [smem:[#allocation4 + $0x26]]  ;;  %v43_v35 = vadd.f32 %v42_v22, %v29_v25  ;;  %v89_v39 = vstv %s1595_s15 }
  0x2a   :  { %s1651_s7 = sld [smem:[#allocation4 + $0x8]]  ;;  %v93_v40 = vstv %s1599_s17 }
  0x2b   :  { %s1658_s8 = sld [smem:[#allocation4 + $0x18]]  ;;  %v97_v41 = vstv %s1601_s18  ;;  %s2893_s18 = smov 123  }
  0x2c   :  { %s1668_s9 = sld [smem:[#allocation4 + $0x28]]  ;;  %v161_v58 = vstv %s1634_s1 }
  0x2d   :  { %174 = vrot.lane.b32.xlu1 %v31_v1, %s2864_s23  ;;  %172 = vrot.lane.b32.xlu0 %v1519_v0, %s2864_s23  ;;  %s1627_s23 = sld [smem:[#allocation4 + $0x16]]  ;;  %v165_v59 = vstv %s1641_s21 }
  0x2e   :  { %s1673_s10 = sld [smem:[#allocation4 + $0x9]]  ;;  %v169_v62 = vstv %s1645_s6  ;;  %s2894_s6 = smov 122  }
  0x2f   :  { %s1676_s11 = sld [smem:[#allocation4 + $0x19]]  ;;  %v151_v55 = vstv %s1630_s22 }
  0x30   :  { %s1681_s3 = sld [smem:[#allocation4 + $0x29]] }
  0x31   :  { %192 = vrot.lane.b32.xlu1 %v31_v1, %s2862_s24  ;;  %190 = vrot.lane.b32.xlu0 %v1519_v0, %s2862_s24  ;;  %s1625_s24 = sld [smem:[#allocation4 + $0x6]] }
  0x32   :  { %s1688_s4 = sld [smem:[#allocation4 + $0xa]] }
  0x33   :  { %v147_v54 = vstv %s1627_s23  ;;  %s1713_s22 = sld [smem:[#allocation4 + $0xb]] }
  0x34   :  { %s1722_s23 = sld [smem:[#allocation4 + $0x1b]] }
  0x35   :  { %210 = vrot.lane.b32.xlu1 %v31_v1, %s2860_s25  ;;  %208 = vrot.lane.b32.xlu0 %v1519_v0, %s2860_s25  ;;  %s1617_s25 = sld [smem:[#allocation4 + $0x25]]  ;;  %v201_v20 = vstv %s1676_s11  ;;  %s2899_s11 = smov 117  }
  0x36   :  { %v205_v21 = vstv %s1681_s3  ;;  %s1755_s5 = sld [smem:[#allocation4 + $0x1d]]  ;;  %s2900_s3 = smov 116  }
  0x37   :  { %v143_v51 = vstv %s1625_s24  ;;  %s1708_s24 = sld [smem:[#allocation4 + $0x2a]] }
  0x38   :  { %v215_v25 = vstv %s1688_s4  ;;  %s1767_s12 = sld [smem:[#allocation4 + $0x2d]]  ;;  %s2901_s4 = smov 115  }
  0x39   :  { %228 = vrot.lane.b32.xlu1 %v31_v1, %s2858_s26  ;;  %226 = vrot.lane.b32.xlu0 %v1519_v0, %s2858_s26  ;;  %s1615_s26 = sld [smem:[#allocation4 + $0x15]] }
  0x3a   :  { %s1773_s1 = sld [smem:[#allocation4 + $0xe]] }
  0x3b   :  { %v133_v50 = vstv %s1617_s25  ;;  %s1729_s25 = sld [smem:[#allocation4 + $0x2b]] }
  0x3c   :  { %s1779_s21 = sld [smem:[#allocation4 + $0x1e]] }
  0x3d   :  { %246 = vrot.lane.b32.xlu1 %v31_v1, %s2856_s27  ;;  %244 = vrot.lane.b32.xlu0 %v1519_v0, %s2856_s27  ;;  %s1613_s27 = sld [smem:[#allocation4 + $0x5]] }
  0x3e   :  { %s1785_s13 = sld [smem:[#allocation4 + $0x2e]] }
  0x3f   :  { %v129_v49 = vstv %s1615_s26  ;;  %s1733_s26 = sld [smem:[#allocation4 + $0xc]] }
  0x40   :  { %s1796_s14 = sld [smem:[#allocation4 + $0xf]] }
  0x41   :  { %264 = vrot.lane.b32.xlu1 %v31_v1, %s2854_s28  ;;  %262 = vrot.lane.b32.xlu0 %v1519_v0, %s2854_s28  ;;  %s1611_s28 = sld [smem:[#allocation4 + $0x24]] }
  0x42   :  { %s1800_s15 = sld [smem:[#allocation4 + $0x1f]] }
  0x43   :  { %v125_v45 = vstv %s1613_s27  ;;  %s1742_s27 = sld [smem:[#allocation4 + $0x1c]] }
  0x44   :  { %s1803_s17 = sld [smem:[#allocation4 + $0x2f]] }
  0x45   :  { %282 = vrot.lane.b32.xlu1 %v31_v1, %s2852_s29  ;;  %280 = vrot.lane.b32.xlu0 %v1519_v0, %s2852_s29  ;;  %s1605_s29 = sld [smem:[#allocation4 + $0x14]] }
  0x46   :  { %s2231_s2 = sld [smem:[#allocation4 + $0x45]] }
  0x47   :  { %v115_v44 = vstv %s1611_s28  ;;  %s1697_s28 = sld [smem:[#allocation4 + $0x1a]] }
  0x49   :  { %300 = vrot.lane.b32.xlu1 %v31_v1, %s2850_s30  ;;  %298 = vrot.lane.b32.xlu0 %v1519_v0, %s2850_s30  ;;  %s1603_s30 = sld [smem:[#allocation4 + $0x4]]  ;;  %v179_v0 = vstv %s1651_s7  ;;  %s2895_s7 = smov 121  }
  0x4b   :  { %v111_v43 = vstv %s1605_s29  ;;  %s1748_s29 = sld [smem:[#allocation4 + $0x2c]] }
  0x4c   :  { %2910 = sst [smem:[#allocation13_spill]] %s2231_s2 }
  0x4d   :  { %s2250_s2 = sld [smem:[#allocation4 + $0x47]] }
  0x4f   :  { %v107_v42 = vstv %s1603_s30  ;;  %s1751_s30 = sld [smem:[#allocation4 + $0xd]] }
  0x83   :  { %v1587_v3 = vpop.permute.xlu1 %64  ;;  %v45_v4 = vpop.permute.xlu0 %44 }
  0x87   :  { %v1597_v5 = vpop.permute.xlu1 %66  ;;  %v47_v6 = vpop.permute.xlu0 %46 }
  0x88   :  { %v51_v26 = vsel %vm50_vm0, %v45_v4, %v47_v6  ;;  %v69_v48 = vsel %vm68_vm1, %v1587_v3, %v1597_v5  ;;  %v183_v4 = vstv %s1658_s8  ;;  %v187_v5 = vstv %s1668_s9  ;;  %s2896_s8 = smov 120   ;;  %s2897_s9 = smov 119  }
  0x89   :  { %v54_v36 = vmul.f32 %v53_v19, %v51_v26  ;;  %v58_v37 = vmul.f32 %v57_v23, %v51_v26  ;;  %v62_v38 = vmul.f32 %v61_v27, %v51_v26  ;;  %v72_v60 = vmul.f32 %v71_v30, %v69_v48 }
  0x8a   :  { %v76_v61 = vmul.f32 %v75_v31, %v69_v48  ;;  %v80_v2 = vmul.f32 %v79_v32, %v69_v48 }
  0x8b   :  { %v1607_v8 = vpop.permute.xlu1 %84  ;;  %v1609_v9 = vpop.permute.xlu0 %82  ;;  %v55_v52 = vadd.f32 %v54_v36, %v35_v33  ;;  %v59_v53 = vadd.f32 %v58_v37, %v39_v34  ;;  %v63_v56 = vadd.f32 %v62_v38, %v43_v35  ;;  %v223_v34 = vstv %s1708_s24  ;;  %s2903_s24 = smov 113  }
  0x8c   :  { %v87_v57 = vsel %vm86_vm2, %v1609_v9, %v1607_v8  ;;  %v233_v38 = vstv %s1713_s22  ;;  %s1906_s22 = sld [smem:[#allocation4 + $0x30]] }
  0x8d   :  { %v73_v6 = vadd.f32 %v72_v60, %v55_v52  ;;  %v77_v7 = vadd.f32 %v76_v61, %v59_v53  ;;  %v90_v8 = vmul.f32 %v89_v39, %v87_v57  ;;  %v94_v9 = vmul.f32 %v93_v40, %v87_v57 }
  0x8e   :  { %v81_v13 = vadd.f32 %v80_v2, %v63_v56  ;;  %v98_v14 = vmul.f32 %v97_v41, %v87_v57  ;;  %v251_v56 = vstv %s1733_s26  ;;  %s1915_s26 = sld [smem:[#allocation4 + $0xcd]] }
  0x8f   :  { %v1621_v11 = vpop.permute.xlu1 %102  ;;  %v1623_v12 = vpop.permute.xlu0 %100  ;;  %v95_v26 = vadd.f32 %v94_v9, %v77_v7 }
  0x90   :  { %v105_v3 = vsel %vm104_vm3, %v1623_v12, %v1621_v11  ;;  %v197_v12 = vstv %s1673_s10  ;;  %v99_v31 = vadd.f32 %v98_v14, %v81_v13  ;;  %s2898_s10 = smov 118  }
  0x91   :  { %v108_v15 = vmul.f32 %v107_v42, %v105_v3  ;;  %v112_v18 = vmul.f32 %v111_v43, %v105_v3  ;;  %v116_v23 = vmul.f32 %v115_v44, %v105_v3 }
  0x93   :  { %v1637_v16 = vpop.permute.xlu1 %120  ;;  %v1639_v17 = vpop.permute.xlu0 %118  ;;  %v117_v39 = vadd.f32 %v116_v23, %v99_v31  ;;  %v287_v31 = vstv %s1773_s1  ;;  %s1930_s1 = sld [smem:[#allocation4 + $0x32]] }
  0x94   :  { %v123_v11 = vsel %vm122_vm4, %v1639_v17, %v1637_v16  ;;  %v219_v16 = vstv %s1697_s28  ;;  %v91_v17 = vadd.f32 %v90_v8, %v73_v6  ;;  %s2902_s28 = smov 114  }
  0x95   :  { %v126_v27 = vmul.f32 %v125_v45, %v123_v11  ;;  %v130_v30 = vmul.f32 %v129_v49, %v123_v11  ;;  %v134_v32 = vmul.f32 %v133_v50, %v123_v11 }
  0x97   :  { %v1664_v28 = vpop.permute.xlu1 %138  ;;  %v1666_v29 = vpop.permute.xlu0 %136 }
  0x98   :  { %v141_v24 = vsel %vm140_vm5, %v1666_v29, %v1664_v28  ;;  %v109_v28 = vadd.f32 %v108_v15, %v91_v17  ;;  %v113_v29 = vadd.f32 %v112_v18, %v95_v26  ;;  %v273_v15 = vstv %s1755_s5  ;;  %s1926_s5 = sld [smem:[#allocation4 + $0x61]] }
  0x99   :  { %v144_v35 = vmul.f32 %v143_v51, %v141_v24  ;;  %v148_v40 = vmul.f32 %v147_v54, %v141_v24  ;;  %v152_v41 = vmul.f32 %v151_v55, %v141_v24  ;;  %v241_v54 = vstv %s1729_s25  ;;  %s1913_s25 = sld [smem:[#allocation4 + $0xcc]] }
  0x9a   :  { %v127_v43 = vadd.f32 %v126_v27, %v109_v28  ;;  %v131_v44 = vadd.f32 %v130_v30, %v113_v29 }
  0x9b   :  { %v157_v46 = vpop.permute.xlu1 %156  ;;  %v155_v47 = vpop.permute.xlu0 %154 }
  0x9c   :  { %v159_v33 = vsel %vm158_vm6, %v155_v47, %v157_v46  ;;  %v237_v46 = vstv %s1722_s23  ;;  %v135_v47 = vadd.f32 %v134_v32, %v117_v39  ;;  %v145_v51 = vadd.f32 %v144_v35, %v127_v43  ;;  %s1908_s23 = sld [smem:[#allocation4 + $0x60]] }
  0x9d   :  { %v162_v45 = vmul.f32 %v161_v58, %v159_v33  ;;  %v166_v48 = vmul.f32 %v165_v59, %v159_v33  ;;  %v170_v49 = vmul.f32 %v169_v62, %v159_v33  ;;  %v149_v57 = vadd.f32 %v148_v40, %v131_v44 }
  0x9e   :  { %v153_v58 = vadd.f32 %v152_v41, %v135_v47 }
  0x9f   :  { %v175_v63 = vpop.permute.xlu1 %174  ;;  %v173_v1 = vpop.permute.xlu0 %172  ;;  %v163_v61 = vadd.f32 %v162_v45, %v145_v51 }
  0xa0   :  { %v177_v42 = vsel %vm176_vm7, %v173_v1, %v175_v63  ;;  %v167_v1 = vadd.f32 %v166_v48, %v149_v57  ;;  %v171_v2 = vadd.f32 %v170_v49, %v153_v58  ;;  %v305_v49 = vstv %s1796_s14  ;;  %s1940_s14 = sld [smem:[#allocation4 + $0x33]] }
  0xa1   :  { %v180_v52 = vmul.f32 %v179_v0, %v177_v42  ;;  %v184_v59 = vmul.f32 %v183_v4, %v177_v42  ;;  %v188_v62 = vmul.f32 %v187_v5, %v177_v42  ;;  %v255_v0 = vstv %s1742_s27  ;;  %s1917_s27 = sld [smem:[#allocation4 + $0xce]] }
  0xa2   :  { %v259_v4 = vstv %s1748_s29  ;;  %v313_v57 = vstv %s1803_s17  ;;  %s1919_s29 = sld [smem:[#allocation4 + $0x90]] }
  0xa3   :  { %v193_v19 = vpop.permute.xlu1 %192  ;;  %v191_v22 = vpop.permute.xlu0 %190  ;;  %v181_v6 = vadd.f32 %v180_v52, %v163_v61  ;;  %v185_v14 = vadd.f32 %v184_v59, %v167_v1  ;;  %v189_v18 = vadd.f32 %v188_v62, %v171_v2  ;;  %s1951_s17 = sld [smem:[#allocation4 + $0x93]] }
  0xa4   :  { %v195_v50 = vsel %vm194_vm8, %v191_v22, %v193_v19 }
  0xa5   :  { %v198_v63 = vmul.f32 %v197_v12, %v195_v50  ;;  %v202_v3 = vmul.f32 %v201_v20, %v195_v50  ;;  %v206_v7 = vmul.f32 %v205_v21, %v195_v50  ;;  %v269_v12 = vstv %s1751_s30  ;;  %s1924_s30 = sld [smem:[#allocation4 + $0x31]] }
  0xa7   :  { %v211_v36 = vpop.permute.xlu1 %210  ;;  %v209_v37 = vpop.permute.xlu0 %208  ;;  %v199_v19 = vadd.f32 %v198_v63, %v181_v6  ;;  %v203_v22 = vadd.f32 %v202_v3, %v185_v14 }
  0xa8   :  { %v213_v60 = vsel %vm212_vm9, %v209_v37, %v211_v36  ;;  %v291_v36 = vstv %s1779_s21  ;;  %v295_v37 = vstv %s1785_s13  ;;  %s1935_s21 = sld [smem:[#allocation4 + $0x62]] }
  0xa9   :  { %v216_v8 = vmul.f32 %v215_v25, %v213_v60  ;;  %v220_v11 = vmul.f32 %v219_v16, %v213_v60  ;;  %v224_v20 = vmul.f32 %v223_v34, %v213_v60  ;;  %v277_v25 = vstv %s1767_s12  ;;  %s1928_s12 = sld [smem:[#allocation4 + $0x91]] }
  0xaa   :  { %v207_v16 = vadd.f32 %v206_v7, %v189_v18  ;;  %s1937_s13 = sld [smem:[#allocation4 + $0x92]]  ;;  %v340_v18 = vstv %s1908_s23 }
  0xab   :  { %v229_v53 = vpop.permute.xlu1 %228  ;;  %v227_v55 = vpop.permute.xlu0 %226  ;;  %v217_v17 = vadd.f32 %v216_v8, %v199_v19  ;;  %v221_v32 = vadd.f32 %v220_v11, %v203_v22  ;;  %v344_v19 = vstv %s1919_s29  ;;  %s1969_s23 = sld [smem:[#allocation4 + $0x64]] }
  0xac   :  { %v231_v5 = vsel %vm230_vm10, %v227_v55, %v229_v53  ;;  %v225_v29 = vadd.f32 %v224_v20, %v207_v16  ;;  %v328_v20 = vstv %s1913_s25  ;;  %s1972_s25 = sld [smem:[#allocation4 + $0x94]] }
  0xad   :  { %v234_v23 = vmul.f32 %v233_v38, %v231_v5  ;;  %v238_v24 = vmul.f32 %v237_v46, %v231_v5  ;;  %v242_v26 = vmul.f32 %v241_v54, %v231_v5  ;;  %s1989_s29 = sld [smem:[#allocation4 + $0x95]] }
  0xaf   :  { %v247_v9 = vpop.permute.xlu1 %246  ;;  %v245_v13 = vpop.permute.xlu0 %244  ;;  %v235_v38 = vadd.f32 %v234_v23, %v217_v17  ;;  %v239_v39 = vadd.f32 %v238_v24, %v221_v32  ;;  %v243_v42 = vadd.f32 %v242_v26, %v225_v29  ;;  %v353_v23 = vstv %s1924_s30  ;;  %s1993_s30 = sld [smem:[#allocation4 + $0x36]] }
  0xb0   :  { %v249_v21 = vsel %vm248_vm11, %v245_v13, %v247_v9  ;;  %v357_v24 = vstv %s1926_s5  ;;  %v332_v26 = vstv %s1917_s27  ;;  %v370_v32 = vstv %s1930_s1  ;;  %s1986_s27 = sld [smem:[#allocation4 + $0x65]] }
  0xb1   :  { %v252_v33 = vmul.f32 %v251_v56, %v249_v21  ;;  %v256_v34 = vmul.f32 %v255_v0, %v249_v21  ;;  %v260_v35 = vmul.f32 %v259_v4, %v249_v21  ;;  %v309_v56 = vstv %s1800_s15  ;;  %s1947_s15 = sld [smem:[#allocation4 + $0x63]] }
  0xb2   :  { %v330_v21 = vstv %s1915_s26  ;;  %s1979_s26 = sld [smem:[#allocation4 + $0x35]] }
  0xb3   :  { %v265_v27 = vpop.permute.xlu1 %264  ;;  %v263_v30 = vpop.permute.xlu0 %262  ;;  %v253_v46 = vadd.f32 %v252_v33, %v235_v38  ;;  %v257_v47 = vadd.f32 %v256_v34, %v239_v39  ;;  %v261_v50 = vadd.f32 %v260_v35, %v243_v42  ;;  %v374_v33 = vstv %s1935_s21  ;;  %s1999_s5 = sld [smem:[#allocation4 + $0x66]] }
  0xb4   :  { %v267_v28 = vsel %vm266_vm12, %v263_v30, %v265_v27  ;;  %v378_v35 = vstv %s1937_s13  ;;  %s2008_s1 = sld [smem:[#allocation4 + $0x37]] }
  0xb5   :  { %v270_v40 = vmul.f32 %v269_v12, %v267_v28  ;;  %v274_v41 = vmul.f32 %v273_v15, %v267_v28  ;;  %v278_v43 = vmul.f32 %v277_v25, %v267_v28  ;;  %v336_v15 = vstv %s1906_s22  ;;  %s1962_s22 = sld [smem:[#allocation4 + $0x34]] }
  0xb6   :  { %v361_v25 = vstv %s1928_s12  ;;  %s2004_s12 = sld [smem:[#allocation4 + $0x96]] }
  0xb7   :  { %v283_v44 = vpop.permute.xlu1 %282  ;;  %v281_v45 = vpop.permute.xlu0 %280  ;;  %v271_v54 = vadd.f32 %v270_v40, %v253_v46  ;;  %v275_v55 = vadd.f32 %v274_v41, %v257_v47  ;;  %v279_v58 = vadd.f32 %v278_v43, %v261_v50  ;;  %v387_v43 = vstv %s1940_s14  ;;  %s2014_s21 = sld [smem:[#allocation4 + $0x67]] }
  0xb8   :  { %v285_v48 = vsel %vm284_vm13, %v281_v45, %v283_v44  ;;  %v391_v47 = vstv %s1947_s15  ;;  %s2019_s13 = sld [smem:[#allocation4 + $0x97]] }
  0xb9   :  { %v288_v51 = vmul.f32 %v287_v31, %v285_v48  ;;  %v292_v52 = vmul.f32 %v291_v36, %v285_v48  ;;  %v296_v53 = vmul.f32 %v295_v37, %v285_v48  ;;  %s2029_s14 = sld [smem:[#allocation4 + $0x68]] }
  0xba   :  { %s2034_s15 = sld [smem:[#allocation4 + $0x98]] }
  0xbb   :  { %v301_v59 = vpop.permute.xlu1 %300  ;;  %v299_v60 = vpop.permute.xlu0 %298  ;;  %v289_v61 = vadd.f32 %v288_v51, %v271_v54  ;;  %v293_v62 = vadd.f32 %v292_v52, %v275_v55  ;;  %v297_v0 = vadd.f32 %v296_v53, %v279_v58  ;;  %v395_v51 = vstv %s1951_s17  ;;  %s2044_s17 = sld [smem:[#allocation4 + $0x69]] }
  0xbc   :  { %v303_v63 = vsel %vm302_vm14, %v299_v60, %v301_v59 }
  0xbd   :  { %v306_v1 = vmul.f32 %v305_v49, %v303_v63  ;;  %v310_v2 = vmul.f32 %v309_v56, %v303_v63  ;;  %v314_v3 = vmul.f32 %v313_v57, %v303_v63  ;;  %v412_v63 = vstv %s1972_s25  ;;  %s2064_s25 = sld [smem:[#allocation4 + $0x9a]] }
  0xbf   :  { %v307_v4 = vadd.f32 %v306_v1, %v289_v61  ;;  %v311_v6 = vadd.f32 %v310_v2, %v293_v62  ;;  %v315_v7 = vadd.f32 %v314_v3, %v297_v0  ;;  %v404_v61 = vstv %s1962_s22  ;;  %s2049_s22 = sld [smem:[#allocation4 + $0x99]] }
  0xc0   :  { %v408_v62 = vstv %s1969_s23  ;;  %s2059_s23 = sld [smem:[#allocation4 + $0x6a]] }
  0xc1   :  { %1455 = vtanh.f32 %v307_v4 }
  0xc2   :  { %1457 = vtanh.f32 %v311_v6 }
  0xc3   :  { %1459 = vtanh.f32 %v315_v7 }
  0xce   :  { %v1818_v8 = vpop.eup %1455 }
  0xcf   :  { %v1820_v5 = vpop.eup %1457  ;;  %317 = vst [vmem:[#allocation2] sm:$0xff] %v1818_v8  ;;  %347 = vrot.lane.b32.xlu0 %v1818_v8, %s2874_s0  ;;  %v337_v16 = vmul.f32 %v1818_v8, %v336_v15  ;;  %v341_v27 = vmul.f32 %v1818_v8, %v340_v18  ;;  %v345_v30 = vmul.f32 %v1818_v8, %v344_v19 }
  0xd0   :  { %v1825_v9 = vpop.eup %1459  ;;  %321 = vst [vmem:[#allocation2 + $0x10] sm:$0xff] %v1820_v5 }
  0xd1   :  { %325 = vst [vmem:[#allocation2 + $0x20] sm:$0xff] %v1825_v9  ;;  %v338_v36 = vadd.f32 %v337_v16, %v328_v20  ;;  %v342_v40 = vadd.f32 %v341_v27, %v330_v21  ;;  %v346_v41 = vadd.f32 %v345_v30, %v332_v26  ;;  %v438_v16 = vstv %s1993_s30  ;;  %s2161_s30 = sld [smem:[#allocation4 + $0x9c]] }
  0xd2   :  { %v446_v26 = vstv %s2004_s12  ;;  %s2169_s12 = sld [smem:[#allocation4 + $0x6d]] }
  0xd3   :  { %364 = vrot.lane.b32.xlu0 %v1818_v8, %s2872_s16 }
  0xd6   :  { %v334_v13 = vld [vmem:[#allocation2 + $0x1] sm:$0xff] }
  0xd7   :  { %349 = vrot.lane.b32.xlu1 %v334_v13, %s2874_s0  ;;  %381 = vrot.lane.b32.xlu0 %v1818_v8, %s1484_s19  ;;  %v603_v14 = vld [vmem:[#allocation2 + $0x11] sm:$0xff] }
  0xd8   :  { %v1974_v39 = vld [vmem:[#allocation2 + $0x21] sm:$0xff] }
  0xdb   :  { %366 = vrot.lane.b32.xlu1 %v334_v13, %s2872_s16  ;;  %398 = vrot.lane.b32.xlu0 %v1818_v8, %s1485_s20 }
  0xdf   :  { %383 = vrot.lane.b32.xlu1 %v334_v13, %s1484_s19  ;;  %415 = vrot.lane.b32.xlu0 %v1818_v8, %s2893_s18 }
  0xe3   :  { %400 = vrot.lane.b32.xlu1 %v334_v13, %s1485_s20  ;;  %432 = vrot.lane.b32.xlu0 %v1818_v8, %s2894_s6 }
  0xe7   :  { %417 = vrot.lane.b32.xlu1 %v334_v13, %s2893_s18  ;;  %449 = vrot.lane.b32.xlu0 %v1818_v8, %s2895_s7 }
  0xeb   :  { %434 = vrot.lane.b32.xlu1 %v334_v13, %s2894_s6  ;;  %466 = vrot.lane.b32.xlu0 %v1818_v8, %s2896_s8 }
  0xef   :  { %451 = vrot.lane.b32.xlu1 %v334_v13, %s2895_s7  ;;  %483 = vrot.lane.b32.xlu0 %v1818_v8, %s2897_s9 }
  0xf3   :  { %468 = vrot.lane.b32.xlu1 %v334_v13, %s2896_s8  ;;  %500 = vrot.lane.b32.xlu0 %v1818_v8, %s2898_s10 }
  0xf7   :  { %485 = vrot.lane.b32.xlu1 %v334_v13, %s2897_s9  ;;  %517 = vrot.lane.b32.xlu0 %v1818_v8, %s2899_s11 }
  0xfb   :  { %502 = vrot.lane.b32.xlu1 %v334_v13, %s2898_s10  ;;  %534 = vrot.lane.b32.xlu0 %v1818_v8, %s2900_s3 }
  0xff   :  { %519 = vrot.lane.b32.xlu1 %v334_v13, %s2899_s11  ;;  %551 = vrot.lane.b32.xlu0 %v1818_v8, %s2901_s4 }
 0x103   :  { %536 = vrot.lane.b32.xlu1 %v334_v13, %s2900_s3  ;;  %568 = vrot.lane.b32.xlu0 %v1818_v8, %s2902_s28 }
 0x107   :  { %553 = vrot.lane.b32.xlu1 %v334_v13, %s2901_s4  ;;  %585 = vrot.lane.b32.xlu0 %v1818_v8, %s2903_s24 }
 0x10b   :  { %570 = vrot.lane.b32.xlu1 %v334_v13, %s2902_s28  ;;  %616 = vrot.lane.b32.xlu0 %v1820_v5, %s2874_s0 }
 0x10f   :  { %587 = vrot.lane.b32.xlu1 %v334_v13, %s2903_s24  ;;  %633 = vrot.lane.b32.xlu0 %v1820_v5, %s2872_s16 }
 0x113   :  { %618 = vrot.lane.b32.xlu1 %v603_v14, %s2874_s0  ;;  %650 = vrot.lane.b32.xlu0 %v1820_v5, %s1484_s19 }
 0x117   :  { %635 = vrot.lane.b32.xlu1 %v603_v14, %s2872_s16  ;;  %667 = vrot.lane.b32.xlu0 %v1820_v5, %s1485_s20 }
 0x11b   :  { %652 = vrot.lane.b32.xlu1 %v603_v14, %s1484_s19  ;;  %684 = vrot.lane.b32.xlu0 %v1820_v5, %s2893_s18 }
 0x11f   :  { %669 = vrot.lane.b32.xlu1 %v603_v14, %s1485_s20  ;;  %701 = vrot.lane.b32.xlu0 %v1820_v5, %s2894_s6 }
 0x123   :  { %686 = vrot.lane.b32.xlu1 %v603_v14, %s2893_s18  ;;  %718 = vrot.lane.b32.xlu0 %v1820_v5, %s2895_s7 }
 0x127   :  { %703 = vrot.lane.b32.xlu1 %v603_v14, %s2894_s6  ;;  %735 = vrot.lane.b32.xlu0 %v1820_v5, %s2896_s8 }
 0x12b   :  { %720 = vrot.lane.b32.xlu1 %v603_v14, %s2895_s7  ;;  %752 = vrot.lane.b32.xlu0 %v1820_v5, %s2897_s9 }
 0x12f   :  { %737 = vrot.lane.b32.xlu1 %v603_v14, %s2896_s8  ;;  %769 = vrot.lane.b32.xlu0 %v1820_v5, %s2898_s10 }
 0x133   :  { %754 = vrot.lane.b32.xlu1 %v603_v14, %s2897_s9  ;;  %786 = vrot.lane.b32.xlu0 %v1820_v5, %s2899_s11 }
 0x137   :  { %771 = vrot.lane.b32.xlu1 %v603_v14, %s2898_s10  ;;  %803 = vrot.lane.b32.xlu0 %v1820_v5, %s2900_s3 }
 0x13b   :  { %788 = vrot.lane.b32.xlu1 %v603_v14, %s2899_s11  ;;  %820 = vrot.lane.b32.xlu0 %v1820_v5, %s2901_s4 }
 0x13f   :  { %805 = vrot.lane.b32.xlu1 %v603_v14, %s2900_s3  ;;  %837 = vrot.lane.b32.xlu0 %v1820_v5, %s2902_s28 }
 0x141   :  { %v348_v11 = vpop.permute.xlu0 %347 }
 0x143   :  { %822 = vrot.lane.b32.xlu1 %v603_v14, %s2901_s4  ;;  %854 = vrot.lane.b32.xlu0 %v1820_v5, %s2903_s24 }
 0x145   :  { %v365_v12 = vpop.permute.xlu0 %364 }
 0x147   :  { %839 = vrot.lane.b32.xlu1 %v603_v14, %s2902_s28  ;;  %885 = vrot.lane.b32.xlu0 %v1825_v9, %s2874_s0 }
 0x149   :  { %v350_v22 = vpop.permute.xlu1 %349  ;;  %v382_v17 = vpop.permute.xlu0 %381 }
 0x14a   :  { %v351_v31 = vsel %vm50_vm0, %v348_v11, %v350_v22  ;;  %v425_v11 = vstv %s1986_s27  ;;  %s2079_s27 = sld [smem:[#allocation4 + $0x9b]] }
 0x14b   :  { %856 = vrot.lane.b32.xlu1 %v603_v14, %s2903_s24  ;;  %902 = vrot.lane.b32.xlu0 %v1825_v9, %s2872_s16  ;;  %v354_v34 = vmul.f32 %v353_v23, %v351_v31  ;;  %v358_v28 = vmul.f32 %v357_v24, %v351_v31  ;;  %v362_v29 = vmul.f32 %v361_v25, %v351_v31  ;;  %v421_v14 = vstv %s1979_s26  ;;  %s2074_s26 = sld [smem:[#allocation4 + $0x6b]] }
 0x14d   :  { %v367_v37 = vpop.permute.xlu1 %366  ;;  %v399_v38 = vpop.permute.xlu0 %398  ;;  %v355_v48 = vadd.f32 %v354_v34, %v338_v36  ;;  %v359_v49 = vadd.f32 %v358_v28, %v342_v40  ;;  %v363_v50 = vadd.f32 %v362_v29, %v346_v41  ;;  %v455_v36 = vstv %s2008_s1  ;;  %s2173_s1 = sld [smem:[#allocation4 + $0x9d]] }
 0x14e   :  { %v368_v42 = vsel %vm68_vm1, %v365_v12, %v367_v37  ;;  %v429_v12 = vstv %s1989_s29  ;;  %v459_v37 = vstv %s2014_s21  ;;  %s2155_s29 = sld [smem:[#allocation4 + $0x3c]] }
 0x14f   :  { %v371_v44 = vmul.f32 %v370_v32, %v368_v42  ;;  %v375_v45 = vmul.f32 %v374_v33, %v368_v42  ;;  %v379_v46 = vmul.f32 %v378_v35, %v368_v42  ;;  %887 = vrot.lane.b32.xlu1 %v1974_v39, %s2874_s0  ;;  %919 = vrot.lane.b32.xlu0 %v1825_v9, %s1484_s19  ;;  %s2175_s21 = sld [smem:[#allocation4 + $0x3e]] }
 0x150   :  { %s2229_s0 = sld [smem:[#allocation4 + $0xa4]] }
 0x151   :  { %v384_v52 = vpop.permute.xlu1 %383  ;;  %v416_v53 = vpop.permute.xlu0 %415  ;;  %v372_v54 = vadd.f32 %v371_v44, %v355_v48  ;;  %v376_v55 = vadd.f32 %v375_v45, %v359_v49  ;;  %v380_v56 = vadd.f32 %v379_v46, %v363_v50  ;;  %v476_v50 = vstv %s2029_s14  ;;  %s2187_s14 = sld [smem:[#allocation4 + $0x6f]] }
 0x152   :  { %v385_v57 = vsel %vm86_vm2, %v382_v17, %v384_v52  ;;  %v442_v17 = vstv %s1999_s5  ;;  %s2167_s5 = sld [smem:[#allocation4 + $0x3d]] }
 0x153   :  { %v388_v58 = vmul.f32 %v387_v43, %v385_v57  ;;  %v392_v59 = vmul.f32 %v391_v47, %v385_v57  ;;  %v396_v60 = vmul.f32 %v395_v51, %v385_v57  ;;  %904 = vrot.lane.b32.xlu1 %v1974_v39, %s2872_s16  ;;  %936 = vrot.lane.b32.xlu0 %v1825_v9, %s1485_s20  ;;  %v480_v51 = vstv %s2034_s15  ;;  %s2195_s15 = sld [smem:[#allocation4 + $0x41]] }
 0x154   :  { %s2223_s16 = sld [smem:[#allocation4 + $0x74]] }
 0x155   :  { %v389_v0 = vadd.f32 %v388_v58, %v372_v54  ;;  %v393_v1 = vadd.f32 %v392_v59, %v376_v55  ;;  %v397_v2 = vadd.f32 %v396_v60, %v380_v56  ;;  %v401_v3 = vpop.permute.xlu1 %400  ;;  %v433_v4 = vpop.permute.xlu0 %432 }
 0x156   :  { %v402_v6 = vsel %vm104_vm3, %v399_v38, %v401_v3  ;;  %v463_v38 = vstv %s2019_s13  ;;  %s2183_s13 = sld [smem:[#allocation4 + $0x9e]] }
 0x157   :  { %v405_v7 = vmul.f32 %v404_v61, %v402_v6  ;;  %v409_v8 = vmul.f32 %v408_v62, %v402_v6  ;;  %v413_v13 = vmul.f32 %v412_v63, %v402_v6  ;;  %921 = vrot.lane.b32.xlu1 %v1974_v39, %s1484_s19  ;;  %953 = vrot.lane.b32.xlu0 %v1825_v9, %s2893_s18  ;;  %s2023_s19 = sld [smem:[#allocation4 + $0x38]]  ;;  %v493_v62 = vstv %s2044_s17 }
 0x158   :  { %v497_v63 = vstv %s2049_s22  ;;  %s2199_s17 = sld [smem:[#allocation4 + $0xa1]] }
 0x159   :  { %v406_v15 = vadd.f32 %v405_v7, %v389_v0  ;;  %v410_v18 = vadd.f32 %v409_v8, %v393_v1  ;;  %v414_v19 = vadd.f32 %v413_v13, %v397_v2  ;;  %v418_v20 = vpop.permute.xlu1 %417  ;;  %v450_v21 = vpop.permute.xlu0 %449  ;;  %s2205_s22 = sld [smem:[#allocation4 + $0x42]] }
 0x15a   :  { %v419_v22 = vsel %vm122_vm4, %v416_v53, %v418_v20  ;;  %2908 = sst [smem:[#allocation11_spill]] %s2223_s16 }
 0x15b   :  { %v422_v23 = vmul.f32 %v421_v14, %v419_v22  ;;  %v426_v24 = vmul.f32 %v425_v11, %v419_v22  ;;  %v430_v25 = vmul.f32 %v429_v12, %v419_v22  ;;  %938 = vrot.lane.b32.xlu1 %v1974_v39, %s1485_s20  ;;  %970 = vrot.lane.b32.xlu0 %v1825_v9, %s2894_s6  ;;  %s2038_s20 = sld [smem:[#allocation4 + $0x39]]  ;;  %v510_v11 = vstv %s2059_s23 }
 0x15c   :  { %v514_v12 = vstv %s2064_s25  ;;  %s2209_s23 = sld [smem:[#allocation4 + $0xa2]] }
 0x15d   :  { %v423_v27 = vadd.f32 %v422_v23, %v406_v15  ;;  %v427_v30 = vadd.f32 %v426_v24, %v410_v18  ;;  %v431_v31 = vadd.f32 %v430_v25, %v414_v19  ;;  %v435_v32 = vpop.permute.xlu1 %434  ;;  %v467_v33 = vpop.permute.xlu0 %466  ;;  %v472_v49 = vstv %s2023_s19  ;;  %s2185_s19 = sld [smem:[#allocation4 + $0x3f]] }
 0x15e   :  { %v436_v34 = vsel %vm140_vm5, %v433_v4, %v435_v32  ;;  %s2211_s25 = sld [smem:[#allocation4 + $0x43]] }
 0x15f   :  { %v439_v28 = vmul.f32 %v438_v16, %v436_v34  ;;  %v443_v29 = vmul.f32 %v442_v17, %v436_v34  ;;  %v447_v35 = vmul.f32 %v446_v26, %v436_v34  ;;  %955 = vrot.lane.b32.xlu1 %v1974_v39, %s2893_s18  ;;  %987 = vrot.lane.b32.xlu0 %v1825_v9, %s2895_s7  ;;  %s2053_s18 = sld [smem:[#allocation4 + $0x3a]]  ;;  %v527_v17 = vstv %s2074_s26 }
 0x160   :  { %v531_v26 = vstv %s2079_s27  ;;  %s2219_s26 = sld [smem:[#allocation4 + $0xa3]] }
 0x161   :  { %v440_v40 = vadd.f32 %v439_v28, %v423_v27  ;;  %v444_v41 = vadd.f32 %v443_v29, %v427_v30  ;;  %v448_v42 = vadd.f32 %v447_v35, %v431_v31  ;;  %v452_v43 = vpop.permute.xlu1 %451  ;;  %v484_v44 = vpop.permute.xlu0 %483  ;;  %v489_v61 = vstv %s2038_s20  ;;  %s2197_s20 = sld [smem:[#allocation4 + $0x71]] }
 0x162   :  { %v453_v45 = vsel %vm158_vm6, %v450_v21, %v452_v43  ;;  %s2221_s27 = sld [smem:[#allocation4 + $0x44]] }
 0x163   :  { %v456_v46 = vmul.f32 %v455_v36, %v453_v45  ;;  %v460_v47 = vmul.f32 %v459_v37, %v453_v45  ;;  %v464_v48 = vmul.f32 %v463_v38, %v453_v45  ;;  %972 = vrot.lane.b32.xlu1 %v1974_v39, %s2894_s6  ;;  %1004 = vrot.lane.b32.xlu0 %v1825_v9, %s2896_s8  ;;  %s2068_s6 = sld [smem:[#allocation4 + $0x3b]] }
 0x164   :  { %2904 = sst [smem:[#allocation7_spill]] %s2211_s25 }
 0x165   :  { %v457_v52 = vadd.f32 %v456_v46, %v440_v40  ;;  %v461_v53 = vadd.f32 %v460_v47, %v444_v41  ;;  %v465_v54 = vadd.f32 %v464_v48, %v448_v42  ;;  %v469_v55 = vpop.permute.xlu1 %468  ;;  %v501_v56 = vpop.permute.xlu0 %500  ;;  %v506_v14 = vstv %s2053_s18  ;;  %s2207_s18 = sld [smem:[#allocation4 + $0x72]] }
 0x166   :  { %v470_v57 = vsel %vm176_vm7, %v467_v33, %v469_v55  ;;  %2906 = sst [smem:[#allocation9_spill]] %s2219_s26 }
 0x167   :  { %v473_v58 = vmul.f32 %v472_v49, %v470_v57  ;;  %v477_v59 = vmul.f32 %v476_v50, %v470_v57  ;;  %v481_v60 = vmul.f32 %v480_v51, %v470_v57  ;;  %989 = vrot.lane.b32.xlu1 %v1974_v39, %s2895_s7  ;;  %1021 = vrot.lane.b32.xlu0 %v1825_v9, %s2897_s9  ;;  %s2133_s7 = sld [smem:[#allocation4 + $0x40]] }
 0x168   :  { %2907 = sst [smem:[#allocation10_spill]] %s2221_s27 }
 0x169   :  { %v474_v0 = vadd.f32 %v473_v58, %v457_v52  ;;  %v478_v1 = vadd.f32 %v477_v59, %v461_v53  ;;  %v482_v2 = vadd.f32 %v481_v60, %v465_v54  ;;  %v486_v3 = vpop.permute.xlu1 %485  ;;  %v518_v4 = vpop.permute.xlu0 %517  ;;  %v523_v16 = vstv %s2068_s6  ;;  %s2217_s6 = sld [smem:[#allocation4 + $0x73]] }
 0x16a   :  { %v487_v6 = vsel %vm194_vm8, %v484_v44, %v486_v3  ;;  %2909 = sst [smem:[#allocation12_spill]] %s2229_s0 }
 0x16b   :  { %v490_v7 = vmul.f32 %v489_v61, %v487_v6  ;;  %v494_v8 = vmul.f32 %v493_v62, %v487_v6  ;;  %v498_v13 = vmul.f32 %v497_v63, %v487_v6  ;;  %1006 = vrot.lane.b32.xlu1 %v1974_v39, %s2896_s8  ;;  %1038 = vrot.lane.b32.xlu0 %v1825_v9, %s2898_s10  ;;  %s2137_s8 = sld [smem:[#allocation4 + $0x70]] }
 0x16c   :  { %s2233_s25 = sld [smem:[#allocation4 + $0x75]] }
 0x16d   :  { %v491_v15 = vadd.f32 %v490_v7, %v474_v0  ;;  %v495_v18 = vadd.f32 %v494_v8, %v478_v1  ;;  %v499_v19 = vadd.f32 %v498_v13, %v482_v2  ;;  %v503_v20 = vpop.permute.xlu1 %502  ;;  %v2090_v21 = vpop.permute.xlu0 %534  ;;  %s2241_s16 = sld [smem:[#allocation4 + $0x46]]  ;;  %v605_v61 = vstv %s2133_s7 }
 0x16e   :  { %v504_v22 = vsel %vm212_vm9, %v501_v56, %v503_v20  ;;  %s2243_s27 = sld [smem:[#allocation4 + $0x76]]  ;;  %v2262_v6 = vmul.f32 %v1820_v5, %v605_v61  ;;  %v540_v13 = vstv %s2155_s29 }
 0x16f   :  { %v507_v23 = vmul.f32 %v506_v14, %v504_v22  ;;  %v511_v24 = vmul.f32 %v510_v11, %v504_v22  ;;  %v515_v25 = vmul.f32 %v514_v12, %v504_v22  ;;  %1023 = vrot.lane.b32.xlu1 %v1974_v39, %s2897_s9  ;;  %1055 = vrot.lane.b32.xlu0 %v1825_v9, %s2899_s11  ;;  %s2141_s9 = sld [smem:[#allocation4 + $0xa0]] }
 0x170   :  { %2905 = sst [smem:[#allocation8_spill]] %s2217_s6 }
 0x171   :  { %v508_v27 = vadd.f32 %v507_v23, %v491_v15  ;;  %v512_v30 = vadd.f32 %v511_v24, %v495_v18  ;;  %v516_v31 = vadd.f32 %v515_v25, %v499_v19  ;;  %v520_v32 = vpop.permute.xlu1 %519  ;;  %v2101_v33 = vpop.permute.xlu0 %551  ;;  %s2235_s6 = sld [smem:[#allocation4 + $0xa5]]  ;;  %v609_v62 = vstv %s2137_s8 }
 0x172   :  { %v521_v34 = vsel %vm230_vm10, %v518_v4, %v520_v32  ;;  %s2248_s0 = sld [smem:[#allocation4 + $0xa6]]  ;;  %v2265_v7 = vmul.f32 %v1820_v5, %v609_v62  ;;  %v548_v15 = vstv %s2161_s30  ;;  %v557_v18 = vstv %s2167_s5 }
 0x173   :  { %v524_v28 = vmul.f32 %v523_v16, %v521_v34  ;;  %v528_v29 = vmul.f32 %v527_v17, %v521_v34  ;;  %v532_v35 = vmul.f32 %v531_v26, %v521_v34  ;;  %1040 = vrot.lane.b32.xlu1 %v1974_v39, %s2898_s10  ;;  %1072 = vrot.lane.b32.xlu0 %v1825_v9, %s2900_s3  ;;  %s2145_s10 = sld [smem:[#allocation4 + $0x50]]  ;;  %v561_v19 = vstv %s2169_s12 }
 0x174   :  { %2912 = sst [smem:[#allocation15_spill]] %s2243_s27  ;;  %v565_v23 = vstv %s2173_s1  ;;  %v574_v24 = vstv %s2175_s21  ;;  %v582_v16 = vstv %s2183_s13  ;;  %v591_v17 = vstv %s2185_s19 }
 0x175   :  { %v2109_v36 = vadd.f32 %v524_v28, %v508_v27  ;;  %v2111_v37 = vadd.f32 %v528_v29, %v512_v30  ;;  %v2113_v38 = vadd.f32 %v532_v35, %v516_v31  ;;  %v2115_v40 = vpop.permute.xlu1 %536  ;;  %v2117_v41 = vpop.permute.xlu0 %568  ;;  %v613_v63 = vstv %s2141_s9  ;;  %s2259_s27 = sld [smem:[#allocation4 + $0x77]] }
 0x176   :  { %v2268_v8 = vmul.f32 %v1820_v5, %v613_v63  ;;  %s2270_s7 = sld [smem:[#allocation4 + $0xa7]]  ;;  %v595_v26 = vstv %s2187_s14  ;;  %v622_v30 = vstv %s2195_s15  ;;  %v626_v31 = vstv %s2197_s20 }
 0x177   :  { %1057 = vrot.lane.b32.xlu1 %v1974_v39, %s2899_s11  ;;  %1089 = vrot.lane.b32.xlu0 %v1825_v9, %s2901_s4  ;;  %s2151_s11 = sld [smem:[#allocation4 + $0x80]]  ;;  %v630_v32 = vstv %s2199_s17  ;;  %v639_v29 = vstv %s2205_s22 }
 0x178   :  { %2911 = sst [smem:[#allocation14_spill]] %s2235_s6  ;;  %v643_v35 = vstv %s2207_s18  ;;  %v647_v62 = vstv %s2209_s23 }
 0x179   :  { %v2123_v42 = vpop.permute.xlu1 %553  ;;  %v2125_v43 = vpop.permute.xlu0 %585  ;;  %v874_v2 = vstv %s2145_s10  ;;  %s2273_s8 = sld [smem:[#allocation4 + $0x48]] }
 0x17a   :  { %v2276_v14 = vmul.f32 %v1825_v9, %v874_v2  ;;  %s2288_s9 = sld [smem:[#allocation4 + $0x78]] }
 0x17b   :  { %1074 = vrot.lane.b32.xlu1 %v1974_v39, %s2900_s3  ;;  %1106 = vrot.lane.b32.xlu0 %v1825_v9, %s2902_s28  ;;  %s2153_s3 = sld [smem:[#allocation4 + $0xb0]] }
 0x17c   :  { %2913 = sst [smem:[#allocation16_spill]] %s2259_s27 }
 0x17d   :  { %v2131_v44 = vpop.permute.xlu1 %570  ;;  %v2135_v45 = vpop.permute.xlu0 %616  ;;  %v878_v3 = vstv %s2151_s11  ;;  %s2301_s10 = sld [smem:[#allocation4 + $0xa8]] }
 0x17e   :  { %v2279_v11 = vmul.f32 %v1825_v9, %v878_v3  ;;  %s2307_s11 = sld [smem:[#allocation4 + $0x49]] }
 0x17f   :  { %1091 = vrot.lane.b32.xlu1 %v1974_v39, %s2901_s4  ;;  %1123 = vrot.lane.b32.xlu0 %v1825_v9, %s2903_s24  ;;  %s2159_s4 = sld [smem:[#allocation4 + $0x6c]] }
 0x180   :  { %2914 = sst [smem:[#allocation17_spill]] %s2273_s8 }
 0x181   :  { %v2147_v46 = vpop.permute.xlu1 %587  ;;  %v2149_v47 = vpop.permute.xlu0 %633  ;;  %v882_v4 = vstv %s2153_s3  ;;  %s2915_s3 = sld [smem:[#allocation7_spill]] }
 0x182   :  { %v2282_v12 = vmul.f32 %v1825_v9, %v882_v4  ;;  %v538_v9 = vsel %vm248_vm11, %v2090_v21, %v2115_v40  ;;  %v555_v21 = vsel %vm266_vm12, %v2101_v33, %v2123_v42  ;;  %s2916_s29 = sld [smem:[#allocation8_spill]]  ;;  %v572_v42 = vsel %vm284_vm13, %v2117_v41, %v2131_v44 }
 0x183   :  { %1108 = vrot.lane.b32.xlu1 %v1974_v39, %s2902_s28  ;;  %s2181_s28 = sld [smem:[#allocation4 + $0x6e]]  ;;  %v541_v34 = vmul.f32 %v540_v13, %v538_v9  ;;  %v549_v33 = vmul.f32 %v548_v15, %v538_v9  ;;  %v558_v2 = vmul.f32 %v557_v18, %v555_v21  ;;  %v562_v3 = vmul.f32 %v561_v19, %v555_v21 }
 0x184   :  { %s2320_s5 = sld [smem:[#allocation4 + $0xa9]]  ;;  %v589_v15 = vsel %vm302_vm14, %v2125_v43, %v2147_v46  ;;  %v575_v19 = vmul.f32 %v574_v24, %v572_v42  ;;  %v583_v46 = vmul.f32 %v582_v16, %v572_v42 }
 0x185   :  { %v2163_v48 = vpop.permute.xlu1 %618  ;;  %v2165_v49 = vpop.permute.xlu0 %650  ;;  %v544_v5 = vstv %s2159_s4  ;;  %s2316_s4 = sld [smem:[#allocation4 + $0x79]]  ;;  %v542_v44 = vadd.f32 %v541_v34, %v2109_v36  ;;  %v550_v43 = vadd.f32 %v549_v33, %v2113_v38  ;;  %v592_v24 = vmul.f32 %v591_v17, %v589_v15 }
 0x186   :  { %v545_v28 = vmul.f32 %v544_v5, %v538_v9  ;;  %s2332_s1 = sld [smem:[#allocation4 + $0x4a]]  ;;  %v566_v5 = vmul.f32 %v565_v23, %v555_v21  ;;  %v694_v9 = vstv %s2233_s25  ;;  %v698_v38 = vstv %s2235_s6 }
 0x187   :  { %1125 = vrot.lane.b32.xlu1 %v1974_v39, %s2903_s24  ;;  %s2193_s24 = sld [smem:[#allocation4 + $0x9f]]  ;;  %v656_v63 = vstv %s2915_s3  ;;  %v559_v36 = vadd.f32 %v558_v2, %v542_v44 }
 0x188   :  { %s2921_s21 = sld [smem:[#allocation12_spill]]  ;;  %v546_v18 = vadd.f32 %v545_v28, %v2111_v37  ;;  %v567_v34 = vadd.f32 %v566_v5, %v550_v43  ;;  %v724_v5 = vstv %s2250_s2 }
 0x189   :  { %v2177_v50 = vpop.permute.xlu1 %635  ;;  %v2179_v51 = vpop.permute.xlu0 %667  ;;  %v578_v25 = vstv %s2181_s28  ;;  %s2336_s28 = sld [smem:[#allocation4 + $0x7a]]  ;;  %v576_v16 = vadd.f32 %v575_v19, %v559_v36  ;;  %v741_v19 = vstv %s2273_s8  ;;  %v745_v36 = vstv %s2288_s9 }
 0x18a   :  { %2918 = sst [smem:[#allocation7_spill]] %s2320_s5  ;;  %v579_v13 = vmul.f32 %v578_v25, %v572_v42  ;;  %v563_v37 = vadd.f32 %v562_v3, %v546_v18  ;;  %v596_v25 = vmul.f32 %v595_v26, %v589_v15  ;;  %v707_v42 = vstv %s2241_s16 }
 0x18b   :  { %s2922_s13 = sld [smem:[#allocation13_spill]]  ;;  %v715_v3 = vstv %s2248_s0  ;;  %v732_v18 = vstv %s2270_s7 }
 0x18c   :  { %2920 = sst [smem:[#allocation8_spill]] %s2332_s1  ;;  %v580_v33 = vadd.f32 %v579_v13, %v563_v37  ;;  %v593_v13 = vadd.f32 %v592_v24, %v576_v16 }
 0x18d   :  { %v2189_v52 = vpop.permute.xlu1 %652  ;;  %v2191_v53 = vpop.permute.xlu0 %684  ;;  %v599_v27 = vstv %s2193_s24  ;;  %s2344_s19 = sld [smem:[#allocation4 + $0xaa]] }
 0x18e   :  { %s2350_s14 = sld [smem:[#allocation4 + $0x4b]]  ;;  %v681_v21 = vstv %s2921_s21  ;;  %v600_v28 = vmul.f32 %v599_v27, %v589_v15  ;;  %v584_v27 = vadd.f32 %v583_v46, %v567_v34  ;;  %v728_v15 = vstv %s2259_s27 }
 0x18f   :  { %s2923_s24 = sld [smem:[#allocation15_spill]]  ;;  %v597_v44 = vadd.f32 %v596_v25, %v580_v33  ;;  %v620_v46 = vsel %vm50_vm0, %v2135_v45, %v2163_v48  ;;  %v637_v45 = vsel %vm68_vm1, %v2149_v47, %v2177_v50  ;;  %v779_v48 = vstv %s2336_s28 }
 0x190   :  { %s2357_s12 = sld [smem:[#allocation4 + $0x7b]]  ;;  %v601_v43 = vadd.f32 %v600_v28, %v584_v27  ;;  %v607_v16 = vadd.f32 %v2262_v6, %v593_v13  ;;  %v623_v24 = vmul.f32 %v622_v30, %v620_v46  ;;  %v627_v37 = vmul.f32 %v626_v31, %v620_v46 }
 0x191   :  { %v2201_v39 = vpop.permute.xlu1 %669  ;;  %v2203_v54 = vpop.permute.xlu0 %701  ;;  %v690_v41 = vstv %s2922_s13  ;;  %s2359_s30 = sld [smem:[#allocation4 + $0xab]]  ;;  %v611_v25 = vadd.f32 %v2265_v7, %v597_v44  ;;  %v631_v50 = vmul.f32 %v630_v32, %v620_v46  ;;  %v654_v6 = vsel %vm86_vm2, %v2165_v49, %v2189_v52 }
 0x192   :  { %s2363_s26 = sld [smem:[#allocation4 + $0x4c]]  ;;  %v615_v47 = vadd.f32 %v2268_v8, %v601_v43  ;;  %v640_v7 = vmul.f32 %v639_v29, %v637_v45  ;;  %v644_v30 = vmul.f32 %v643_v35, %v637_v45  ;;  %v648_v49 = vmul.f32 %v647_v62, %v637_v45 }
 0x193   :  { %s2369_s13 = sld [smem:[#allocation4 + $0x7c]]  ;;  %v783_v27 = vstv %s2344_s19  ;;  %v671_v52 = vsel %vm104_vm3, %v2179_v51, %v2201_v39  ;;  %v624_v43 = vadd.f32 %v623_v24, %v607_v16  ;;  %v628_v46 = vadd.f32 %v627_v37, %v611_v25 }
 0x194   :  { %s2376_s6 = sld [smem:[#allocation4 + $0xac]]  ;;  %v657_v44 = vmul.f32 %v656_v63, %v654_v6  ;;  %v2930_v31 = vstv %s2916_s29  ;;  %v632_v62 = vadd.f32 %v631_v50, %v615_v47 }
 0x195   :  { %v2213_v55 = vpop.permute.xlu1 %686  ;;  %v2215_v56 = vpop.permute.xlu0 %718  ;;  %v711_v2 = vstv %s2923_s24  ;;  %s2380_s24 = sld [smem:[#allocation4 + $0x4d]]  ;;  %v661_v13 = vmul.f32 %v2930_v31, %v654_v6  ;;  %v641_v63 = vadd.f32 %v640_v7, %v624_v43  ;;  %v645_v37 = vadd.f32 %v644_v30, %v628_v46 }
 0x196   :  { %s2388_s27 = sld [smem:[#allocation4 + $0x7d]]  ;;  %v688_v51 = vsel %vm122_vm4, %v2191_v53, %v2213_v55  ;;  %v649_v53 = vadd.f32 %v648_v49, %v632_v62  ;;  %v682_v55 = vmul.f32 %v681_v21, %v671_v52 }
 0x197   :  { %2924 = sst [smem:[#allocation12_spill]] %s2359_s30  ;;  %v658_v30 = vadd.f32 %v657_v44, %v641_v63  ;;  %v662_v43 = vadd.f32 %v661_v13, %v645_v37  ;;  %v691_v46 = vmul.f32 %v690_v41, %v688_v51  ;;  %v699_v49 = vmul.f32 %v698_v38, %v688_v51 }
 0x198   :  { %s2396_s8 = sld [smem:[#allocation4 + $0xad]] }
 0x199   :  { %v2225_v57 = vpop.permute.xlu1 %703  ;;  %v2227_v58 = vpop.permute.xlu0 %735  ;;  %2925 = sst [smem:[#allocation18_spill]] %s2369_s13  ;;  %v813_v29 = vstv %s2369_s13 }
 0x19a   :  { %2926 = sst [smem:[#allocation19_spill]] %s2376_s6  ;;  %v817_v35 = vstv %s2376_s6 }
 0x19b   :  { %s2407_s1 = sld [smem:[#allocation4 + $0x4e]]  ;;  %v826_v39 = vstv %s2380_s24 }
 0x19c   :  { %s2415_s5 = sld [smem:[#allocation4 + $0x7e]]  ;;  %v830_v7 = vstv %s2388_s27 }
 0x19d   :  { %v2237_v59 = vpop.permute.xlu1 %720  ;;  %v2239_v60 = vpop.permute.xlu0 %752  ;;  %s2425_s15 = sld [smem:[#allocation4 + $0xae]] }
 0x19e   :  { %s2927_s20 = sld [smem:[#allocation9_spill]] }
 0x19f   :  { %s2435_s17 = sld [smem:[#allocation4 + $0x4f]] }
 0x1a0   :  { %s2928_s22 = sld [smem:[#allocation10_spill]] }
 0x1a1   :  { %v2252_v0 = vpop.permute.xlu1 %737  ;;  %v2254_v1 = vpop.permute.xlu0 %769  ;;  %s2929_s18 = sld [smem:[#allocation11_spill]] }
 0x1a2   :  { %s2447_s30 = sld [smem:[#allocation4 + $0x7f]] }
 0x1a3   :  { %s2453_s23 = sld [smem:[#allocation4 + $0xaf]] }
 0x1a4   :  { %v2931_v45 = vstv %s2927_s20  ;;  %s2462_s13 = sld [smem:[#allocation4 + $0x51]] }
 0x1a5   :  { %v2290_v20 = vpop.permute.xlu1 %754  ;;  %v2292_v22 = vpop.permute.xlu0 %786  ;;  %v665_v34 = vmul.f32 %v2931_v45, %v654_v6  ;;  %s2470_s29 = sld [smem:[#allocation4 + $0x81]]  ;;  %v705_v6 = vsel %vm140_vm5, %v2203_v54, %v2225_v57  ;;  %v695_v45 = vmul.f32 %v694_v9, %v688_v51  ;;  %v722_v54 = vsel %vm158_vm6, %v2215_v56, %v2237_v59 }
 0x1a6   :  { %v2933_v24 = vstv %s2928_s22  ;;  %s2481_s22 = sld [smem:[#allocation4 + $0xb1]]  ;;  %v834_v57 = vstv %s2396_s8  ;;  %v708_v9 = vmul.f32 %v707_v42, %v705_v6  ;;  %v712_v44 = vmul.f32 %v711_v2, %v705_v6 }
 0x1a7   :  { %v674_v25 = vmul.f32 %v2933_v24, %v671_v52  ;;  %v2934_v16 = vstv %s2929_s18  ;;  %s2487_s18 = sld [smem:[#allocation4 + $0x52]]  ;;  %v666_v21 = vadd.f32 %v665_v34, %v649_v53  ;;  %v716_v59 = vmul.f32 %v715_v3, %v705_v6 }
 0x1a8   :  { %v678_v31 = vmul.f32 %v2934_v16, %v671_v52  ;;  %s2496_s21 = sld [smem:[#allocation4 + $0x82]]  ;;  %v739_v52 = vsel %vm176_vm7, %v2227_v58, %v2252_v0  ;;  %v843_v42 = vstv %s2407_s1  ;;  %v725_v51 = vmul.f32 %v724_v5, %v722_v54 }
 0x1a9   :  { %v2322_v40 = vpop.permute.xlu1 %771  ;;  %v2324_v61 = vpop.permute.xlu0 %803  ;;  %v675_v41 = vadd.f32 %v674_v25, %v658_v30  ;;  %s2504_s25 = sld [smem:[#allocation4 + $0xb2]]  ;;  %v683_v56 = vadd.f32 %v682_v55, %v666_v21  ;;  %v729_v63 = vmul.f32 %v728_v15, %v722_v54  ;;  %v733_v37 = vmul.f32 %v732_v18, %v722_v54 }
 0x1aa   :  { %v679_v13 = vadd.f32 %v678_v31, %v662_v43  ;;  %s2515_s16 = sld [smem:[#allocation4 + $0x53]]  ;;  %v756_v58 = vsel %vm194_vm8, %v2239_v60, %v2290_v20  ;;  %v847_v0 = vstv %s2415_s5  ;;  %v742_v15 = vmul.f32 %v741_v19, %v739_v52 }
 0x1ab   :  { %v692_v2 = vadd.f32 %v691_v46, %v675_v41  ;;  %s2521_s20 = sld [smem:[#allocation4 + $0x83]]  ;;  %v700_v3 = vadd.f32 %v699_v49, %v683_v56  ;;  %v746_v25 = vmul.f32 %v745_v36, %v739_v52  ;;  %v2940_v20 = vstv %s2301_s10 }
 0x1ac   :  { %v696_v62 = vadd.f32 %v695_v45, %v679_v13  ;;  %s2530_s0 = sld [smem:[#allocation4 + $0xb3]]  ;;  %v750_v31 = vmul.f32 %v2940_v20, %v739_v52  ;;  %v773_v53 = vsel %vm212_vm9, %v2254_v1, %v2322_v40  ;;  %v851_v19 = vstv %s2425_s15 }
 0x1ad   :  { %v2348_v4 = vpop.permute.xlu1 %788  ;;  %v2352_v23 = vpop.permute.xlu0 %820  ;;  %v709_v5 = vadd.f32 %v708_v9, %v692_v2  ;;  %s2939_s2 = sld [smem:[#allocation7_spill]]  ;;  %v717_v60 = vadd.f32 %v716_v59, %v700_v3  ;;  %v2942_v6 = vstv %s2307_s11  ;;  %v2943_v43 = vstv %s2316_s4 }
 0x1ae   :  { %v713_v24 = vadd.f32 %v712_v44, %v696_v62  ;;  %s2538_s7 = sld [smem:[#allocation4 + $0x54]]  ;;  %v759_v30 = vmul.f32 %v2942_v6, %v756_v58  ;;  %v763_v46 = vmul.f32 %v2943_v43, %v756_v58  ;;  %v790_v1 = vsel %vm230_vm10, %v2292_v22, %v2348_v4 }
 0x1af   :  { %s2941_s6 = sld [smem:[#allocation8_spill]]  ;;  %v726_v36 = vadd.f32 %v725_v51, %v709_v5  ;;  %v734_v45 = vadd.f32 %v733_v37, %v717_v60  ;;  %v860_v40 = vstv %s2435_s17  ;;  %v780_v44 = vmul.f32 %v779_v48, %v773_v53 }
 0x1b0   :  { %s2549_s9 = sld [smem:[#allocation4 + $0x84]]  ;;  %v730_v55 = vadd.f32 %v729_v63, %v713_v24  ;;  %v784_v4 = vmul.f32 %v783_v27, %v773_v53  ;;  %v864_v2 = vstv %s2447_s30  ;;  %v2948_v51 = vstv %s2350_s14 }
 0x1b1   :  { %v2367_v17 = vpop.permute.xlu1 %805  ;;  %v2371_v26 = vpop.permute.xlu0 %837  ;;  %s2555_s3 = sld [smem:[#allocation4 + $0xb4]]  ;;  %v743_v54 = vadd.f32 %v742_v15, %v726_v36  ;;  %v751_v22 = vadd.f32 %v750_v31, %v734_v45  ;;  %v793_v63 = vmul.f32 %v2948_v51, %v790_v1  ;;  %v2949_v3 = vstv %s2357_s12 }
 0x1b2   :  { %s2564_s10 = sld [smem:[#allocation4 + $0x55]]  ;;  %v747_v41 = vadd.f32 %v746_v25, %v730_v55  ;;  %v807_v52 = vsel %vm248_vm11, %v2324_v61, %v2367_v17  ;;  %v797_v37 = vmul.f32 %v2949_v3, %v790_v1  ;;  %v868_v17 = vstv %s2453_s23 }
 0x1b3   :  { %v2944_v21 = vstv %s2939_s2  ;;  %s2946_s11 = sld [smem:[#allocation12_spill]]  ;;  %v760_v48 = vadd.f32 %v759_v30, %v743_v54  ;;  %v2952_v25 = vstv %s2363_s26  ;;  %v814_v20 = vmul.f32 %v813_v29, %v807_v52  ;;  %s2953_s2 = smov 127  }
 0x1b4   :  { %v767_v49 = vmul.f32 %v2944_v21, %v756_v58  ;;  %s2572_s4 = sld [smem:[#allocation4 + $0x85]]  ;;  %v764_v62 = vadd.f32 %v763_v46, %v747_v41  ;;  %v810_v60 = vmul.f32 %v2952_v25, %v807_v52  ;;  %v891_v55 = vstv %s2462_s13 }
 0x1b5   :  { %v2394_v33 = vpop.permute.xlu1 %822  ;;  %v2398_v28 = vpop.permute.xlu0 %854  ;;  %v2945_v13 = vstv %s2941_s6  ;;  %s2583_s28 = sld [smem:[#allocation4 + $0xb5]]  ;;  %v908_v54 = vstv %s2487_s18  ;;  %v942_v3 = vstv %s2538_s7 }
 0x1b6   :  { %v776_v9 = vmul.f32 %v2945_v13, %v773_v53  ;;  %s2589_s6 = sld [smem:[#allocation4 + $0x56]]  ;;  %v768_v27 = vadd.f32 %v767_v49, %v751_v22  ;;  %v824_v61 = vsel %vm266_vm12, %v2352_v23, %v2394_v33  ;;  %v781_v15 = vadd.f32 %v780_v44, %v764_v62 }
 0x1b7   :  { %s2598_s30 = sld [smem:[#allocation4 + $0x86]]  ;;  %v818_v33 = vmul.f32 %v817_v35, %v807_v52  ;;  %v827_v30 = vmul.f32 %v826_v39, %v824_v61  ;;  %v831_v43 = vmul.f32 %v830_v7, %v824_v61  ;;  %v835_v46 = vmul.f32 %v834_v57, %v824_v61 }
 0x1b8   :  { %v777_v24 = vadd.f32 %v776_v9, %v760_v48  ;;  %s2606_s12 = sld [smem:[#allocation4 + $0xb6]]  ;;  %v785_v23 = vadd.f32 %v784_v4, %v768_v27  ;;  %v798_v6 = vadd.f32 %v797_v37, %v781_v15  ;;  %v912_v22 = vstv %s2496_s21 }
 0x1b9   :  { %v2433_v8 = vpop.permute.xlu1 %839  ;;  %v2437_v32 = vpop.permute.xlu0 %885  ;;  %v2951_v58 = vstv %s2946_s11  ;;  %s2617_s26 = sld [smem:[#allocation4 + $0x57]]  ;;  %v916_v4 = vstv %s2504_s25  ;;  %v925_v48 = vstv %s2515_s16  ;;  %v929_v62 = vstv %s2521_s20 }
 0x1ba   :  { %v801_v5 = vmul.f32 %v2951_v58, %v790_v1  ;;  %v841_v36 = vsel %vm284_vm13, %v2371_v26, %v2433_v8  ;;  %v794_v29 = vadd.f32 %v793_v63, %v777_v24  ;;  %s2623_s19 = sld [smem:[#allocation4 + $0x87]]  ;;  %v895_v8 = vstv %s2470_s29 }
 0x1bb   :  { %s2632_s14 = sld [smem:[#allocation4 + $0xb7]]  ;;  %v815_v39 = vadd.f32 %v814_v20, %v798_v6  ;;  %v844_v21 = vmul.f32 %v843_v42, %v841_v36  ;;  %v848_v7 = vmul.f32 %v847_v0, %v841_v36  ;;  %v933_v63 = vstv %s2530_s0 }
 0x1bc   :  { %v802_v35 = vadd.f32 %v801_v5, %v785_v23  ;;  %v811_v45 = vadd.f32 %v810_v60, %v794_v29  ;;  %s2642_s27 = sld [smem:[#allocation4 + $0x58]]  ;;  %v946_v37 = vstv %s2549_s9  ;;  %v950_v5 = vstv %s2555_s3 }
 0x1bd   :  { %v2468_v47 = vpop.permute.xlu1 %856  ;;  %v2472_v50 = vpop.permute.xlu0 %902  ;;  %s2648_s8 = sld [smem:[#allocation4 + $0x88]]  ;;  %v832_v41 = vadd.f32 %v831_v43, %v815_v39  ;;  %v959_v61 = vstv %s2564_s10  ;;  %v963_v15 = vstv %s2572_s4  ;;  %v967_v25 = vstv %s2583_s28 }
 0x1be   :  { %v858_v26 = vsel %vm302_vm14, %v2398_v28, %v2468_v47  ;;  %v819_v57 = vadd.f32 %v818_v33, %v802_v35  ;;  %v852_v28 = vmul.f32 %v851_v19, %v841_v36  ;;  %v899_v47 = vstv %s2481_s22  ;;  %s2650_s5 = sld [smem:[#allocation4 + $0xb8]] }
 0x1bf   :  { %v828_v42 = vadd.f32 %v827_v30, %v811_v45  ;;  %v861_v0 = vmul.f32 %v860_v40, %v858_v26  ;;  %v865_v13 = vmul.f32 %v864_v2, %v858_v26  ;;  %v869_v44 = vmul.f32 %v868_v17, %v858_v26  ;;  %s2654_s1 = sld [smem:[#allocation4 + $0x59]] }
 0x1c0   :  { %v836_v9 = vadd.f32 %v835_v46, %v819_v57  ;;  %v849_v52 = vadd.f32 %v848_v7, %v832_v41  ;;  %s2662_s24 = sld [smem:[#allocation4 + $0x89]]  ;;  %v976_v60 = vstv %s2589_s6  ;;  %v980_v20 = vstv %s2598_s30  ;;  %s2954_s6 = smov 126  }
 0x1c1   :  { %v2502_v34 = vpop.permute.xlu1 %887  ;;  %v2506_v38 = vpop.permute.xlu0 %919  ;;  %v845_v19 = vadd.f32 %v844_v21, %v828_v42  ;;  %s2667_s15 = sld [smem:[#allocation4 + $0xb9]]  ;;  %v984_v23 = vstv %s2606_s12  ;;  %v993_v36 = vstv %s2617_s26  ;;  %v997_v30 = vstv %s2623_s19 }
 0x1c2   :  { %v853_v51 = vadd.f32 %v852_v28, %v836_v9  ;;  %v866_v58 = vadd.f32 %v865_v13, %v849_v52  ;;  %v889_v24 = vsel %vm50_vm0, %v2437_v32, %v2502_v34  ;;  %s2677_s23 = sld [smem:[#allocation4 + $0x5a]]  ;;  %v1001_v32 = vstv %s2632_s14 }
 0x1c3   :  { %v862_v27 = vadd.f32 %v861_v0, %v845_v19  ;;  %v1010_v34 = vstv %s2642_s27  ;;  %s2692_s29 = sld [smem:[#allocation4 + $0x8a]]  ;;  %v892_v46 = vmul.f32 %v891_v55, %v889_v24  ;;  %v896_v26 = vmul.f32 %v895_v8, %v889_v24 }
 0x1c4   :  { %v870_v17 = vadd.f32 %v869_v44, %v853_v51  ;;  %v880_v35 = vadd.f32 %v2279_v11, %v866_v58  ;;  %v900_v39 = vmul.f32 %v899_v47, %v889_v24  ;;  %s2704_s22 = sld [smem:[#allocation4 + $0xba]]  ;;  %v1018_v11 = vstv %s2650_s5 }
 0x1c5   :  { %v2536_v16 = vpop.permute.xlu1 %904  ;;  %v2540_v18 = vpop.permute.xlu0 %936  ;;  %v876_v43 = vadd.f32 %v2276_v14, %v862_v27  ;;  %v1027_v55 = vstv %s2654_s1  ;;  %s2710_s13 = sld [smem:[#allocation4 + $0x5b]] }
 0x1c6   :  { %v906_v6 = vsel %vm68_vm1, %v2472_v50, %v2536_v16  ;;  %v884_v45 = vadd.f32 %v2282_v12, %v870_v17  ;;  %v1014_v16 = vstv %s2648_s8  ;;  %v897_v47 = vadd.f32 %v896_v26, %v880_v35  ;;  %s2718_s18 = sld [smem:[#allocation4 + $0x8b]] }
 0x1c7   :  { %v909_v21 = vmul.f32 %v908_v54, %v906_v6  ;;  %v913_v14 = vmul.f32 %v912_v22, %v906_v6  ;;  %v917_v12 = vmul.f32 %v916_v4, %v906_v6  ;;  %v893_v28 = vadd.f32 %v892_v46, %v876_v43  ;;  %s2725_s21 = sld [smem:[#allocation4 + $0xbb]] }
 0x1c8   :  { %v901_v41 = vadd.f32 %v900_v39, %v884_v45  ;;  %v1044_v9 = vstv %s2677_s23  ;;  %s2727_s25 = sld [smem:[#allocation4 + $0x5c]] }
 0x1c9   :  { %v2570_v56 = vpop.permute.xlu1 %921  ;;  %v2574_v59 = vpop.permute.xlu0 %953  ;;  %s2734_s16 = sld [smem:[#allocation4 + $0x8c]] }
 0x1ca   :  { %v923_v50 = vsel %vm86_vm2, %v2506_v38, %v2570_v56  ;;  %v1031_v38 = vstv %s2662_s24  ;;  %v1035_v56 = vstv %s2667_s15  ;;  %v918_v52 = vadd.f32 %v917_v12, %v901_v41  ;;  %s2740_s20 = sld [smem:[#allocation4 + $0xbc]] }
 0x1cb   :  { %v926_v54 = vmul.f32 %v925_v48, %v923_v50  ;;  %v930_v42 = vmul.f32 %v929_v62, %v923_v50  ;;  %v934_v0 = vmul.f32 %v933_v63, %v923_v50  ;;  %v1061_v24 = vstv %s2710_s13  ;;  %s2745_s0 = sld [smem:[#allocation4 + $0x5d]] }
 0x1cc   :  { %s2754_s7 = sld [smem:[#allocation4 + $0x8d]]  ;;  %v1065_v35 = vstv %s2718_s18 }
 0x1cd   :  { %v2604_v31 = vpop.permute.xlu1 %938  ;;  %v2608_v53 = vpop.permute.xlu0 %970  ;;  %s2766_s9 = sld [smem:[#allocation4 + $0xbd]]  ;;  %v1069_v50 = vstv %s2725_s21 }
 0x1ce   :  { %v940_v8 = vsel %vm104_vm3, %v2540_v18, %v2604_v31  ;;  %v910_v18 = vadd.f32 %v909_v21, %v893_v28  ;;  %v914_v31 = vadd.f32 %v913_v14, %v897_v47  ;;  %v1078_v21 = vstv %s2727_s25  ;;  %s2772_s3 = sld [smem:[#allocation4 + $0x5e]] }
 0x1cf   :  { %v943_v44 = vmul.f32 %v942_v3, %v940_v8  ;;  %v947_v22 = vmul.f32 %v946_v37, %v940_v8  ;;  %v951_v48 = vmul.f32 %v950_v5, %v940_v8  ;;  %v935_v37 = vadd.f32 %v934_v0, %v918_v52  ;;  %s2779_s10 = sld [smem:[#allocation4 + $0x8e]] }
 0x1d0   :  { %v927_v62 = vadd.f32 %v926_v54, %v910_v18  ;;  %v931_v51 = vadd.f32 %v930_v42, %v914_v31  ;;  %v1052_v5 = vstv %s2704_s22  ;;  %v1082_v8 = vstv %s2734_s16  ;;  %s2786_s11 = sld [smem:[#allocation4 + $0xbe]] }
 0x1d1   :  { %v2638_v49 = vpop.permute.xlu1 %955  ;;  %v2640_v1 = vpop.permute.xlu0 %987  ;;  %v1086_v54 = vstv %s2740_s20  ;;  %v1095_v31 = vstv %s2745_s0  ;;  %s2799_s4 = sld [smem:[#allocation4 + $0x5f]] }
 0x1d2   :  { %v957_v13 = vsel %vm122_vm4, %v2574_v59, %v2638_v49  ;;  %v1048_v49 = vstv %s2692_s29  ;;  %s2803_s17 = sld [smem:[#allocation4 + $0x8f]] }
 0x1d3   :  { %v960_v63 = vmul.f32 %v959_v61, %v957_v13  ;;  %v964_v3 = vmul.f32 %v963_v15, %v957_v13  ;;  %v968_v27 = vmul.f32 %v967_v25, %v957_v13  ;;  %v952_v15 = vadd.f32 %v951_v48, %v935_v37  ;;  %s2806_s28 = sld [smem:[#allocation4 + $0xbf]] }
 0x1d4   :  { %v1103_v48 = vstv %s2766_s9  ;;  %s1429_s30 = sld [smem:[#allocation4 + $0xc0]] }
 0x1d5   :  { %v2658_v40 = vpop.permute.xlu1 %972  ;;  %v2660_v2 = vpop.permute.xlu0 %1004  ;;  %v969_v26 = vadd.f32 %v968_v27, %v952_v15  ;;  %s1430_s12 = sld [smem:[#allocation4 + $0xc1]] }
 0x1d6   :  { %v974_v59 = vsel %vm140_vm5, %v2608_v53, %v2658_v40  ;;  %v944_v53 = vadd.f32 %v943_v44, %v927_v62  ;;  %v948_v40 = vadd.f32 %v947_v22, %v931_v51  ;;  %v1099_v44 = vstv %s2754_s7  ;;  %s1428_s26 = sld [smem:[#allocation4 + $0xcf]] }
 0x1d7   :  { %v977_v61 = vmul.f32 %v976_v60, %v974_v59  ;;  %v981_v25 = vmul.f32 %v980_v20, %v974_v59  ;;  %s1431_s19 = sld [smem:[#allocation4 + $0xc2]] }
 0x1d8   :  { %v961_v60 = vadd.f32 %v960_v63, %v944_v53  ;;  %v965_v6 = vadd.f32 %v964_v3, %v948_v40  ;;  %v1112_v63 = vstv %s2772_s3  ;;  %v1116_v40 = vstv %s2779_s10  ;;  %s1432_s14 = sld [smem:[#allocation4 + $0xc3]] }
 0x1d9   :  { %v990_v33 = vpop.permute.xlu1 %989  ;;  %v2683_v29 = vpop.permute.xlu0 %1021  ;;  %s1433_s27 = sld [smem:[#allocation4 + $0xc4]] }
 0x1da   :  { %v991_v58 = vsel %vm158_vm6, %v2640_v1, %v990_v33  ;;  %v985_v1 = vmul.f32 %v984_v23, %v974_v59  ;;  %v978_v45 = vadd.f32 %v977_v61, %v961_v60  ;;  %v1120_v61 = vstv %s2786_s11  ;;  %s1434_s8 = sld [smem:[#allocation4 + $0xc5]] }
 0x1db   :  { %v994_v43 = vmul.f32 %v993_v36, %v991_v58  ;;  %v998_v20 = vmul.f32 %v997_v30, %v991_v58  ;;  %v1002_v23 = vmul.f32 %v1001_v32, %v991_v58  ;;  %v982_v30 = vadd.f32 %v981_v25, %v965_v6  ;;  %s1435_s5 = sld [smem:[#allocation4 + $0xc6]] }
 0x1dc   :  { %v986_v32 = vadd.f32 %v985_v1, %v969_v26  ;;  %v1129_v26 = vstv %s2799_s4  ;;  %s1436_s1 = sld [smem:[#allocation4 + $0xc7]] }
 0x1dd   :  { %v1007_v7 = vpop.permute.xlu1 %1006  ;;  %v2708_v57 = vpop.permute.xlu0 %1038  ;;  %v999_v28 = vadd.f32 %v998_v20, %v982_v30  ;;  %s1437_s24 = sld [smem:[#allocation4 + $0xc8]] }
 0x1de   :  { %v1008_v33 = vsel %vm176_vm7, %v2660_v2, %v1007_v7  ;;  %v1003_v47 = vadd.f32 %v1002_v23, %v986_v32  ;;  %s2955_s29 = sld [smem:[#allocation20_spill]] }
 0x1df   :  { %v1011_v36 = vmul.f32 %v1010_v34, %v1008_v33  ;;  %v1015_v14 = vmul.f32 %v1014_v16, %v1008_v33  ;;  %v995_v34 = vadd.f32 %v994_v43, %v978_v45  ;;  %v1019_v7 = vmul.f32 %v1018_v11, %v1008_v33 }
 0x1e1   :  { %v1024_v4 = vpop.permute.xlu1 %1023  ;;  %v1056_v19 = vpop.permute.xlu0 %1055  ;;  %v1012_v42 = vadd.f32 %v1011_v36, %v995_v34  ;;  %v1016_v13 = vadd.f32 %v1015_v14, %v999_v28 }
 0x1e2   :  { %v1025_v2 = vsel %vm194_vm8, %v2683_v29, %v1024_v4 }
 0x1e3   :  { %v1028_v12 = vmul.f32 %v1027_v55, %v1025_v2  ;;  %v1032_v16 = vmul.f32 %v1031_v38, %v1025_v2  ;;  %v1020_v38 = vadd.f32 %v1019_v7, %v1003_v47 }
 0x1e5   :  { %v1041_v17 = vpop.permute.xlu1 %1040  ;;  %v1073_v46 = vpop.permute.xlu0 %1072  ;;  %v1029_v22 = vadd.f32 %v1028_v12, %v1012_v42 }
 0x1e6   :  { %v1042_v29 = vsel %vm212_vm9, %v2708_v57, %v1041_v17  ;;  %v1036_v57 = vmul.f32 %v1035_v56, %v1025_v2 }
 0x1e7   :  { %v1045_v41 = vmul.f32 %v1044_v9, %v1042_v29  ;;  %v1049_v18 = vmul.f32 %v1048_v49, %v1042_v29  ;;  %v1053_v4 = vmul.f32 %v1052_v5, %v1042_v29  ;;  %v1033_v9 = vadd.f32 %v1032_v16, %v1016_v13 }
 0x1e8   :  { %v1037_v59 = vadd.f32 %v1036_v57, %v1020_v38  ;;  %v1165_v38 = vstv %s1430_s12 }
 0x1e9   :  { %v1058_v39 = vpop.permute.xlu1 %1057  ;;  %v1090_v55 = vpop.permute.xlu0 %1089  ;;  %v1046_v49 = vadd.f32 %v1045_v41, %v1029_v22  ;;  %v1050_v3 = vadd.f32 %v1049_v18, %v1033_v9 }
 0x1ea   :  { %v1059_v11 = vsel %vm230_vm10, %v1056_v19, %v1058_v39  ;;  %v1054_v5 = vadd.f32 %v1053_v4, %v1037_v59 }
 0x1eb   :  { %v1062_v19 = vmul.f32 %v1061_v24, %v1059_v11  ;;  %v1066_v52 = vmul.f32 %v1065_v35, %v1059_v11  ;;  %v1070_v62 = vmul.f32 %v1069_v50, %v1059_v11  ;;  %v1133_v50 = vstv %s2803_s17 }
 0x1ed   :  { %v1075_v0 = vpop.permute.xlu1 %1074  ;;  %v1107_v17 = vpop.permute.xlu0 %1106  ;;  %v1063_v24 = vadd.f32 %v1062_v19, %v1046_v49  ;;  %v1067_v15 = vadd.f32 %v1066_v52, %v1050_v3  ;;  %v1071_v33 = vadd.f32 %v1070_v62, %v1054_v5  ;;  %v1180_v62 = vstv %s1432_s14 }
 0x1ee   :  { %v1076_v56 = vsel %vm248_vm11, %v1073_v46, %v1075_v0 }
 0x1ef   :  { %v1079_v37 = vmul.f32 %v1078_v21, %v1076_v56  ;;  %v1083_v27 = vmul.f32 %v1082_v8, %v1076_v56  ;;  %v1087_v53 = vmul.f32 %v1086_v54, %v1076_v56  ;;  %v1137_v21 = vstv %s2806_s28 }
 0x1f0   :  { %v1152_v56 = vstv %s1428_s26 }
 0x1f1   :  { %v1092_v51 = vpop.permute.xlu1 %1091  ;;  %v1080_v43 = vadd.f32 %v1079_v37, %v1063_v24  ;;  %v1084_v35 = vadd.f32 %v1083_v27, %v1067_v15  ;;  %v1088_v20 = vadd.f32 %v1087_v53, %v1071_v33  ;;  %v1124_v14 = vpop.permute.xlu0 %1123  ;;  %v1189_v37 = vstv %s1433_s27 }
 0x1f2   :  { %v1093_v58 = vsel %vm266_vm12, %v1090_v55, %v1092_v51  ;;  %v1198_v24 = vstv %s1434_s8 }
 0x1f3   :  { %v1096_v25 = vmul.f32 %v1095_v31, %v1093_v58  ;;  %v1100_v1 = vmul.f32 %v1099_v44, %v1093_v58  ;;  %v1104_v60 = vmul.f32 %v1103_v48, %v1093_v58  ;;  %v1156_v44 = vstv %s1429_s30 }
 0x1f4   :  { %v1174_v48 = vstv %s1431_s19 }
 0x1f5   :  { %v1109_v6 = vpop.permute.xlu1 %1108  ;;  %v1097_v36 = vadd.f32 %v1096_v25, %v1080_v43  ;;  %v1101_v39 = vadd.f32 %v1100_v1, %v1084_v35  ;;  %v1105_v30 = vadd.f32 %v1104_v60, %v1088_v20  ;;  %v1204_v25 = vstv %s1435_s5 }
 0x1f6   :  { %v1110_v46 = vsel %vm284_vm13, %v1107_v17, %v1109_v6  ;;  %v1213_v43 = vstv %s1436_s1 }
 0x1f7   :  { %v1113_v23 = vmul.f32 %v1112_v63, %v1110_v46  ;;  %v1117_v2 = vmul.f32 %v1116_v40, %v1110_v46  ;;  %v1121_v45 = vmul.f32 %v1120_v61, %v1110_v46 }
 0x1f9   :  { %v1126_v32 = vpop.permute.xlu1 %1125  ;;  %v1114_v29 = vadd.f32 %v1113_v23, %v1097_v36  ;;  %v1118_v34 = vadd.f32 %v1117_v2, %v1101_v39  ;;  %v1122_v12 = vadd.f32 %v1121_v45, %v1105_v30  ;;  %v1222_v45 = vstv %s1437_s24 }
 0x1fa   :  { %v1127_v7 = vsel %vm302_vm14, %v1124_v14, %v1126_v32 }
 0x1fb   :  { %v1130_v8 = vmul.f32 %v1129_v26, %v1127_v7  ;;  %v1134_v28 = vmul.f32 %v1133_v50, %v1127_v7  ;;  %v1138_v47 = vmul.f32 %v1137_v21, %v1127_v7 }
 0x1fd   :  { %v1131_v16 = vadd.f32 %v1130_v8, %v1114_v29  ;;  %v1135_v54 = vadd.f32 %v1134_v28, %v1118_v34  ;;  %v1139_v42 = vadd.f32 %v1138_v47, %v1122_v12 }
 0x1ff   :  { %1461 = vtanh.f32 %v1131_v16 }
 0x200   :  { %1463 = vtanh.f32 %v1135_v54 }
 0x201   :  { %1465 = vtanh.f32 %v1139_v42 }
 0x20c   :  { %v1462_v57 = vpop.eup %1461 }
 0x20d   :  { %v1464_v41 = vpop.eup %1463  ;;  %1141 = vst [vmem:[#allocation3] sm:$0xff] %v1462_v57  ;;  %1159 = vrot.lane.b32.xlu0 %v1462_v57, %s2953_s2  ;;  %v1157_v22 = vmul.f32 %v1462_v57, %v1156_v44 }
 0x20e   :  { %v1466_v11 = vpop.eup %1465  ;;  %1145 = vst [vmem:[#allocation3 + $0x10] sm:$0xff] %v1464_v41  ;;  %v1181_v27 = vmul.f32 %v1464_v41, %v1180_v62 }
 0x20f   :  { %1149 = vst [vmem:[#allocation3 + $0x20] sm:$0xff] %v1466_v11  ;;  %v1158_v59 = vadd.f32 %v1157_v22, %v1152_v56  ;;  %v1205_v35 = vmul.f32 %v1466_v11, %v1204_v25 }
 0x211   :  { %1168 = vrot.lane.b32.xlu0 %v1462_v57, %s2954_s6 }
 0x214   :  { %v1154_v0 = vld [vmem:[#allocation3 + $0x1] sm:$0xff] }
 0x215   :  { %1161 = vrot.lane.b32.xlu1 %v1154_v0, %s2953_s2  ;;  %1183 = vrot.lane.b32.xlu0 %v1464_v41, %s2953_s2  ;;  %v1178_v55 = vld [vmem:[#allocation3 + $0x11] sm:$0xff] }
 0x216   :  { %v1202_v13 = vld [vmem:[#allocation3 + $0x21] sm:$0xff] }
 0x219   :  { %1170 = vrot.lane.b32.xlu1 %v1154_v0, %s2954_s6  ;;  %1192 = vrot.lane.b32.xlu0 %v1464_v41, %s2954_s6 }
 0x21d   :  { %1185 = vrot.lane.b32.xlu1 %v1178_v55, %s2953_s2  ;;  %1207 = vrot.lane.b32.xlu0 %v1466_v11, %s2953_s2 }
 0x221   :  { %1194 = vrot.lane.b32.xlu1 %v1178_v55, %s2954_s6  ;;  %1216 = vrot.lane.b32.xlu0 %v1466_v11, %s2954_s6 }
 0x225   :  { %1209 = vrot.lane.b32.xlu1 %v1202_v13, %s2953_s2 }
 0x229   :  { %1218 = vrot.lane.b32.xlu1 %v1202_v13, %s2954_s6 }
 0x27f   :  { %v1160_v18 = vpop.permute.xlu0 %1159 }
 0x283   :  { %v1169_v31 = vpop.permute.xlu0 %1168 }
 0x287   :  { %v1162_v4 = vpop.permute.xlu1 %1161  ;;  %v1184_v52 = vpop.permute.xlu0 %1183 }
 0x288   :  { %v1163_v9 = vsel %vm50_vm0, %v1160_v18, %v1162_v4 }
 0x289   :  { %v1166_v19 = vmul.f32 %v1165_v38, %v1163_v9 }
 0x28b   :  { %v1171_v49 = vpop.permute.xlu1 %1170  ;;  %v1167_v63 = vadd.f32 %v1166_v19, %v1158_v59  ;;  %v1193_v53 = vpop.permute.xlu0 %1192 }
 0x28c   :  { %v1172_v51 = vsel %vm68_vm1, %v1169_v31, %v1171_v49 }
 0x28d   :  { %v1175_v3 = vmul.f32 %v1174_v48, %v1172_v51 }
 0x28f   :  { %v1176_v58 = vadd.f32 %v1175_v3, %v1167_v63  ;;  %v1186_v5 = vpop.permute.xlu1 %1185  ;;  %v1208_v6 = vpop.permute.xlu0 %1207 }
 0x290   :  { %v1187_v40 = vsel %vm50_vm0, %v1184_v52, %v1186_v5 }
 0x291   :  { %v1182_v61 = vadd.f32 %v1181_v27, %v1176_v58  ;;  %v1190_v17 = vmul.f32 %v1189_v37, %v1187_v40 }
 0x293   :  { %v1195_v15 = vpop.permute.xlu1 %1194  ;;  %v1191_v33 = vadd.f32 %v1190_v17, %v1182_v61  ;;  %v1217_v39 = vpop.permute.xlu0 %1216 }
 0x294   :  { %v1196_v1 = vsel %vm68_vm1, %v1193_v53, %v1195_v15 }
 0x295   :  { %v1199_v60 = vmul.f32 %v1198_v24, %v1196_v1 }
 0x297   :  { %v1200_v46 = vadd.f32 %v1199_v60, %v1191_v33  ;;  %v1210_v26 = vpop.permute.xlu1 %1209 }
 0x298   :  { %v1211_v20 = vsel %vm50_vm0, %v1208_v6, %v1210_v26 }
 0x299   :  { %v1206_v23 = vadd.f32 %v1205_v35, %v1200_v46  ;;  %v1214_v2 = vmul.f32 %v1213_v43, %v1211_v20 }
 0x29b   :  { %v1219_v36 = vpop.permute.xlu1 %1218  ;;  %v1215_v21 = vadd.f32 %v1214_v2, %v1206_v23 }
 0x29c   :  { %v1220_v50 = vsel %vm68_vm1, %v1217_v39, %v1219_v36 }
 0x29d   :  { %v1223_v30 = vmul.f32 %v1222_v45, %v1220_v50 }
 0x29f   :  { %v1224_v32 = vadd.f32 %v1223_v30, %v1215_v21 }
 0x2a1   :  { %1225 = vst [vmem:[%s2955_s29] sm:$0xff] %v1224_v32 }
 0x2a2   :  { %1230 = vsyncpa [#allocation5], 1 }

</bundles_post_ra>
